<compile_context>
chip_gen: v6e
topology: v6e:2x2x1
jax: 0.10.0
libtpu: 0.0.40
codegen_flags: <defaults>
</compile_context>

<pallas_src>
import jax
import jax.numpy as jnp
from jax.experimental import pallas as pl
from jax.experimental.pallas import tpu as pltpu


def _round_up(x, m):
    return ((x + m - 1) // m) * m


def value_fn_kernel(x_ref, w0_ref, b0_ref, w1_ref, b1_ref, w2_ref, b2_ref, o_ref):
    x = x_ref[...]  # (TB, S) f32

    # fc0 + ReLU: bf16 operands on the MXU, f32 accumulation, f32 elementwise.
    h0 = jnp.dot(x.astype(jnp.bfloat16), w0_ref[...],
                 preferred_element_type=jnp.float32)
    h0 = jnp.maximum(h0 + b0_ref[...], 0.0)          # (TB, 1024) f32

    # fc1 + ReLU
    h1 = jnp.dot(h0.astype(jnp.bfloat16), w1_ref[...],
                 preferred_element_type=jnp.float32)
    h1 = jnp.maximum(h1 + b1_ref[...], 0.0)          # (TB, 512) f32

    # fc2: (TB,512) x (512,1) as a VPU multiply + lane reduction
    # (w2 stored row-major as (1,512) f32); b2 is a scalar read from SMEM.
    y = jnp.sum(h1 * w2_ref[...], axis=-1, keepdims=True) + b2_ref[0, 0]  # (TB,1)

    o_ref[...] = y.astype(o_ref.dtype)


def value_function_forward(state, params, block_b=1024):
    """state: (B, S) float32.

    params: w0 (S,1024) bf16, b0 (1,1024) f32, w1 (1024,512) bf16,
            b1 (1,512) f32, w2 (1,512) f32, b2 (1,1) f32.
    Returns (B, 1) float32, matching nn.Linear(512, 1) output.
    """
    B, S = state.shape
    w0, b0 = params["w0"], params["b0"]
    w1, b1 = params["w1"], params["b1"]
    w2, b2 = params["w2"], params["b2"]

    # Batch tile selection:
    #   * B <= block_b  -> one grid step covering the (sublane-padded) batch.
    #   * otherwise     -> block_b-row tiles (clamped to 2048; see header).
    # Padding rows are zeros and get sliced off after the call (harmless
    # wasted MXU cycles when B is far from a multiple of tb).
    block_b = max(8, min(int(block_b), 2048))
    if B <= block_b:
        tb = _round_up(B, 8)                 # single grid step
    else:
        tb = _round_up(block_b, 8)
    b_pad = _round_up(B, tb)
    if b_pad != B:
        state = jnp.pad(state, ((0, b_pad - B), (0, 0)))
    grid = (b_pad // tb,)

    # VMEM footprint estimate: weights (worst case double-buffered) + streamed
    # tiles + ~10 KiB/row of f32/bf16 intermediates.  Only raise the scoped
    # VMEM limit when a large tile would bust v5e's 16 MiB default.
    weight_bytes = (int(w0.size) * w0.dtype.itemsize
                    + int(w1.size) * w1.dtype.itemsize
                    + (int(b0.size) + int(b1.size) + int(w2.size)) * 4)
    per_row_bytes = 2 * (S * 4 + 4) + 10 * 1024
    vmem_est = 2 * weight_bytes + tb * per_row_bytes
    compiler_kwargs = dict(dimension_semantics=("parallel",))
    if vmem_est > 14 * 1024 * 1024:
        compiler_kwargs["vmem_limit_bytes"] = min(60 * 1024 * 1024, 2 * vmem_est)

    # Weights/biases use block index (0, 0) for every grid step -> DMA'd once,
    # VMEM-resident across the whole batch sweep.
    def pinned(arr):
        return pl.BlockSpec(arr.shape, lambda i: (0, 0))

    out = pl.pallas_call(
        value_fn_kernel,
        out_shape=jax.ShapeDtypeStruct((b_pad, 1), jnp.float32),
        grid=grid,
        in_specs=[
            pl.BlockSpec((tb, S), lambda i: (i, 0)),             # streamed state tile
            pinned(w0), pinned(b0),
            pinned(w1), pinned(b1),
            pinned(w2),
            pl.BlockSpec(memory_space=pltpu.MemorySpace.SMEM),   # b2 scalar
        ],
        out_specs=pl.BlockSpec((tb, 1), lambda i: (i, 0)),
        compiler_params=pltpu.CompilerParams(**compiler_kwargs),
    )(state, w0, b0, w1, b1, w2, b2)

    return out[:B]


def init_params(key, state_size):
    """Deterministic init mimicking PyTorch nn.Linear defaults + fc2 override."""
    k0, k0b, k1, k1b, k2, k2b = jax.random.split(key, 6)

    def linear_init(kw, kb, fan_in, fan_out):
        bound = 1.0 / jnp.sqrt(fan_in)
        w = jax.random.uniform(kw, (fan_in, fan_out), jnp.float32, -bound, bound)
        b = jax.random.uniform(kb, (1, fan_out), jnp.float32, -bound, bound)
        return w, b

    w0, b0 = linear_init(k0, k0b, state_size, 1024)
    w1, b1 = linear_init(k1, k1b, 1024, 512)
    # fc2: uniform_(-init_w, init_w) with init_w = 0.003.  Stored as a (1,512)
    # row vector for the in-kernel VPU reduce (== (512,1) matmul).
    init_w = 0.003
    w2 = jax.random.uniform(k2, (1, 512), jnp.float32, -init_w, init_w)
    b2 = jax.random.uniform(k2b, (1, 1), jnp.float32, -init_w, init_w)
    return {
        "w0": w0.astype(jnp.bfloat16), "b0": b0,
        "w1": w1.astype(jnp.bfloat16), "b1": b1,
        "w2": w2, "b2": b2,
    }


if __name__ == "__main__":
    key = jax.random.PRNGKey(0)
    k_params, k_state = jax.random.split(key)

    B, STATE_SIZE = 256, 32
    params = init_params(k_params, STATE_SIZE)
    state = jax.random.normal(k_state, (B, STATE_SIZE), jnp.float32)

    # Default path: single grid step (tb = 256).
    out = value_function_forward(state, params)
    jax.block_until_ready(out)
    assert out.shape == (B, 1)

    # Pure-JAX reference with the same bf16-operand / f32-accumulate math
    # (bf16 weights are a deliberate deviation from the f32 PyTorch module).
    h0 = jnp.maximum(jnp.dot(state.astype(jnp.bfloat16), params["w0"],
                             preferred_element_type=jnp.float32) + params["b0"], 0.0)
    h1 = jnp.maximum(jnp.dot(h0.astype(jnp.bfloat16), params["w1"],
                             preferred_element_type=jnp.float32) + params["b1"], 0.0)
    ref = jnp.sum(h1 * params["w2"], axis=-1, keepdims=True) + params["b2"]

    assert jnp.allclose(out, ref, atol=5e-3, rtol=5e-3), (
        float(jnp.max(jnp.abs(out - ref))))

    # Also exercise the multi-step (streamed batch) path: 2 grid steps of 128.
    out_multi = value_function_forward(state, params, block_b=128)
    jax.block_until_ready(out_multi)
    assert jnp.allclose(out_multi, ref, atol=5e-3, rtol=5e-3), (
        float(jnp.max(jnp.abs(out_multi - ref))))

    print("KERNEL_OK")
</pallas_src>

<mosaic_0001>
module attributes {stable_mosaic.version = 11 : i64} {
  func.func @value_fn_kernel(%arg0: i32, %arg1: memref<256x32xf32, #tpu.memory_space<vmem>>, %arg2: memref<32x1024xbf16, #tpu.memory_space<vmem>>, %arg3: memref<1x1024xf32, #tpu.memory_space<vmem>>, %arg4: memref<1024x512xbf16, #tpu.memory_space<vmem>>, %arg5: memref<1x512xf32, #tpu.memory_space<vmem>>, %arg6: memref<1x512xf32, #tpu.memory_space<vmem>>, %arg7: memref<1x1xf32, #tpu.memory_space<smem>>, %arg8: memref<256x1xf32, #tpu.memory_space<vmem>>) attributes {dimension_semantics = [#tpu.dimension_semantics<parallel>], iteration_bounds = array<i64: 1>, scalar_prefetch = 0 : i64, scratch_operands = 0 : i64, tpu.core_type = #tpu.core_type<tc>, window_params = [{transform_indices = @transform_0, window_bounds = array<i64: 256, 32>}, {pipeline_mode = #tpu.pipeline_mode<synchronous>, transform_indices = @transform_1, window_bounds = array<i64: 32, 1024>}, {pipeline_mode = #tpu.pipeline_mode<synchronous>, transform_indices = @transform_2, window_bounds = array<i64: 1, 1024>}, {pipeline_mode = #tpu.pipeline_mode<synchronous>, transform_indices = @transform_3, window_bounds = array<i64: 1024, 512>}, {pipeline_mode = #tpu.pipeline_mode<synchronous>, transform_indices = @transform_4, window_bounds = array<i64: 1, 512>}, {pipeline_mode = #tpu.pipeline_mode<synchronous>, transform_indices = @transform_5, window_bounds = array<i64: 1, 512>}, {transform_indices = @transform_6, window_bounds = array<i64: 1, 1>}, {transform_indices = @transform_7, window_bounds = array<i64: 256, 1>}]} {
    %c0 = arith.constant 0 : index
    %c0_0 = arith.constant 0 : index
    %0 = vector.load %arg1[%c0, %c0_0] : memref<256x32xf32, #tpu.memory_space<vmem>>, vector<256x32xf32>
    %1 = arith.truncf %0 : vector<256x32xf32> to vector<256x32xbf16>
    %c0_1 = arith.constant 0 : index
    %c0_2 = arith.constant 0 : index
    %2 = vector.load %arg2[%c0_1, %c0_2] : memref<32x1024xbf16, #tpu.memory_space<vmem>>, vector<32x1024xbf16>
    %cst = arith.constant dense<0.000000e+00> : vector<256x1024xf32>
    %3 = tpu.matmul %1, %2, %cst {dimension_numbers = #tpu.dot_dimension_numbers<[1], [0], [0], [1], [0, 0, 1, 1], [], []>} : vector<256x32xbf16>, vector<32x1024xbf16>, vector<256x1024xf32> -> vector<256x1024xf32>
    %c0_3 = arith.constant 0 : index
    %c0_4 = arith.constant 0 : index
    %4 = vector.load %arg3[%c0_3, %c0_4] : memref<1x1024xf32, #tpu.memory_space<vmem>>, vector<1x1024xf32>
    %5 = vector.broadcast %4 : vector<1x1024xf32> to vector<256x1024xf32>
    %6 = arith.addf %3, %5 : vector<256x1024xf32>
    %cst_5 = arith.constant 0.000000e+00 : f32
    %7 = vector.broadcast %cst_5 : f32 to vector<256x1024xf32>
    %8 = arith.maximumf %6, %7 : vector<256x1024xf32>
    %9 = arith.truncf %8 : vector<256x1024xf32> to vector<256x1024xbf16>
    %c0_6 = arith.constant 0 : index
    %c0_7 = arith.constant 0 : index
    %10 = vector.load %arg4[%c0_6, %c0_7] : memref<1024x512xbf16, #tpu.memory_space<vmem>>, vector<1024x512xbf16>
    %cst_8 = arith.constant dense<0.000000e+00> : vector<256x512xf32>
    %11 = tpu.matmul %9, %10, %cst_8 {dimension_numbers = #tpu.dot_dimension_numbers<[1], [0], [0], [1], [0, 0, 1, 1], [], []>} : vector<256x1024xbf16>, vector<1024x512xbf16>, vector<256x512xf32> -> vector<256x512xf32>
    %c0_9 = arith.constant 0 : index
    %c0_10 = arith.constant 0 : index
    %12 = vector.load %arg5[%c0_9, %c0_10] : memref<1x512xf32, #tpu.memory_space<vmem>>, vector<1x512xf32>
    %13 = vector.broadcast %12 : vector<1x512xf32> to vector<256x512xf32>
    %14 = arith.addf %11, %13 : vector<256x512xf32>
    %cst_11 = arith.constant 0.000000e+00 : f32
    %15 = vector.broadcast %cst_11 : f32 to vector<256x512xf32>
    %16 = arith.maximumf %14, %15 : vector<256x512xf32>
    %c0_12 = arith.constant 0 : index
    %c0_13 = arith.constant 0 : index
    %17 = vector.load %arg6[%c0_12, %c0_13] : memref<1x512xf32, #tpu.memory_space<vmem>>, vector<1x512xf32>
    %18 = vector.broadcast %17 : vector<1x512xf32> to vector<256x512xf32>
    %19 = arith.mulf %16, %18 : vector<256x512xf32>
    %cst_14 = arith.constant dense<0.000000e+00> : vector<256xf32>
    %20 = vector.multi_reduction <add>, %19, %cst_14 [1] : vector<256x512xf32> to vector<256xf32>
    %21 = vector.shape_cast %20 : vector<256xf32> to vector<256x1xf32>
    %c0_15 = arith.constant 0 : index
    %c0_16 = arith.constant 0 : index
    %22 = memref.load %arg7[%c0_15, %c0_16] : memref<1x1xf32, #tpu.memory_space<smem>>
    %23 = vector.broadcast %22 : f32 to vector<256x1xf32>
    %24 = arith.addf %21, %23 : vector<256x1xf32>
    %c0_17 = arith.constant 0 : index
    %c0_18 = arith.constant 0 : index
    %25 = vector.load %arg8[%c0_17, %c0_18] : memref<256x1xf32, #tpu.memory_space<vmem>>, vector<256x1xf32>
    tpu.vector_store %arg8[%c0_17, %c0_18], %24 {strides = array<i32>} : memref<256x1xf32, #tpu.memory_space<vmem>>, vector<256x1xf32>,
    return
  }
  func.func @transform_0(%arg0: i32) -> (i32, i32) {
    %c0_i32 = arith.constant 0 : i32
    %c0_i32_0 = arith.constant 0 : i32
    return %arg0, %c0_i32 : i32, i32
  }
  func.func @transform_1(%arg0: i32) -> (i32, i32) {
    %c0_i32 = arith.constant 0 : i32
    %c0_i32_0 = arith.constant 0 : i32
    %c0_i32_1 = arith.constant 0 : i32
    return %c0_i32, %c0_i32_0 : i32, i32
  }
  func.func @transform_2(%arg0: i32) -> (i32, i32) {
    %c0_i32 = arith.constant 0 : i32
    %c0_i32_0 = arith.constant 0 : i32
    %c0_i32_1 = arith.constant 0 : i32
    return %c0_i32, %c0_i32_0 : i32, i32
  }
  func.func @transform_3(%arg0: i32) -> (i32, i32) {
    %c0_i32 = arith.constant 0 : i32
    %c0_i32_0 = arith.constant 0 : i32
    %c0_i32_1 = arith.constant 0 : i32
    return %c0_i32, %c0_i32_0 : i32, i32
  }
  func.func @transform_4(%arg0: i32) -> (i32, i32) {
    %c0_i32 = arith.constant 0 : i32
    %c0_i32_0 = arith.constant 0 : i32
    %c0_i32_1 = arith.constant 0 : i32
    return %c0_i32, %c0_i32_0 : i32, i32
  }
  func.func @transform_5(%arg0: i32) -> (i32, i32) {
    %c0_i32 = arith.constant 0 : i32
    %c0_i32_0 = arith.constant 0 : i32
    %c0_i32_1 = arith.constant 0 : i32
    return %c0_i32, %c0_i32_0 : i32, i32
  }
  func.func @transform_6(%arg0: i32) -> (i32, i32) {
    %c0_i32 = arith.constant 0 : i32
    %c0_i32_0 = arith.constant 0 : i32
    %c0_i32_1 = arith.constant 0 : i32
    return %c0_i32, %c0_i32_0 : i32, i32
  }
  func.func @transform_7(%arg0: i32) -> (i32, i32) {
    %c0_i32 = arith.constant 0 : i32
    %c0_i32_0 = arith.constant 0 : i32
    return %arg0, %c0_i32 : i32, i32
  }
}

</mosaic_0001>

<bundles_post_ra>
// kernel: tpu_custom_call.1
= control target key start
LH: loop header
LB: loop body
LE: loop exit
PB: predicated region body
PF: predicated region fallthrough
CT: control target
= control target key end

     0   :  { %13 = vsyncpa [#allocation4], 0  ;;  %s5794_s24 = smov [#allocation3]   ;;  %s8726_s0 = inlined_call_operand.vmem [shape: f32[256,32], index: 0, kind: input, shape index: {}]   ;;  %s8727_s1 = inlined_call_operand.vmem [shape: bf16[32,1024], index: 1, kind: input, shape index: {}]   ;;  %s8728_s2 = inlined_call_operand.vmem [shape: f32[1,1024], index: 2, kind: input, shape index: {}]   ;;  %s8729_s3 = inlined_call_operand.hbm [shape: bf16[1024,512], index: 3, kind: input, shape index: {}]   ;;  %s8730_s4 = inlined_call_operand.vmem [shape: f32[1,512], index: 4, kind: input, shape index: {}]   ;;  %s8731_s5 = inlined_call_operand.vmem [shape: f32[1,512], index: 5, kind: input, shape index: {}]   ;;  %s8732_s6 = inlined_call_operand.<no memory space> [shape: f32[1,1], index: 6, kind: input, shape index: {}]   ;;  %s8733_s7 = inlined_call_operand.vmem [shape: f32[256,1], index: 7, kind: output, shape index: {}]  }
   0x1   :  { %s25_s25 = sshll.u32 %s5794_s24, 4  ;;  %s26_s25 = int_to_ptr.vmem [resolvable:$true] %s25_s25 }
   0x2   :  { %s5780_s26 = scalar_lea.vmem %s26_s25, 32768  ;;  %p5785_p1 = scmp.lt.s32.totalorder %s26_s25, %s26_s25 }
   0x3   :  { %p5781_p0 = scmp.ne.s32.totalorder %s26_s25, %s5780_s26  ;;  %p5786_p2 = scmp.lt.s32.totalorder %s5780_s26, %s5780_s26 }
   0x5   :  { %p5787_p3 = por %p5786_p2, %p5785_p1 }
   0x7   :  { %p5788_p4 = pnand %p5787_p3, %p5781_p0 }
   0x9   :  { %5791 = shalt.err (!%p5788_p4)
}
   0xa   :  { %s5795_s27 = smov 256   ;;  %s5796_s28 = smov 16  }
   0xb   :  { %31 = dma.hbm_to_vmem [thread:$0]  %s8729_s3, 32768, %s26_s25, [#allocation4], %s5795_s27, %s5795_s27, %s5796_s28  }
   0xc   :  { %5792 = dma.done.wait [#allocation4], 32768  }
   0xd   :  { %5793 = vsyncadd [#allocation4], 4294934528  ;;  %v5797_v0 = vmov 0   ;;  %v98_v1 = vld [vmem:[%s8727_s1 + $0x40] sm:$0xff]  ;;  %v99_v3 = vld [vmem:[%s8727_s1 + $0x48] sm:$0xff]  ;;  %vm228_vm0 = vcmask 261120  }
   0xe   :  { %309 = vmatprep.mubr.bf16.mxu0 %v5797_v0  ;;  %502 = vmatprep.mubr.bf16.mxu1 %v5797_v0  ;;  %v102_v2 = vld [vmem:[%s8727_s1 + $0x60] sm:$0xff]  ;;  %v103_v5 = vld [vmem:[%s8727_s1 + $0x68] sm:$0xff]  ;;  %v100_v16 = vld [vmem:[%s8727_s1 + $0x50] sm:$0xff]  ;;  %vm5007_vm1 = vcmask 7168  }
   0xf   :  { %v5054_v4 = vcombine.high %v98_v1, %v102_v2  ;;  %v5053_v6 = vcombine.low %v98_v1, %v102_v2  ;;  %v90_v7 = vld [vmem:[%s8727_s1] sm:$0xff]  ;;  %v5056_v9 = vcombine.high %v99_v3, %v103_v5  ;;  %v5055_v10 = vcombine.low %v99_v3, %v103_v5  ;;  %v91_v12 = vld [vmem:[%s8727_s1 + $0x8] sm:$0xff]  ;;  %v104_v17 = vld [vmem:[%s8727_s1 + $0x70] sm:$0xff] }
  0x10   :  { %v94_v8 = vld [vmem:[%s8727_s1 + $0x20] sm:$0xff]  ;;  %v95_v13 = vld [vmem:[%s8727_s1 + $0x28] sm:$0xff]  ;;  %v101_v20 = vld [vmem:[%s8727_s1 + $0x58] sm:$0xff]  ;;  %v5058_v23 = vcombine.high %v100_v16, %v104_v17  ;;  %v5057_v26 = vcombine.low %v100_v16, %v104_v17 }
  0x11   :  { %v5046_v11 = vcombine.high %v90_v7, %v94_v8  ;;  %289 = vmatprep.subr.bf16.mxu0 %v5054_v4  ;;  %v5048_v14 = vcombine.high %v91_v12, %v95_v13  ;;  %v42_v15 = vld [vmem:[%s8726_s0] sm:$0xff]  ;;  %482 = vmatprep.subr.bf16.mxu1 %v5056_v9  ;;  %v5045_v18 = vcombine.low %v90_v7, %v94_v8  ;;  %v43_v19 = vld [vmem:[%s8726_s0 + $0x8] sm:$0xff]  ;;  %v105_v21 = vld [vmem:[%s8727_s1 + $0x78] sm:$0xff] }
  0x12   :  { %290 = vmatpush1.bf16.msra.mxu0 %v5053_v6  ;;  %483 = vmatpush1.bf16.msra.mxu1 %v5055_v10  ;;  %v5047_v22 = vcombine.low %v91_v12, %v95_v13  ;;  %v5060_v24 = vcombine.high %v101_v20, %v105_v21  ;;  %v5885_v25 = vpack.c.bf16 %v43_v19, %v42_v15  ;;  %v92_v28 = vld [vmem:[%s8727_s1 + $0x10] sm:$0xff]  ;;  %v93_v30 = vld [vmem:[%s8727_s1 + $0x18] sm:$0xff]  ;;  %v46_v41 = vld [vmem:[%s8726_s0 + $0x20] sm:$0xff] }
  0x13   :  { %291 = vmatprep.subr.bf16.mxu0 %v5046_v11  ;;  %484 = vmatprep.subr.bf16.mxu1 %v5048_v14  ;;  %v5059_v27 = vcombine.low %v101_v20, %v105_v21  ;;  %v96_v29 = vld [vmem:[%s8727_s1 + $0x30] sm:$0xff]  ;;  %v97_v32 = vld [vmem:[%s8727_s1 + $0x38] sm:$0xff]  ;;  %v47_v42 = vld [vmem:[%s8726_s0 + $0x28] sm:$0xff] }
  0x14   :  { %v5050_v31 = vcombine.high %v92_v28, %v96_v29  ;;  %v44_v33 = vld [vmem:[%s8726_s0 + $0x10] sm:$0xff]  ;;  %v45_v34 = vld [vmem:[%s8726_s0 + $0x18] sm:$0xff]  ;;  %v5049_v35 = vcombine.low %v92_v28, %v96_v29  ;;  %v5052_v36 = vcombine.high %v93_v30, %v97_v32  ;;  %v5051_v37 = vcombine.low %v93_v30, %v97_v32  ;;  %v50_v47 = vld [vmem:[%s8726_s0 + $0x40] sm:$0xff] }
  0x15   :  { %v5911_v38 = vpack.c.bf16 %v45_v34, %v44_v33  ;;  %v5387_v39 = vld [vmem:[#allocation3 + $0xe4] ss:$16 sps:$4 sm:$0xff]   ;;  %v5925_v43 = vpack.c.bf16 %v47_v42, %v46_v41  ;;  %v49_v45 = vld [vmem:[%s8726_s0 + $0x38] sm:$0xff]  ;;  %v51_v48 = vld [vmem:[%s8726_s0 + $0x48] sm:$0xff] }
  0x16   :  { %292 = vmatpush1.bf16.msra.mxu0 %v5045_v18  ;;  %485 = vmatpush1.bf16.msra.mxu1 %v5047_v22  ;;  %v5390_v40 = vld [vmem:[#allocation3 + $0x2e4] ss:$16 sps:$4 sm:$0xff]   ;;  %v5953_v49 = vpack.c.bf16 %v51_v48, %v50_v47  ;;  %v53_v51 = vld [vmem:[%s8726_s0 + $0x58] sm:$0xff]  ;;  %v55_v54 = vld [vmem:[%s8726_s0 + $0x68] sm:$0xff] }
  0x17   :  { %675 = vmatprep.subr.bf16.mxu0 %v5058_v23  ;;  %868 = vmatprep.subr.bf16.mxu1 %v5060_v24  ;;  %v48_v44 = vld [vmem:[%s8726_s0 + $0x30] sm:$0xff]  ;;  %v54_v53 = vld [vmem:[%s8726_s0 + $0x60] sm:$0xff]  ;;  %v57_v57 = vld [vmem:[%s8726_s0 + $0x78] sm:$0xff] }
  0x18   :  { %v5939_v46 = vpack.c.bf16 %v49_v45, %v48_v44  ;;  %v52_v50 = vld [vmem:[%s8726_s0 + $0x50] sm:$0xff]  ;;  %v5981_v55 = vpack.c.bf16 %v55_v54, %v54_v53  ;;  %v58_v59 = vld [vmem:[%s8726_s0 + $0x80] sm:$0xff]  ;;  %v59_v60 = vld [vmem:[%s8726_s0 + $0x88] sm:$0xff] }
  0x19   :  { %5061 = vmatmul.mubr.msk.bf16.vlgmr.msra.gmra.mxu0 %vm228_vm0, %v5885_v25  ;;  %5077 = vmatmul.mubr.msk.bf16.vlgmr.msra.gmra.mxu1 %vm228_vm0, %v5885_v25  ;;  %v5967_v52 = vpack.c.bf16 %v53_v51, %v52_v50  ;;  %v56_v56 = vld [vmem:[%s8726_s0 + $0x70] sm:$0xff]  ;;  %v6009_v61 = vpack.c.bf16 %v59_v60, %v58_v59  ;;  %v61_v63 = vld [vmem:[%s8726_s0 + $0x98] sm:$0xff]  ;;  %v62_v2 = vld [vmem:[%s8726_s0 + $0xa0] sm:$0xff] }
  0x1a   :  { %676 = vmatpush1.bf16.msra.mxu0 %v5057_v26  ;;  %869 = vmatpush1.bf16.msra.mxu1 %v5059_v27  ;;  %v5995_v58 = vpack.c.bf16 %v57_v57, %v56_v56  ;;  %v60_v62 = vld [vmem:[%s8726_s0 + $0x90] sm:$0xff]  ;;  %v63_v3 = vld [vmem:[%s8726_s0 + $0xa8] sm:$0xff]  ;;  %v65_v6 = vld [vmem:[%s8726_s0 + $0xb8] sm:$0xff] }
  0x1b   :  { %319 = vmatprep.mubr.bf16.mxu0 %v5797_v0  ;;  %512 = vmatprep.mubr.bf16.mxu1 %v5797_v0  ;;  %v6023_v1 = vpack.c.bf16 %v61_v63, %v60_v62  ;;  %v6037_v4 = vpack.c.bf16 %v63_v3, %v62_v2  ;;  %v64_v5 = vld [vmem:[%s8726_s0 + $0xb0] sm:$0xff]  ;;  %v66_v8 = vld [vmem:[%s8726_s0 + $0xc0] sm:$0xff]  ;;  %v67_v9 = vld [vmem:[%s8726_s0 + $0xc8] sm:$0xff] }
  0x1c   :  { %677 = vmatprep.subr.bf16.mxu0 %v5050_v31  ;;  %870 = vmatprep.subr.bf16.mxu1 %v5052_v36  ;;  %v6051_v7 = vpack.c.bf16 %v65_v6, %v64_v5  ;;  %v6065_v10 = vpack.c.bf16 %v67_v9, %v66_v8  ;;  %v68_v11 = vld [vmem:[%s8726_s0 + $0xd0] sm:$0xff]  ;;  %v69_v12 = vld [vmem:[%s8726_s0 + $0xd8] sm:$0xff]  ;;  %v70_v14 = vld [vmem:[%s8726_s0 + $0xe0] sm:$0xff] }
  0x1d   :  { %v6079_v13 = vpack.c.bf16 %v69_v12, %v68_v11  ;;  %v71_v15 = vld [vmem:[%s8726_s0 + $0xe8] sm:$0xff]  ;;  %v72_v17 = vld [vmem:[%s8726_s0 + $0xf0] sm:$0xff]  ;;  %v73_v18 = vld [vmem:[%s8726_s0 + $0xf8] sm:$0xff] }
  0x1e   :  { %678 = vmatpush1.bf16.msra.mxu0 %v5049_v35  ;;  %871 = vmatpush1.bf16.msra.mxu1 %v5051_v37  ;;  %v6093_v16 = vpack.c.bf16 %v71_v15, %v70_v14  ;;  %v6107_v19 = vpack.c.bf16 %v73_v18, %v72_v17  ;;  %v5385_v20 = vld [vmem:[#allocation3 + $0xe0] ss:$16 sps:$4 sm:$0xff]   ;;  %v5393_v22 = vld [vmem:[#allocation3 + $0xc4] ss:$16 sps:$4 sm:$0xff]  }
  0x1f   :  { %2991 = vmatprep.subr.bf16.mxu0 %v5387_v39  ;;  %3184 = vmatprep.subr.bf16.mxu1 %v5390_v40  ;;  %v5388_v21 = vld [vmem:[#allocation3 + $0x2e0] ss:$16 sps:$4 sm:$0xff]   ;;  %v5396_v23 = vld [vmem:[#allocation3 + $0x2c4] ss:$16 sps:$4 sm:$0xff]  }
  0x20   :  { %v5391_v24 = vld [vmem:[#allocation3 + $0xc0] ss:$16 sps:$4 sm:$0xff]   ;;  %v5399_v27 = vld [vmem:[#allocation3 + $0xa4] ss:$16 sps:$4 sm:$0xff]  }
  0x21   :  { %5062 = vmatmul.mubr.msk.bf16.gmra.mxu0 %vm228_vm0, %v5911_v38  ;;  %5078 = vmatmul.mubr.msk.bf16.gmra.mxu1 %vm228_vm0, %v5911_v38  ;;  %v5394_v26 = vld [vmem:[#allocation3 + $0x2c0] ss:$16 sps:$4 sm:$0xff]   ;;  %v5402_v28 = vld [vmem:[#allocation3 + $0x2a4] ss:$16 sps:$4 sm:$0xff]  }
  0x22   :  { %329 = vmatprep.mubr.bf16.mxu0 %v5797_v0  ;;  %522 = vmatprep.mubr.bf16.mxu1 %v5797_v0  ;;  %v5397_v29 = vld [vmem:[#allocation3 + $0xa0] ss:$16 sps:$4 sm:$0xff]   ;;  %v5405_v31 = vld [vmem:[#allocation3 + $0x84] ss:$16 sps:$4 sm:$0xff]  }
  0x23   :  { %v5400_v30 = vld [vmem:[#allocation3 + $0x2a0] ss:$16 sps:$4 sm:$0xff]   ;;  %v5411_v34 = vld [vmem:[#allocation3 + $0x64] ss:$16 sps:$4 sm:$0xff]  }
  0x24   :  { %v5403_v32 = vld [vmem:[#allocation3 + $0x80] ss:$16 sps:$4 sm:$0xff]   ;;  %v5414_v35 = vld [vmem:[#allocation3 + $0x264] ss:$16 sps:$4 sm:$0xff]  }
  0x25   :  { %v5406_v33 = vld [vmem:[#allocation3 + $0x280] ss:$16 sps:$4 sm:$0xff]   ;;  %v5417_v39 = vld [vmem:[#allocation3 + $0x44] ss:$16 sps:$4 sm:$0xff]  }
  0x26   :  { %v5409_v36 = vld [vmem:[#allocation3 + $0x60] ss:$16 sps:$4 sm:$0xff]   ;;  %v5423_v42 = vld [vmem:[#allocation3 + $0x24] ss:$16 sps:$4 sm:$0xff]  }
  0x27   :  { %v5412_v37 = vld [vmem:[#allocation3 + $0x260] ss:$16 sps:$4 sm:$0xff]   ;;  %v5426_v44 = vld [vmem:[#allocation3 + $0x224] ss:$16 sps:$4 sm:$0xff]  }
  0x28   :  { %v5415_v40 = vld [vmem:[#allocation3 + $0x40] ss:$16 sps:$4 sm:$0xff]   ;;  %v5429_v48 = vld [vmem:[#allocation3 + $0x4] ss:$16 sps:$4 sm:$0xff]  }
  0x29   :  { %5063 = vmatmul.mubr.msk.bf16.gmra.mxu0 %vm228_vm0, %v5925_v43  ;;  %5079 = vmatmul.mubr.msk.bf16.gmra.mxu1 %vm228_vm0, %v5925_v43  ;;  %v5418_v41 = vld [vmem:[#allocation3 + $0x240] ss:$16 sps:$4 sm:$0xff]   ;;  %v5435_v53 = vld [vmem:[#allocation3 + $0x1e4] ss:$16 sps:$4 sm:$0xff]  }
  0x2a   :  { %339 = vmatprep.mubr.bf16.mxu0 %v5797_v0  ;;  %532 = vmatprep.mubr.bf16.mxu1 %v5797_v0  ;;  %v5421_v45 = vld [vmem:[#allocation3 + $0x20] ss:$16 sps:$4 sm:$0xff]   ;;  %v5438_v54 = vld [vmem:[#allocation3 + $0x3e4] ss:$16 sps:$4 sm:$0xff]  }
  0x2b   :  { %v5424_v47 = vld [vmem:[#allocation3 + $0x220] ss:$16 sps:$4 sm:$0xff]   ;;  %v5441_v59 = vld [vmem:[#allocation3 + $0x1c4] ss:$16 sps:$4 sm:$0xff]  }
  0x2c   :  { %v5427_v50 = vld [vmem:[#allocation3] ss:$16 sps:$4 sm:$0xff]   ;;  %v5447_v63 = vld [vmem:[#allocation3 + $0x1a4] ss:$16 sps:$4 sm:$0xff]  }
  0x2d   :  { %v5430_v51 = vld [vmem:[#allocation3 + $0x200] ss:$16 sps:$4 sm:$0xff]   ;;  %v5450_v2 = vld [vmem:[#allocation3 + $0x3a4] ss:$16 sps:$4 sm:$0xff]  }
  0x2e   :  { %v5433_v56 = vld [vmem:[#allocation3 + $0x1e0] ss:$16 sps:$4 sm:$0xff]   ;;  %v5453_v6 = vld [vmem:[#allocation3 + $0x184] ss:$16 sps:$4 sm:$0xff]  }
  0x2f   :  { %v5436_v57 = vld [vmem:[#allocation3 + $0x3e0] ss:$16 sps:$4 sm:$0xff]   ;;  %v5459_v11 = vld [vmem:[#allocation3 + $0x164] ss:$16 sps:$4 sm:$0xff]  }
  0x30   :  { %v5439_v60 = vld [vmem:[#allocation3 + $0x1c0] ss:$16 sps:$4 sm:$0xff]   ;;  %v5462_v12 = vld [vmem:[#allocation3 + $0x364] ss:$16 sps:$4 sm:$0xff]  }
  0x31   :  { %5064 = vmatmul.mubr.msk.bf16.gmra.mxu0 %vm228_vm0, %v5939_v46  ;;  %5080 = vmatmul.mubr.msk.bf16.gmra.mxu1 %vm228_vm0, %v5939_v46  ;;  %v5442_v62 = vld [vmem:[#allocation3 + $0x3c0] ss:$16 sps:$4 sm:$0xff]   ;;  %v5465_v17 = vld [vmem:[#allocation3 + $0x144] ss:$16 sps:$4 sm:$0xff]  }
  0x32   :  { %349 = vmatprep.mubr.bf16.mxu0 %v5797_v0  ;;  %542 = vmatprep.mubr.bf16.mxu1 %v5797_v0  ;;  %v5445_v3 = vld [vmem:[#allocation3 + $0x1a0] ss:$16 sps:$4 sm:$0xff]  }
  0x33   :  { %v5448_v5 = vld [vmem:[#allocation3 + $0x3a0] ss:$16 sps:$4 sm:$0xff]  }
  0x34   :  { %v5451_v8 = vld [vmem:[#allocation3 + $0x180] ss:$16 sps:$4 sm:$0xff]  }
  0x35   :  { %v5454_v9 = vld [vmem:[#allocation3 + $0x380] ss:$16 sps:$4 sm:$0xff]  }
  0x36   :  { %v5457_v14 = vld [vmem:[#allocation3 + $0x160] ss:$16 sps:$4 sm:$0xff]  }
  0x37   :  { %v5460_v15 = vld [vmem:[#allocation3 + $0x360] ss:$16 sps:$4 sm:$0xff]  }
  0x38   :  { %v5463_v18 = vld [vmem:[#allocation3 + $0x140] ss:$16 sps:$4 sm:$0xff]  }
  0x39   :  { %5065 = vmatmul.mubr.msk.bf16.gmra.mxu0 %vm228_vm0, %v5953_v49  ;;  %5081 = vmatmul.mubr.msk.bf16.gmra.mxu1 %vm228_vm0, %v5953_v49 }
  0x3a   :  { %359 = vmatprep.mubr.bf16.mxu0 %v5797_v0  ;;  %552 = vmatprep.mubr.bf16.mxu1 %v5797_v0 }
  0x41   :  { %5066 = vmatmul.mubr.msk.bf16.gmra.mxu0 %vm228_vm0, %v5967_v52  ;;  %5082 = vmatmul.mubr.msk.bf16.gmra.mxu1 %vm228_vm0, %v5967_v52 }
  0x42   :  { %369 = vmatprep.mubr.bf16.mxu0 %v5797_v0  ;;  %562 = vmatprep.mubr.bf16.mxu1 %v5797_v0 }
  0x49   :  { %5067 = vmatmul.mubr.msk.bf16.gmra.mxu0 %vm228_vm0, %v5981_v55  ;;  %5083 = vmatmul.mubr.msk.bf16.gmra.mxu1 %vm228_vm0, %v5981_v55 }
  0x4a   :  { %379 = vmatprep.mubr.bf16.mxu0 %v5797_v0  ;;  %572 = vmatprep.mubr.bf16.mxu1 %v5797_v0 }
  0x51   :  { %5068 = vmatmul.mubr.msk.bf16.gmra.mxu0 %vm228_vm0, %v5995_v58  ;;  %5084 = vmatmul.mubr.msk.bf16.gmra.mxu1 %vm228_vm0, %v5995_v58 }
  0x52   :  { %389 = vmatprep.mubr.bf16.mxu0 %v5797_v0  ;;  %582 = vmatprep.mubr.bf16.mxu1 %v5797_v0 }
  0x59   :  { %5069 = vmatmul.mubr.msk.bf16.gmra.mxu0 %vm228_vm0, %v6009_v61  ;;  %5085 = vmatmul.mubr.msk.bf16.gmra.mxu1 %vm228_vm0, %v6009_v61 }
  0x5a   :  { %399 = vmatprep.mubr.bf16.mxu0 %v5797_v0  ;;  %592 = vmatprep.mubr.bf16.mxu1 %v5797_v0 }
  0x61   :  { %5070 = vmatmul.mubr.msk.bf16.gmra.mxu0 %vm228_vm0, %v6023_v1  ;;  %5086 = vmatmul.mubr.msk.bf16.gmra.mxu1 %vm228_vm0, %v6023_v1 }
  0x62   :  { %409 = vmatprep.mubr.bf16.mxu0 %v5797_v0  ;;  %602 = vmatprep.mubr.bf16.mxu1 %v5797_v0 }
  0x69   :  { %5071 = vmatmul.mubr.msk.bf16.gmra.mxu0 %vm228_vm0, %v6037_v4  ;;  %5087 = vmatmul.mubr.msk.bf16.gmra.mxu1 %vm228_vm0, %v6037_v4 }
  0x6a   :  { %419 = vmatprep.mubr.bf16.mxu0 %v5797_v0  ;;  %612 = vmatprep.mubr.bf16.mxu1 %v5797_v0 }
  0x71   :  { %5072 = vmatmul.mubr.msk.bf16.gmra.mxu0 %vm228_vm0, %v6051_v7  ;;  %5088 = vmatmul.mubr.msk.bf16.gmra.mxu1 %vm228_vm0, %v6051_v7 }
  0x72   :  { %429 = vmatprep.mubr.bf16.mxu0 %v5797_v0  ;;  %622 = vmatprep.mubr.bf16.mxu1 %v5797_v0 }
  0x79   :  { %5073 = vmatmul.mubr.msk.bf16.gmra.mxu0 %vm228_vm0, %v6065_v10  ;;  %5089 = vmatmul.mubr.msk.bf16.gmra.mxu1 %vm228_vm0, %v6065_v10 }
  0x7a   :  { %439 = vmatprep.mubr.bf16.mxu0 %v5797_v0  ;;  %632 = vmatprep.mubr.bf16.mxu1 %v5797_v0 }
  0x81   :  { %5074 = vmatmul.mubr.msk.bf16.gmra.mxu0 %vm228_vm0, %v6079_v13  ;;  %5090 = vmatmul.mubr.msk.bf16.gmra.mxu1 %vm228_vm0, %v6079_v13 }
  0x82   :  { %449 = vmatprep.mubr.bf16.mxu0 %v5797_v0  ;;  %642 = vmatprep.mubr.bf16.mxu1 %v5797_v0 }
  0x89   :  { %5075 = vmatmul.mubr.msk.bf16.gmra.mxu0 %vm228_vm0, %v6093_v16  ;;  %5091 = vmatmul.mubr.msk.bf16.gmra.mxu1 %vm228_vm0, %v6093_v16 }
  0x8a   :  { %459 = vmatprep.mubr.bf16.mxu0 %v5797_v0  ;;  %652 = vmatprep.mubr.bf16.mxu1 %v5797_v0 }
  0x91   :  { %5076 = vmatmul.mubr.msk.bf16.gmra.mxu0 %vm228_vm0, %v6107_v19  ;;  %5092 = vmatmul.mubr.msk.bf16.gmra.mxu1 %vm228_vm0, %v6107_v19 }
  0x92   :  { %695 = vmatprep.mubr.bf16.mxu0 %v5797_v0  ;;  %888 = vmatprep.mubr.bf16.mxu1 %v5797_v0 }
  0x99   :  { %5093 = vmatmul.mubr.msk.bf16.vlgmr.msra.gmra.mxu0 %vm228_vm0, %v5885_v25  ;;  %5109 = vmatmul.mubr.msk.bf16.vlgmr.msra.gmra.mxu1 %vm228_vm0, %v5885_v25  ;;  %v5408_v25 = vld [vmem:[#allocation3 + $0x284] ss:$16 sps:$4 sm:$0xff]  }
  0x9a   :  { %2992 = vmatpush1.bf16.msra.mxu0 %v5385_v20  ;;  %3185 = vmatpush1.bf16.msra.mxu1 %v5388_v21  ;;  %v5466_v20 = vld [vmem:[#allocation3 + $0x340] ss:$16 sps:$4 sm:$0xff]   ;;  %v5471_v21 = vld [vmem:[#allocation3 + $0x124] ss:$16 sps:$4 sm:$0xff]  }
  0x9b   :  { %705 = vmatprep.mubr.bf16.mxu0 %v5797_v0  ;;  %898 = vmatprep.mubr.bf16.mxu1 %v5797_v0 }
  0x9c   :  { %2993 = vmatprep.subr.bf16.mxu0 %v5393_v22  ;;  %3186 = vmatprep.subr.bf16.mxu1 %v5396_v23  ;;  %v5474_v22 = vld [vmem:[#allocation3 + $0x324] ss:$16 sps:$4 sm:$0xff]   ;;  %v5469_v23 = vld [vmem:[#allocation3 + $0x120] ss:$16 sps:$4 sm:$0xff]  }
  0x9e   :  { %2994 = vmatpush1.bf16.msra.mxu0 %v5391_v24  ;;  %3187 = vmatpush1.bf16.msra.mxu1 %v5394_v26  ;;  %v5472_v24 = vld [vmem:[#allocation3 + $0x320] ss:$16 sps:$4 sm:$0xff]   ;;  %v5477_v26 = vld [vmem:[#allocation3 + $0x104] ss:$16 sps:$4 sm:$0xff]  }
  0x9f   :  { %2995 = vmatprep.subr.bf16.mxu0 %v5399_v27  ;;  %3188 = vmatprep.subr.bf16.mxu1 %v5402_v28  ;;  %v5475_v27 = vld [vmem:[#allocation3 + $0x100] ss:$16 sps:$4 sm:$0xff]  }
  0xa0   :  { %v5478_v28 = vld [vmem:[#allocation3 + $0x300] ss:$16 sps:$4 sm:$0xff]  }
  0xa1   :  { %5094 = vmatmul.mubr.msk.bf16.gmra.mxu0 %vm228_vm0, %v5911_v38  ;;  %5110 = vmatmul.mubr.msk.bf16.gmra.mxu1 %vm228_vm0, %v5911_v38  ;;  %v5420_v38 = vld [vmem:[#allocation3 + $0x244] ss:$16 sps:$4 sm:$0xff]  }
  0xa2   :  { %715 = vmatprep.mubr.bf16.mxu0 %v5797_v0  ;;  %908 = vmatprep.mubr.bf16.mxu1 %v5797_v0 }
  0xa3   :  { %2996 = vmatpush1.bf16.msra.mxu0 %v5397_v29  ;;  %3189 = vmatpush1.bf16.msra.mxu1 %v5400_v30  ;;  %v5483_v29 = vld [vmem:[#allocation3 + $0x4e4] ss:$16 sps:$4 sm:$0xff]  }
  0xa4   :  { %2997 = vmatprep.subr.bf16.mxu0 %v5405_v31  ;;  %3190 = vmatprep.subr.bf16.mxu1 %v5408_v25  ;;  %v5486_v30 = vld [vmem:[#allocation3 + $0x6e4] ss:$16 sps:$4 sm:$0xff]  }
  0xa7   :  { %2998 = vmatpush1.bf16.msra.mxu0 %v5403_v32  ;;  %3191 = vmatpush1.bf16.msra.mxu1 %v5406_v33 }
  0xa8   :  { %2999 = vmatprep.subr.bf16.mxu0 %v5411_v34  ;;  %3192 = vmatprep.subr.bf16.mxu1 %v5414_v35 }
  0xa9   :  { %5095 = vmatmul.mubr.msk.bf16.gmra.mxu0 %vm228_vm0, %v5925_v43  ;;  %5111 = vmatmul.mubr.msk.bf16.gmra.mxu1 %vm228_vm0, %v5925_v43  ;;  %v5432_v43 = vld [vmem:[#allocation3 + $0x204] ss:$16 sps:$4 sm:$0xff]  }
  0xaa   :  { %725 = vmatprep.mubr.bf16.mxu0 %v5797_v0  ;;  %918 = vmatprep.mubr.bf16.mxu1 %v5797_v0 }
  0xab   :  { %3000 = vmatpush1.bf16.msra.mxu0 %v5409_v36  ;;  %3193 = vmatpush1.bf16.msra.mxu1 %v5412_v37 }
  0xac   :  { %3001 = vmatprep.subr.bf16.mxu0 %v5417_v39  ;;  %3194 = vmatprep.subr.bf16.mxu1 %v5420_v38 }
  0xaf   :  { %3002 = vmatpush1.bf16.msra.mxu0 %v5415_v40  ;;  %3195 = vmatpush1.bf16.msra.mxu1 %v5418_v41 }
  0xb0   :  { %3003 = vmatprep.subr.bf16.mxu0 %v5423_v42  ;;  %3196 = vmatprep.subr.bf16.mxu1 %v5426_v44 }
  0xb1   :  { %5096 = vmatmul.mubr.msk.bf16.gmra.mxu0 %vm228_vm0, %v5939_v46  ;;  %5112 = vmatmul.mubr.msk.bf16.gmra.mxu1 %vm228_vm0, %v5939_v46  ;;  %v5444_v46 = vld [vmem:[#allocation3 + $0x3c4] ss:$16 sps:$4 sm:$0xff]  }
  0xb2   :  { %735 = vmatprep.mubr.bf16.mxu0 %v5797_v0  ;;  %928 = vmatprep.mubr.bf16.mxu1 %v5797_v0 }
  0xb3   :  { %3004 = vmatpush1.bf16.msra.mxu0 %v5421_v45  ;;  %3197 = vmatpush1.bf16.msra.mxu1 %v5424_v47 }
  0xb4   :  { %3005 = vmatprep.subr.bf16.mxu0 %v5429_v48  ;;  %3198 = vmatprep.subr.bf16.mxu1 %v5432_v43 }
  0xb7   :  { %3006 = vmatpush1.bf16.msra.mxu0 %v5427_v50  ;;  %3199 = vmatpush1.bf16.msra.mxu1 %v5430_v51 }
  0xb8   :  { %3007 = vmatprep.subr.bf16.mxu0 %v5435_v53  ;;  %3200 = vmatprep.subr.bf16.mxu1 %v5438_v54 }
  0xb9   :  { %5097 = vmatmul.mubr.msk.bf16.gmra.mxu0 %vm228_vm0, %v5953_v49  ;;  %5113 = vmatmul.mubr.msk.bf16.gmra.mxu1 %vm228_vm0, %v5953_v49  ;;  %v5456_v49 = vld [vmem:[#allocation3 + $0x384] ss:$16 sps:$4 sm:$0xff]  }
  0xba   :  { %745 = vmatprep.mubr.bf16.mxu0 %v5797_v0  ;;  %938 = vmatprep.mubr.bf16.mxu1 %v5797_v0 }
  0xbb   :  { %3008 = vmatpush2.bf16.msra.mxu0 %v5433_v56  ;;  %3201 = vmatpush2.bf16.msra.mxu1 %v5436_v57 }
  0xbc   :  { %3009 = vmatprep.subr.bf16.mxu0 %v5441_v59  ;;  %3202 = vmatprep.subr.bf16.mxu1 %v5444_v46 }
  0xbf   :  { %3010 = vmatpush2.bf16.msra.mxu0 %v5439_v60  ;;  %3203 = vmatpush2.bf16.msra.mxu1 %v5442_v62 }
  0xc0   :  { %3011 = vmatprep.subr.bf16.mxu0 %v5447_v63  ;;  %3204 = vmatprep.subr.bf16.mxu1 %v5450_v2 }
  0xc1   :  { %5098 = vmatmul.mubr.msk.bf16.gmra.mxu0 %vm228_vm0, %v5967_v52  ;;  %5114 = vmatmul.mubr.msk.bf16.gmra.mxu1 %vm228_vm0, %v5967_v52  ;;  %v5468_v52 = vld [vmem:[#allocation3 + $0x344] ss:$16 sps:$4 sm:$0xff]  }
  0xc2   :  { %755 = vmatprep.mubr.bf16.mxu0 %v5797_v0  ;;  %948 = vmatprep.mubr.bf16.mxu1 %v5797_v0 }
  0xc3   :  { %3012 = vmatpush2.bf16.msra.mxu0 %v5445_v3  ;;  %3205 = vmatpush2.bf16.msra.mxu1 %v5448_v5  ;;  %v108_v3 = vlaneseq }
  0xc4   :  { %3013 = vmatprep.subr.bf16.mxu0 %v5453_v6  ;;  %3206 = vmatprep.subr.bf16.mxu1 %v5456_v49 }
  0xc7   :  { %3014 = vmatpush2.bf16.msra.mxu0 %v5451_v8  ;;  %3207 = vmatpush2.bf16.msra.mxu1 %v5454_v9  ;;  %v6271_v9 = vshrl.u32 %v108_v3, 7 }
  0xc8   :  { %3015 = vmatprep.subr.bf16.mxu0 %v5459_v11  ;;  %3208 = vmatprep.subr.bf16.mxu1 %v5462_v12 }
  0xc9   :  { %5099 = vmatmul.mubr.msk.bf16.gmra.mxu0 %vm228_vm0, %v5981_v55  ;;  %5115 = vmatmul.mubr.msk.bf16.gmra.mxu1 %vm228_vm0, %v5981_v55  ;;  %v5480_v55 = vld [vmem:[#allocation3 + $0x304] ss:$16 sps:$4 sm:$0xff]   ;;  %8872 = vst [vmem:[#allocation6_spill] sm:$0xff] %v6271_v9  ;;  %v6280_v12 = vsub.s32 1, %v6271_v9 }
  0xca   :  { %765 = vmatprep.mubr.bf16.mxu0 %v5797_v0  ;;  %958 = vmatprep.mubr.bf16.mxu1 %v5797_v0 }
  0xcb   :  { %3016 = vmatpush2.bf16.msra.mxu0 %v5457_v14  ;;  %3209 = vmatpush2.bf16.msra.mxu1 %v5460_v15  ;;  %8873 = vst [vmem:[#allocation7_spill] sm:$0xff] %v6280_v12  ;;  %v6288_v15 = vsub.s32 3, %v6271_v9 }
  0xcc   :  { %3017 = vmatprep.subr.bf16.mxu0 %v5465_v17  ;;  %3210 = vmatprep.subr.bf16.mxu1 %v5468_v52 }
  0xcd   :  { %8875 = vst [vmem:[#allocation9_spill] sm:$0xff] %v6288_v15 }
  0xcf   :  { %3018 = vmatpush2.bf16.msra.mxu0 %v5463_v18  ;;  %3211 = vmatpush2.bf16.msra.mxu1 %v5466_v20  ;;  %v106_v18 = vld [vmem:[%s8728_s2] sm:$0xff] }
  0xd0   :  { %3019 = vmatprep.subr.bf16.mxu0 %v5471_v21  ;;  %3212 = vmatprep.subr.bf16.mxu1 %v5474_v22  ;;  %v6301_v21 = vrot.slane %v106_v18, %v6280_v12  ;;  %v6306_v22 = vrot.slane %v106_v18, %v6288_v15 }
  0xd1   :  { %5100 = vmatmul.mubr.msk.bf16.gmra.mxu0 %vm228_vm0, %v5995_v58  ;;  %5116 = vmatmul.mubr.msk.bf16.gmra.mxu1 %vm228_vm0, %v5995_v58 }
  0xd2   :  { %775 = vmatprep.mubr.bf16.mxu0 %v5797_v0  ;;  %968 = vmatprep.mubr.bf16.mxu1 %v5797_v0 }
  0xd3   :  { %3020 = vmatpush2.bf16.msra.mxu0 %v5469_v23  ;;  %3213 = vmatpush2.bf16.msra.mxu1 %v5472_v24 }
  0xd4   :  { %3021 = vmatprep.subr.bf16.mxu0 %v5477_v26  ;;  %3214 = vmatprep.subr.bf16.mxu1 %v5480_v55  ;;  %v6315_v55 = vsub.s32 0, %v6271_v9 }
  0xd6   :  { %8876 = vst [vmem:[#allocation10_spill] sm:$0xff] %v6315_v55 }
  0xd7   :  { %3022 = vmatpush2.bf16.msra.mxu0 %v5475_v27  ;;  %3215 = vmatpush2.bf16.msra.mxu1 %v5478_v28 }
  0xd8   :  { %3377 = vmatprep.subr.bf16.mxu0 %v5483_v29  ;;  %3570 = vmatprep.subr.bf16.mxu1 %v5486_v30  ;;  %v6324_v29 = vsub.s32 2, %v6271_v9  ;;  %v6341_v9 = vrot.slane %v106_v18, %v6315_v55 }
  0xd9   :  { %v6163_v31 = vpop.f32.mrf.mxu0  ;;  %5101 = vmatmul.mubr.msk.bf16.gmra.mxu0 %vm228_vm0, %v6009_v61  ;;  %v6167_v58 = vpop.f32.mrf.mxu1  ;;  %5117 = vmatmul.mubr.msk.bf16.gmra.mxu1 %vm228_vm0, %v6009_v61 }
  0xda   :  { %785 = vmatprep.mubr.bf16.mxu0 %v5797_v0  ;;  %978 = vmatprep.mubr.bf16.mxu1 %v5797_v0  ;;  %8878 = vst [vmem:[#allocation12_spill] sm:$0xff] %v6324_v29 }
  0xdb   :  { %v6172_v25 = vpop.f32.mrf.mxu0  ;;  %v6175_v32 = vpop.f32.mrf.mxu1 }
  0xdc   :  { %v314_v30 = vadd.f32 %v6172_v25, %v6301_v21 }
  0xdd   :  { %v6177_v33 = vpop.f32.mrf.mxu0  ;;  %v6179_v34 = vpop.f32.mrf.mxu1 }
  0xdf   :  { %v6181_v35 = vpop.f32.mrf.mxu0  ;;  %v6183_v36 = vpop.f32.mrf.mxu1 }
  0xe0   :  { %v318_v24 = vadd.f32 %v6181_v35, %v6301_v21  ;;  %v511_v27 = vadd.f32 %v6183_v36, %v6306_v22  ;;  %v507_v36 = vadd.f32 %v6175_v32, %v6306_v22 }
  0xe1   :  { %v6185_v37 = vpop.f32.mrf.mxu0  ;;  %5102 = vmatmul.mubr.msk.bf16.gmra.mxu0 %vm228_vm0, %v6023_v1  ;;  %v6189_v61 = vpop.f32.mrf.mxu1  ;;  %5118 = vmatmul.mubr.msk.bf16.gmra.mxu1 %vm228_vm0, %v6023_v1 }
  0xe2   :  { %795 = vmatprep.mubr.bf16.mxu0 %v5797_v0  ;;  %988 = vmatprep.mubr.bf16.mxu1 %v5797_v0  ;;  %v1058_v15 = vmax.f32 %v318_v24, 0.0  ;;  %v1060_v25 = vmax.f32 %v511_v27, 0.0  ;;  %v1052_v32 = vmax.f32 %v507_v36, 0.0 }
  0xe3   :  { %v6194_v39 = vpop.f32.mrf.mxu0  ;;  %v6197_v38 = vpop.f32.mrf.mxu1 }
  0xe5   :  { %v6199_v40 = vpop.f32.mrf.mxu0  ;;  %v6201_v41 = vpop.f32.mrf.mxu1 }
  0xe7   :  { %v6203_v42 = vpop.f32.mrf.mxu0  ;;  %v6205_v44 = vpop.f32.mrf.mxu1 }
  0xe8   :  { %v328_v27 = vadd.f32 %v6203_v42, %v6301_v21  ;;  %v324_v42 = vadd.f32 %v6194_v39, %v6301_v21 }
  0xe9   :  { %v6207_v45 = vpop.f32.mrf.mxu0  ;;  %5103 = vmatmul.mubr.msk.bf16.gmra.mxu0 %vm228_vm0, %v6037_v4  ;;  %v6211_v1 = vpop.f32.mrf.mxu1  ;;  %5119 = vmatmul.mubr.msk.bf16.gmra.mxu1 %vm228_vm0, %v6037_v4 }
  0xea   :  { %805 = vmatprep.mubr.bf16.mxu0 %v5797_v0  ;;  %998 = vmatprep.mubr.bf16.mxu1 %v5797_v0 }
  0xeb   :  { %v6216_v47 = vpop.f32.mrf.mxu0  ;;  %v6219_v48 = vpop.f32.mrf.mxu1 }
  0xed   :  { %v6221_v43 = vpop.f32.mrf.mxu0  ;;  %v6223_v50 = vpop.f32.mrf.mxu1 }
  0xef   :  { %v6225_v51 = vpop.f32.mrf.mxu0  ;;  %v6227_v53 = vpop.f32.mrf.mxu1 }
  0xf1   :  { %v6229_v54 = vpop.f32.mrf.mxu0  ;;  %5104 = vmatmul.mubr.msk.bf16.gmra.mxu0 %vm228_vm0, %v6051_v7  ;;  %v6233_v4 = vpop.f32.mrf.mxu1  ;;  %5120 = vmatmul.mubr.msk.bf16.gmra.mxu1 %vm228_vm0, %v6051_v7 }
  0xf2   :  { %815 = vmatprep.mubr.bf16.mxu0 %v5797_v0  ;;  %1008 = vmatprep.mubr.bf16.mxu1 %v5797_v0 }
  0xf3   :  { %v6238_v56 = vpop.f32.mrf.mxu0  ;;  %v6241_v57 = vpop.f32.mrf.mxu1 }
  0xf5   :  { %v6243_v59 = vpop.f32.mrf.mxu0  ;;  %v6245_v46 = vpop.f32.mrf.mxu1 }
  0xf7   :  { %v6247_v60 = vpop.f32.mrf.mxu0  ;;  %v6249_v62 = vpop.f32.mrf.mxu1 }
  0xf9   :  { %v6251_v63 = vpop.f32.mrf.mxu0  ;;  %5105 = vmatmul.mubr.msk.bf16.gmra.mxu0 %vm228_vm0, %v6065_v10  ;;  %v6255_v7 = vpop.f32.mrf.mxu1  ;;  %5121 = vmatmul.mubr.msk.bf16.gmra.mxu1 %vm228_vm0, %v6065_v10 }
  0xfa   :  { %825 = vmatprep.mubr.bf16.mxu0 %v5797_v0  ;;  %1018 = vmatprep.mubr.bf16.mxu1 %v5797_v0 }
  0xfb   :  { %v6260_v2 = vpop.f32.mrf.mxu0  ;;  %v6263_v5 = vpop.f32.mrf.mxu1 }
  0xfd   :  { %v6265_v6 = vpop.f32.mrf.mxu0  ;;  %v6267_v49 = vpop.f32.mrf.mxu1 }
  0xff   :  { %v6269_v8 = vpop.f32.mrf.mxu0  ;;  %v6273_v11 = vpop.f32.mrf.mxu1 }
 0x101   :  { %v6275_v10 = vpop.f32.mrf.mxu0  ;;  %5106 = vmatmul.mubr.msk.bf16.gmra.mxu0 %vm228_vm0, %v6079_v13  ;;  %v6282_v14 = vpop.f32.mrf.mxu1  ;;  %5122 = vmatmul.mubr.msk.bf16.gmra.mxu1 %vm228_vm0, %v6079_v13 }
 0x102   :  { %8874 = vst [vmem:[#allocation8_spill] sm:$0xff] %v6282_v14  ;;  %835 = vmatprep.mubr.bf16.mxu0 %v5797_v0  ;;  %1028 = vmatprep.mubr.bf16.mxu1 %v5797_v0 }
 0x103   :  { %v6290_v17 = vpop.f32.mrf.mxu0  ;;  %v6293_v52 = vpop.f32.mrf.mxu1 }
 0x105   :  { %v6298_v20 = vpop.f32.mrf.mxu0  ;;  %v6303_v13 = vpop.f32.mrf.mxu1 }
 0x107   :  { %v6308_v23 = vpop.f32.mrf.mxu0  ;;  %v6312_v26 = vpop.f32.mrf.mxu1 }
 0x109   :  { %v6319_v28 = vpop.f32.mrf.mxu0  ;;  %5107 = vmatmul.mubr.msk.bf16.gmra.mxu0 %vm228_vm0, %v6093_v16  ;;  %v6328_v35 = vpop.f32.mrf.mxu1  ;;  %5123 = vmatmul.mubr.msk.bf16.gmra.mxu1 %vm228_vm0, %v6093_v16  ;;  %v6346_v16 = vrot.slane %v106_v18, %v6324_v29  ;;  %v312_v18 = vadd.f32 %v6163_v31, %v6341_v9 }
 0x10a   :  { %8877 = vst [vmem:[#allocation11_spill] sm:$0xff] %v6319_v28  ;;  %8879 = vst [vmem:[#allocation13_spill] sm:$0xff] %v6328_v35  ;;  %845 = vmatprep.mubr.bf16.mxu0 %v5797_v0  ;;  %1038 = vmatprep.mubr.bf16.mxu1 %v5797_v0  ;;  %v1050_v28 = vmax.f32 %v314_v30, 0.0  ;;  %v521_v30 = vadd.f32 %v6205_v44, %v6306_v22  ;;  %v517_v44 = vadd.f32 %v6197_v38, %v6306_v22 }
 0x10b   :  { %v6335_v3 = vpop.f32.mrf.mxu0  ;;  %v6338_v12 = vpop.f32.mrf.mxu1  ;;  %v509_v24 = vadd.f32 %v6179_v34, %v6346_v16  ;;  %v505_v34 = vadd.f32 %v6167_v58, %v6346_v16  ;;  %v1074_v58 = vmax.f32 %v328_v27, 0.0  ;;  %v1049_v39 = vmax.f32 %v312_v18, 0.0 }
 0x10c   :  { %8880 = vst [vmem:[#allocation14_spill] sm:$0xff] %v6335_v3  ;;  %v316_v3 = vadd.f32 %v6177_v33, %v6341_v9  ;;  %v6370_v33 = vpack.c.bf16 %v1060_v25, %v1052_v32  ;;  %v1076_v29 = vmax.f32 %v521_v30, 0.0  ;;  %v519_v30 = vadd.f32 %v6201_v41, %v6346_v16 }
 0x10d   :  { %v6343_v35 = vpop.f32.mrf.mxu0  ;;  %v6348_v14 = vpop.f32.mrf.mxu1  ;;  %v1059_v25 = vmax.f32 %v509_v24, 0.0  ;;  %v1068_v24 = vmax.f32 %v517_v44, 0.0  ;;  %v515_v41 = vadd.f32 %v6189_v61, %v6346_v16  ;;  %v5490_v61 = vld [vmem:[#allocation3 + $0x6c0] ss:$16 sps:$4 sm:$0xff]  }
 0x10e   :  { %8881 = vst [vmem:[#allocation15_spill] sm:$0xff] %v6343_v35  ;;  %v6360_v35 = vpack.c.bf16 %v1058_v15, %v1050_v28  ;;  %8884 = vst [vmem:[#allocation18_spill] sm:$0xff] %v6370_v33  ;;  %v1057_v31 = vmax.f32 %v316_v3, 0.0  ;;  %v326_v3 = vadd.f32 %v6199_v40, %v6341_v9 }
 0x10f   :  { %v6352_v0 = vpop.f32.mrf.mxu0  ;;  %v6358_v55 = vpop.f32.mrf.mxu1 }
 0x110   :  { %8882 = vst [vmem:[#allocation16_spill] sm:$0xff] %v6360_v35  ;;  %v6394_v38 = vpack.c.bf16 %v1057_v31, %v1049_v39  ;;  %v5484_v31 = vld [vmem:[#allocation3 + $0x6e0] ss:$16 sps:$4 sm:$0xff]   ;;  %v5489_v39 = vld [vmem:[#allocation3 + $0x4c4] ss:$16 sps:$4 sm:$0xff]  }
 0x111   :  { %v6366_v36 = vpop.f32.mrf.mxu0  ;;  %5108 = vmatmul.mubr.msk.bf16.gmra.mxu0 %vm228_vm0, %v6107_v19  ;;  %v6376_v15 = vpop.f32.mrf.mxu1  ;;  %5124 = vmatmul.mubr.msk.bf16.gmra.mxu1 %vm228_vm0, %v6107_v19  ;;  %v1066_v19 = vmax.f32 %v324_v42, 0.0 }
 0x112   :  { %8883 = vst [vmem:[#allocation17_spill] sm:$0xff] %v6366_v36  ;;  %8885 = vst [vmem:[#allocation19_spill] sm:$0xff] %v6376_v15  ;;  %3023 = vmatprep.mubr.bf16.mxu0 %v6360_v35  ;;  %3216 = vmatprep.mubr.bf16.mxu1 %v6370_v33  ;;  %v1051_v36 = vmax.f32 %v505_v34, 0.0  ;;  %v322_v33 = vadd.f32 %v6185_v37, %v6341_v9  ;;  %v338_v34 = vadd.f32 %v6225_v51, %v6301_v21 }
 0x113   :  { %v6384_v28 = vpop.f32.mrf.mxu0  ;;  %v6386_v32 = vpop.f32.mrf.mxu1  ;;  %8888 = vst [vmem:[#allocation22_spill] sm:$0xff] %v6394_v38  ;;  %v6408_v42 = vpack.c.bf16 %v1074_v58, %v1066_v19  ;;  %v531_v37 = vadd.f32 %v6227_v53, %v6306_v22  ;;  %v1073_v51 = vmax.f32 %v326_v3, 0.0  ;;  %v334_v58 = vadd.f32 %v6216_v47, %v6301_v21 }
 0x114   :  { %8886 = vst [vmem:[#allocation20_spill] sm:$0xff] %v6386_v32  ;;  %v5481_v32 = vld [vmem:[#allocation3 + $0x4e0] ss:$16 sps:$4 sm:$0xff]   ;;  %v6400_v18 = vpack.c.bf16 %v1059_v25, %v1051_v36  ;;  %v6415_v36 = vpack.c.bf16 %v1076_v29, %v1068_v24  ;;  %v5492_v25 = vld [vmem:[#allocation3 + $0x6c4] ss:$16 sps:$4 sm:$0xff]   ;;  %v527_v53 = vadd.f32 %v6219_v48, %v6306_v22  ;;  %v1065_v3 = vmax.f32 %v322_v33, 0.0 }
 0x115   :  { %v6388_v15 = vpop.f32.mrf.mxu0  ;;  %v6392_v35 = vpop.f32.mrf.mxu1  ;;  %8890 = vst [vmem:[#allocation24_spill] sm:$0xff] %v6408_v42  ;;  %v5487_v24 = vld [vmem:[#allocation3 + $0x4c0] ss:$16 sps:$4 sm:$0xff]   ;;  %v5498_v48 = vld [vmem:[#allocation3 + $0x6a4] ss:$16 sps:$4 sm:$0xff]   ;;  %v332_v33 = vadd.f32 %v6207_v45, %v6341_v9 }
 0x116   :  { %8887 = vst [vmem:[#allocation21_spill] sm:$0xff] %v6392_v35  ;;  %8889 = vst [vmem:[#allocation23_spill] sm:$0xff] %v6400_v18  ;;  %v1067_v35 = vmax.f32 %v515_v41, 0.0  ;;  %v348_v41 = vadd.f32 %v6247_v60, %v6301_v21  ;;  %v5496_v45 = vld [vmem:[#allocation3 + $0x6a0] ss:$16 sps:$4 sm:$0xff]  }
 0x117   :  { %v6398_v27 = vpop.f32.mrf.mxu0  ;;  %v6406_v40 = vpop.f32.mrf.mxu1  ;;  %8892 = vst [vmem:[#allocation26_spill] sm:$0xff] %v6415_v36  ;;  %v5504_v60 = vld [vmem:[#allocation3 + $0x684] ss:$16 sps:$4 sm:$0xff]  }
 0x119   :  { %v6412_v44 = vpop.f32.mrf.mxu0  ;;  %3024 = vmatmul.mubr.bf16.vlgmr.msra.gmra.mxu0 %v6394_v38  ;;  %v6421_v19 = vpop.f32.mrf.mxu1  ;;  %3217 = vmatmul.mubr.bf16.vlgmr.msra.gmra.mxu1 %v6400_v18  ;;  %v1075_v38 = vmax.f32 %v519_v30, 0.0  ;;  %v5495_v18 = vld [vmem:[#allocation3 + $0x4a4] ss:$16 sps:$4 sm:$0xff]   ;;  %v1084_v30 = vmax.f32 %v527_v53, 0.0  ;;  %v541_v53 = vadd.f32 %v6249_v62, %v6306_v22  ;;  %v537_v62 = vadd.f32 %v6241_v57, %v6306_v22 }
 0x11a   :  { %8891 = vst [vmem:[#allocation25_spill] sm:$0xff] %v6412_v44  ;;  %8893 = vst [vmem:[#allocation27_spill] sm:$0xff] %v6421_v19  ;;  %3033 = vmatprep.mubr.bf16.mxu0 %v6408_v42  ;;  %3226 = vmatprep.mubr.bf16.mxu1 %v6415_v36  ;;  %v1090_v44 = vmax.f32 %v338_v34, 0.0  ;;  %v1092_v19 = vmax.f32 %v531_v37, 0.0  ;;  %v6434_v36 = vpack.c.bf16 %v1073_v51, %v1065_v3  ;;  %v5493_v37 = vld [vmem:[#allocation3 + $0x4a0] ss:$16 sps:$4 sm:$0xff]  }
 0x11b   :  { %3378 = vmatpush1.bf16.msra.mxu0 %v5481_v32  ;;  %v6428_v29 = vpop.f32.mrf.mxu0  ;;  %v6430_v47 = vpop.f32.mrf.mxu1  ;;  %3571 = vmatpush1.bf16.msra.mxu1 %v5484_v31  ;;  %v1082_v32 = vmax.f32 %v334_v58, 0.0  ;;  %v336_v34 = vadd.f32 %v6221_v43, %v6341_v9  ;;  %v529_v31 = vadd.f32 %v6223_v50, %v6346_v16  ;;  %v5501_v43 = vld [vmem:[#allocation3 + $0x484] ss:$16 sps:$4 sm:$0xff]   ;;  %v525_v50 = vadd.f32 %v6211_v1, %v6346_v16 }
 0x11c   :  { %8894 = vst [vmem:[#allocation28_spill] sm:$0xff] %v6428_v29  ;;  %3379 = vmatprep.subr.bf16.mxu0 %v5489_v39  ;;  %3572 = vmatprep.subr.bf16.mxu1 %v5492_v25  ;;  %8895 = vst [vmem:[#allocation29_spill] sm:$0xff] %v6434_v36  ;;  %v6446_v25 = vpack.c.bf16 %v1075_v38, %v1067_v35  ;;  %v6461_v35 = vpack.c.bf16 %v1092_v19, %v1084_v30  ;;  %v1106_v3 = vmax.f32 %v348_v41, 0.0  ;;  %v5510_v57 = vld [vmem:[#allocation3 + $0x664] ss:$16 sps:$4 sm:$0xff]  }
 0x11d   :  { %v6432_v42 = vpop.f32.mrf.mxu0  ;;  %v6436_v29 = vpop.f32.mrf.mxu1  ;;  %v6452_v58 = vpack.c.bf16 %v1090_v44, %v1082_v32  ;;  %v344_v38 = vadd.f32 %v6238_v56, %v6301_v21  ;;  %v1089_v1 = vmax.f32 %v336_v34, 0.0  ;;  %v1091_v44 = vmax.f32 %v529_v31, 0.0  ;;  %v5502_v56 = vld [vmem:[#allocation3 + $0x680] ss:$16 sps:$4 sm:$0xff]   ;;  %v5507_v32 = vld [vmem:[#allocation3 + $0x464] ss:$16 sps:$4 sm:$0xff]  }
 0x11e   :  { %8896 = vst [vmem:[#allocation30_spill] sm:$0xff] %v6446_v25  ;;  %8898 = vst [vmem:[#allocation32_spill] sm:$0xff] %v6461_v35  ;;  %v1081_v30 = vmax.f32 %v332_v33, 0.0  ;;  %v1108_v34 = vmax.f32 %v541_v53, 0.0  ;;  %v1100_v33 = vmax.f32 %v537_v62, 0.0  ;;  %v539_v53 = vadd.f32 %v6245_v46, %v6346_v16 }
 0x11f   :  { %v6444_v39 = vpop.f32.mrf.mxu0  ;;  %3380 = vmatpush1.bf16.msra.mxu0 %v5487_v24  ;;  %v6450_v51 = vpop.f32.mrf.mxu1  ;;  %8897 = vst [vmem:[#allocation31_spill] sm:$0xff] %v6452_v58  ;;  %3573 = vmatpush1.bf16.msra.mxu1 %v5490_v61  ;;  %v5499_v61 = vld [vmem:[#allocation3 + $0x480] ss:$16 sps:$4 sm:$0xff]   ;;  %v5516_v46 = vld [vmem:[#allocation3 + $0x644] ss:$16 sps:$4 sm:$0xff]  }
 0x120   :  { %3381 = vmatprep.subr.bf16.mxu0 %v5495_v18  ;;  %3574 = vmatprep.subr.bf16.mxu1 %v5498_v48  ;;  %v6482_v41 = vpack.c.bf16 %v1089_v1, %v1081_v30  ;;  %v5513_v1 = vld [vmem:[#allocation3 + $0x444] ss:$16 sps:$4 sm:$0xff]   ;;  %v6503_v62 = vpack.c.bf16 %v1108_v34, %v1100_v33  ;;  %v1107_v30 = vmax.f32 %v539_v53, 0.0 }
 0x121   :  { %v6458_v24 = vpop.f32.mrf.mxu0  ;;  %3034 = vmatmul.mubr.bf16.gmra.mxu0 %v6434_v36  ;;  %v6465_v18 = vpop.f32.mrf.mxu1  ;;  %3227 = vmatmul.mubr.bf16.gmra.mxu1 %v6446_v25  ;;  %v1098_v25 = vmax.f32 %v344_v38, 0.0 }
 0x122   :  { %3043 = vmatprep.mubr.bf16.mxu0 %v6452_v58  ;;  %3236 = vmatprep.mubr.bf16.mxu1 %v6461_v35  ;;  %v1083_v58 = vmax.f32 %v525_v50, 0.0  ;;  %v346_v35 = vadd.f32 %v6243_v59, %v6341_v9  ;;  %8899 = vst [vmem:[#allocation33_spill] sm:$0xff] %v6482_v41  ;;  %v5505_v50 = vld [vmem:[#allocation3 + $0x460] ss:$16 sps:$4 sm:$0xff]   ;;  %v358_v59 = vadd.f32 %v6269_v8, %v6301_v21  ;;  %8902 = vst [vmem:[#allocation36_spill] sm:$0xff] %v6503_v62 }
 0x123   :  { %v6472_v19 = vpop.f32.mrf.mxu0  ;;  %3382 = vmatpush1.bf16.msra.mxu0 %v5493_v37  ;;  %v6474_v48 = vpop.f32.mrf.mxu1  ;;  %3575 = vmatpush1.bf16.msra.mxu1 %v5496_v45  ;;  %v342_v45 = vadd.f32 %v6229_v54, %v6341_v9  ;;  %v6496_v38 = vpack.c.bf16 %v1106_v3, %v1098_v25  ;;  %v551_v54 = vadd.f32 %v6273_v11, %v6306_v22 }
 0x124   :  { %3383 = vmatprep.subr.bf16.mxu0 %v5501_v43  ;;  %3576 = vmatprep.subr.bf16.mxu1 %v5504_v60  ;;  %v6484_v36 = vpack.c.bf16 %v1091_v44, %v1083_v58  ;;  %v5508_v58 = vld [vmem:[#allocation3 + $0x660] ss:$16 sps:$4 sm:$0xff]   ;;  %v535_v8 = vadd.f32 %v6233_v4, %v6346_v16  ;;  %v1105_v25 = vmax.f32 %v346_v35, 0.0  ;;  %v547_v11 = vadd.f32 %v6263_v5, %v6306_v22  ;;  %v5522_v5 = vld [vmem:[#allocation3 + $0x624] ss:$16 sps:$4 sm:$0xff]  }
 0x125   :  { %v6476_v31 = vpop.f32.mrf.mxu0  ;;  %v6480_v37 = vpop.f32.mrf.mxu1  ;;  %8901 = vst [vmem:[#allocation35_spill] sm:$0xff] %v6496_v38  ;;  %v5514_v4 = vld [vmem:[#allocation3 + $0x640] ss:$16 sps:$4 sm:$0xff]   ;;  %v1097_v35 = vmax.f32 %v342_v45, 0.0  ;;  %v1122_v34 = vmax.f32 %v358_v59, 0.0  ;;  %v1124_v33 = vmax.f32 %v551_v54, 0.0  ;;  %v352_v45 = vadd.f32 %v6251_v63, %v6341_v9 }
 0x126   :  { %8900 = vst [vmem:[#allocation34_spill] sm:$0xff] %v6484_v36  ;;  %v1116_v53 = vmax.f32 %v547_v11, 0.0  ;;  %v356_v59 = vadd.f32 %v6265_v6, %v6341_v9  ;;  %v5517_v54 = vld [vmem:[#allocation3 + $0x420] ss:$16 sps:$4 sm:$0xff]   ;;  %v5525_v6 = vld [vmem:[#allocation3 + $0x404] ss:$16 sps:$4 sm:$0xff]   ;;  %v561_v11 = vadd.f32 %v6312_v26, %v6306_v22  ;;  %v557_v26 = vadd.f32 %v6293_v52, %v6306_v22 }
 0x127   :  { %v6488_v43 = vpop.f32.mrf.mxu0  ;;  %3384 = vmatpush1.bf16.msra.mxu0 %v5499_v61  ;;  %v6494_v60 = vpop.f32.mrf.mxu1  ;;  %3577 = vmatpush1.bf16.msra.mxu1 %v5502_v56  ;;  %v354_v61 = vadd.f32 %v6260_v2, %v6301_v21  ;;  %v5520_v63 = vld [vmem:[#allocation3 + $0x620] ss:$16 sps:$4 sm:$0xff]   ;;  %v5534_v52 = vld [vmem:[#allocation3 + $0x7e4] ss:$16 sps:$4 sm:$0xff]  }
 0x128   :  { %3385 = vmatprep.subr.bf16.mxu0 %v5507_v32  ;;  %3578 = vmatprep.subr.bf16.mxu1 %v5510_v57  ;;  %v5511_v32 = vld [vmem:[#allocation3 + $0x440] ss:$16 sps:$4 sm:$0xff]   ;;  %v5519_v57 = vld [vmem:[#allocation3 + $0x424] ss:$16 sps:$4 sm:$0xff]  }
 0x129   :  { %v6500_v44 = vpop.f32.mrf.mxu0  ;;  %3044 = vmatmul.mubr.bf16.gmra.mxu0 %v6482_v41  ;;  %v6509_v3 = vpop.f32.mrf.mxu1  ;;  %3237 = vmatmul.mubr.bf16.gmra.mxu1 %v6484_v36  ;;  %v1099_v36 = vmax.f32 %v535_v8, 0.0  ;;  %v1114_v41 = vmax.f32 %v354_v61, 0.0  ;;  %v368_v8 = vadd.f32 %v6308_v23, %v6301_v21  ;;  %v5528_v23 = vld [vmem:[#allocation3 + $0x604] ss:$16 sps:$4 sm:$0xff]  }
 0x12a   :  { %3053 = vmatprep.mubr.bf16.mxu0 %v6496_v38  ;;  %3246 = vmatprep.mubr.bf16.mxu1 %v6503_v62  ;;  %v6522_v62 = vpack.c.bf16 %v1105_v25, %v1097_v35 }
 0x12b   :  { %v6516_v56 = vpop.f32.mrf.mxu0  ;;  %3386 = vmatpush1.bf16.msra.mxu0 %v5505_v50  ;;  %v6518_v2 = vpop.f32.mrf.mxu1  ;;  %3579 = vmatpush1.bf16.msra.mxu1 %v5508_v58  ;;  %v549_v58 = vadd.f32 %v6267_v49, %v6346_v16  ;;  %v6540_v61 = vpack.c.bf16 %v1122_v34, %v1114_v41  ;;  %v545_v49 = vadd.f32 %v6255_v7, %v6346_v16  ;;  %v1121_v7 = vmax.f32 %v356_v59, 0.0  ;;  %v5523_v34 = vld [vmem:[#allocation3 + $0x400] ss:$16 sps:$4 sm:$0xff]  }
 0x12c   :  { %3387 = vmatprep.subr.bf16.mxu0 %v5513_v1  ;;  %3580 = vmatprep.subr.bf16.mxu1 %v5516_v46  ;;  %8903 = vst [vmem:[#allocation37_spill] sm:$0xff] %v6522_v62  ;;  %v6534_v46 = vpack.c.bf16 %v1107_v30, %v1099_v36  ;;  %v6549_v36 = vpack.c.bf16 %v1124_v33, %v1116_v53  ;;  %v1113_v53 = vmax.f32 %v352_v45, 0.0  ;;  %v1140_v59 = vmax.f32 %v561_v11, 0.0 }
 0x12d   :  { %v6520_v38 = vpop.f32.mrf.mxu0  ;;  %v6524_v50 = vpop.f32.mrf.mxu1  ;;  %8905 = vst [vmem:[#allocation39_spill] sm:$0xff] %v6540_v61  ;;  %v364_v41 = vadd.f32 %v6290_v17, %v6301_v21  ;;  %v1123_v35 = vmax.f32 %v549_v58, 0.0  ;;  %v5526_v17 = vld [vmem:[#allocation3 + $0x600] ss:$16 sps:$4 sm:$0xff]   ;;  %v1132_v45 = vmax.f32 %v557_v26, 0.0  ;;  %v559_v11 = vadd.f32 %v6303_v13, %v6346_v16 }
 0x12e   :  { %8904 = vst [vmem:[#allocation38_spill] sm:$0xff] %v6534_v46  ;;  %8906 = vst [vmem:[#allocation40_spill] sm:$0xff] %v6549_v36  ;;  %v5540_v13 = vld [vmem:[#allocation3 + $0x7c4] ss:$16 sps:$4 sm:$0xff]  }
 0x12f   :  { %v6532_v1 = vpop.f32.mrf.mxu0  ;;  %3388 = vmatpush1.bf16.msra.mxu0 %v5511_v32  ;;  %v6538_v25 = vpop.f32.mrf.mxu1  ;;  %3581 = vmatpush1.bf16.msra.mxu1 %v5514_v4  ;;  %v6591_v26 = vpack.c.bf16 %v1140_v59, %v1132_v45  ;;  %v5535_v59 = vld [vmem:[#allocation3 + $0x5c0] ss:$16 sps:$4 sm:$0xff]   ;;  %v1139_v45 = vmax.f32 %v559_v11, 0.0 }
 0x130   :  { %3389 = vmatprep.subr.bf16.mxu0 %v5519_v57  ;;  %3582 = vmatprep.subr.bf16.mxu1 %v5522_v5  ;;  %v1138_v57 = vmax.f32 %v368_v8, 0.0  ;;  %v5531_v5 = vld [vmem:[#allocation3 + $0x5e4] ss:$16 sps:$4 sm:$0xff]   ;;  %v6570_v8 = vpack.c.bf16 %v1121_v7, %v1113_v53 }
 0x131   :  { %v6546_v32 = vpop.f32.mrf.mxu0  ;;  %3054 = vmatmul.mubr.bf16.gmra.mxu0 %v6522_v62  ;;  %v6553_v4 = vpop.f32.mrf.mxu1  ;;  %3247 = vmatmul.mubr.bf16.gmra.mxu1 %v6534_v46  ;;  %v1130_v46 = vmax.f32 %v364_v41, 0.0  ;;  %v5537_v7 = vld [vmem:[#allocation3 + $0x5c4] ss:$16 sps:$4 sm:$0xff]   ;;  %8911 = vst [vmem:[#allocation45_spill] sm:$0xff] %v6591_v26 }
 0x132   :  { %3063 = vmatprep.mubr.bf16.mxu0 %v6540_v61  ;;  %3256 = vmatprep.mubr.bf16.mxu1 %v6549_v36  ;;  %v1115_v61 = vmax.f32 %v545_v49, 0.0  ;;  %v366_v36 = vadd.f32 %v6298_v20, %v6341_v9  ;;  %8907 = vst [vmem:[#allocation41_spill] sm:$0xff] %v6570_v8  ;;  %v5529_v49 = vld [vmem:[#allocation3 + $0x5e0] ss:$16 sps:$4 sm:$0xff]   ;;  %v378_v20 = vadd.f32 %v6352_v0, %v6301_v21 }
 0x133   :  { %v6560_v30 = vpop.f32.mrf.mxu0  ;;  %3390 = vmatpush1.bf16.msra.mxu0 %v5517_v54  ;;  %v6562_v33 = vpop.f32.mrf.mxu1  ;;  %3583 = vmatpush1.bf16.msra.mxu1 %v5520_v63  ;;  %v362_v63 = vadd.f32 %v6275_v10, %v6341_v9  ;;  %v6584_v41 = vpack.c.bf16 %v1138_v57, %v1130_v46  ;;  %v571_v10 = vadd.f32 %v6358_v55, %v6306_v22  ;;  %v8912_v0 = vld [vmem:[#allocation8_spill] sm:$0xff]  ;;  %v8913_v57 = vld [vmem:[#allocation14_spill] sm:$0xff] }
 0x134   :  { %3391 = vmatprep.subr.bf16.mxu0 %v5525_v6  ;;  %3584 = vmatprep.subr.bf16.mxu1 %v5528_v23  ;;  %v6572_v62 = vpack.c.bf16 %v1123_v35, %v1115_v61  ;;  %v5532_v61 = vld [vmem:[#allocation3 + $0x7e0] ss:$16 sps:$4 sm:$0xff]   ;;  %v1137_v46 = vmax.f32 %v366_v36, 0.0  ;;  %v567_v55 = vadd.f32 %v6338_v12, %v6306_v22  ;;  %v5546_v12 = vld [vmem:[#allocation3 + $0x7a4] ss:$16 sps:$4 sm:$0xff]  }
 0x135   :  { %v6564_v58 = vpop.f32.mrf.mxu0  ;;  %v6568_v54 = vpop.f32.mrf.mxu1  ;;  %8909 = vst [vmem:[#allocation43_spill] sm:$0xff] %v6584_v41  ;;  %v1129_v36 = vmax.f32 %v362_v63, 0.0  ;;  %v8918_v63 = vld [vmem:[#allocation11_spill] sm:$0xff] }
 0x136   :  { %8908 = vst [vmem:[#allocation42_spill] sm:$0xff] %v6572_v62  ;;  %v372_v11 = vadd.f32 %v8918_v63, %v6341_v9  ;;  %v8922_v63 = vld [vmem:[#allocation13_spill] sm:$0xff] }
 0x137   :  { %v6576_v6 = vpop.f32.mrf.mxu0  ;;  %3392 = vmatpush1.bf16.msra.mxu0 %v5523_v34  ;;  %v6582_v23 = vpop.f32.mrf.mxu1  ;;  %3585 = vmatpush1.bf16.msra.mxu1 %v5526_v17  ;;  %v555_v34 = vadd.f32 %v8912_v0, %v6346_v16  ;;  %v374_v17 = vadd.f32 %v8913_v57, %v6301_v21  ;;  %v1154_v0 = vmax.f32 %v378_v20, 0.0  ;;  %v1148_v20 = vmax.f32 %v567_v55, 0.0  ;;  %v5544_v55 = vld [vmem:[#allocation3 + $0x7a0] ss:$16 sps:$4 sm:$0xff]  }
 0x138   :  { %3393 = vmatprep.subr.bf16.mxu0 %v5531_v5  ;;  %3586 = vmatprep.subr.bf16.mxu1 %v5534_v52  ;;  %v5538_v52 = vld [vmem:[#allocation3 + $0x7c0] ss:$16 sps:$4 sm:$0xff]  }
 0x139   :  { %v6588_v35 = vpop.f32.mrf.mxu0  ;;  %3064 = vmatmul.mubr.bf16.gmra.mxu0 %v6570_v8  ;;  %v6597_v5 = vpop.f32.mrf.mxu1  ;;  %3257 = vmatmul.mubr.bf16.gmra.mxu1 %v6572_v62  ;;  %v5543_v62 = vld [vmem:[#allocation3 + $0x5a4] ss:$16 sps:$4 sm:$0xff]   ;;  %v1156_v8 = vmax.f32 %v571_v10, 0.0 }
 0x13a   :  { %8910 = vst [vmem:[#allocation44_spill] sm:$0xff] %v6588_v35  ;;  %8914 = vst [vmem:[#allocation8_spill] sm:$0xff] %v6597_v5  ;;  %3073 = vmatprep.mubr.bf16.mxu0 %v6584_v41  ;;  %3266 = vmatprep.mubr.bf16.mxu1 %v6591_v26  ;;  %v1131_v5 = vmax.f32 %v555_v34, 0.0  ;;  %v6610_v26 = vpack.c.bf16 %v1137_v46, %v1129_v36  ;;  %v1146_v35 = vmax.f32 %v374_v17, 0.0 }
 0x13b   :  { %v6604_v53 = vpop.f32.mrf.mxu0  ;;  %3394 = vmatpush2.bf16.msra.mxu0 %v5529_v49  ;;  %v6606_v57 = vpop.f32.mrf.mxu1  ;;  %3587 = vmatpush2.bf16.msra.mxu1 %v5532_v61  ;;  %v388_v46 = vadd.f32 %v6398_v27, %v6301_v21  ;;  %v5552_v27 = vld [vmem:[#allocation3 + $0x784] ss:$16 sps:$4 sm:$0xff]  }
 0x13c   :  { %8915 = vst [vmem:[#allocation14_spill] sm:$0xff] %v6606_v57  ;;  %3395 = vmatprep.subr.bf16.mxu0 %v5537_v7  ;;  %3588 = vmatprep.subr.bf16.mxu1 %v5540_v13  ;;  %8916 = vst [vmem:[#allocation46_spill] sm:$0xff] %v6610_v26  ;;  %v8919_v57 = vld [vmem:[#allocation15_spill] sm:$0xff]  ;;  %v569_v7 = vadd.f32 %v6348_v14, %v6346_v16  ;;  %v5541_v13 = vld [vmem:[#allocation3 + $0x5a0] ss:$16 sps:$4 sm:$0xff]   ;;  %v6622_v34 = vpack.c.bf16 %v1139_v45, %v1131_v5 }
 0x13d   :  { %v6608_v41 = vpop.f32.mrf.mxu0  ;;  %v6612_v49 = vpop.f32.mrf.mxu1  ;;  %v376_v61 = vadd.f32 %v8919_v57, %v6341_v9  ;;  %v6628_v36 = vpack.c.bf16 %v1154_v0, %v1146_v35  ;;  %v5549_v57 = vld [vmem:[#allocation3 + $0x584] ss:$16 sps:$4 sm:$0xff]   ;;  %v565_v14 = vadd.f32 %v8922_v63, %v6346_v16  ;;  %v6637_v5 = vpack.c.bf16 %v1156_v8, %v1148_v20 }
 0x13e   :  { %8917 = vst [vmem:[#allocation47_spill] sm:$0xff] %v6612_v49  ;;  %8920 = vst [vmem:[#allocation11_spill] sm:$0xff] %v6622_v34  ;;  %v384_v35 = vadd.f32 %v6384_v28, %v6301_v21  ;;  %v1155_v45 = vmax.f32 %v569_v7, 0.0  ;;  %v1170_v20 = vmax.f32 %v388_v46, 0.0  ;;  %v5550_v28 = vld [vmem:[#allocation3 + $0x780] ss:$16 sps:$4 sm:$0xff]  }
 0x13f   :  { %v6620_v10 = vpop.f32.mrf.mxu0  ;;  %3396 = vmatpush2.bf16.msra.mxu0 %v5535_v59  ;;  %v6626_v17 = vpop.f32.mrf.mxu1  ;;  %8921 = vst [vmem:[#allocation15_spill] sm:$0xff] %v6628_v36  ;;  %3589 = vmatpush2.bf16.msra.mxu1 %v5538_v52  ;;  %v581_v59 = vadd.f32 %v6406_v40, %v6306_v22  ;;  %8924 = vst [vmem:[#allocation48_spill] sm:$0xff] %v6637_v5  ;;  %v1153_v52 = vmax.f32 %v376_v61, 0.0  ;;  %v8926_v40 = vld [vmem:[#allocation20_spill] sm:$0xff] }
 0x140   :  { %3397 = vmatprep.subr.bf16.mxu0 %v5543_v62  ;;  %3590 = vmatprep.subr.bf16.mxu1 %v5546_v12  ;;  %v577_v0 = vadd.f32 %v8926_v40, %v6306_v22  ;;  %v5547_v12 = vld [vmem:[#allocation3 + $0x580] ss:$16 sps:$4 sm:$0xff]   ;;  %v5558_v40 = vld [vmem:[#allocation3 + $0x764] ss:$16 sps:$4 sm:$0xff]  }
 0x141   :  { %v6634_v49 = vpop.f32.mrf.mxu0  ;;  %3074 = vmatmul.mubr.bf16.gmra.mxu0 %v6610_v26  ;;  %v6641_v62 = vpop.f32.mrf.mxu1  ;;  %3267 = vmatmul.mubr.bf16.gmra.mxu1 %v6622_v34  ;;  %v5555_v34 = vld [vmem:[#allocation3 + $0x564] ss:$16 sps:$4 sm:$0xff]   ;;  %v1145_v26 = vmax.f32 %v372_v11, 0.0  ;;  %v1172_v61 = vmax.f32 %v581_v59, 0.0  ;;  %v5553_v59 = vld [vmem:[#allocation3 + $0x560] ss:$16 sps:$4 sm:$0xff]  }
 0x142   :  { %8923 = vst [vmem:[#allocation13_spill] sm:$0xff] %v6634_v49  ;;  %8925 = vst [vmem:[#allocation49_spill] sm:$0xff] %v6641_v62  ;;  %3083 = vmatprep.mubr.bf16.mxu0 %v6628_v36  ;;  %3276 = vmatprep.mubr.bf16.mxu1 %v6637_v5  ;;  %v1147_v36 = vmax.f32 %v565_v14, 0.0  ;;  %v1162_v62 = vmax.f32 %v384_v35, 0.0  ;;  %v386_v5 = vadd.f32 %v6388_v15, %v6341_v9  ;;  %v1164_v11 = vmax.f32 %v577_v0, 0.0 }
 0x143   :  { %v6648_v8 = vpop.f32.mrf.mxu0  ;;  %3398 = vmatpush2.bf16.msra.mxu0 %v5541_v13  ;;  %v6650_v63 = vpop.f32.mrf.mxu1  ;;  %3591 = vmatpush2.bf16.msra.mxu1 %v5544_v55  ;;  %v6658_v46 = vpack.c.bf16 %v1153_v52, %v1145_v26  ;;  %v8930_v55 = vld [vmem:[#allocation17_spill] sm:$0xff]  ;;  %v398_v15 = vadd.f32 %v6444_v39, %v6301_v21  ;;  %v5561_v52 = vld [vmem:[#allocation3 + $0x544] ss:$16 sps:$4 sm:$0xff]   ;;  %v8935_v39 = vld [vmem:[#allocation19_spill] sm:$0xff] }
 0x144   :  { %3399 = vmatprep.subr.bf16.mxu0 %v5549_v57  ;;  %3592 = vmatprep.subr.bf16.mxu1 %v5552_v27  ;;  %v6660_v49 = vpack.c.bf16 %v1155_v45, %v1147_v36  ;;  %v382_v57 = vadd.f32 %v8930_v55, %v6341_v9  ;;  %v8931_v27 = vld [vmem:[#allocation21_spill] sm:$0xff]  ;;  %v6672_v26 = vpack.c.bf16 %v1170_v20, %v1162_v62  ;;  %v5556_v36 = vld [vmem:[#allocation3 + $0x760] ss:$16 sps:$4 sm:$0xff]   ;;  %v5564_v55 = vld [vmem:[#allocation3 + $0x744] ss:$16 sps:$4 sm:$0xff]   ;;  %v1169_v62 = vmax.f32 %v386_v5, 0.0 }
 0x145   :  { %v6652_v7 = vpop.f32.mrf.mxu0  ;;  %v6656_v13 = vpop.f32.mrf.mxu1  ;;  %8928 = vst [vmem:[#allocation50_spill] sm:$0xff] %v6658_v46  ;;  %v579_v35 = vadd.f32 %v8931_v27, %v6346_v16  ;;  %v591_v45 = vadd.f32 %v6450_v51, %v6306_v22  ;;  %v575_v27 = vadd.f32 %v8935_v39, %v6346_v16  ;;  %v8936_v20 = vld [vmem:[#allocation28_spill] sm:$0xff]  ;;  %v587_v51 = vadd.f32 %v6430_v47, %v6306_v22 }
 0x146   :  { %8927 = vst [vmem:[#allocation20_spill] sm:$0xff] %v6652_v7  ;;  %8929 = vst [vmem:[#allocation51_spill] sm:$0xff] %v6660_v49  ;;  %v1161_v5 = vmax.f32 %v382_v57, 0.0  ;;  %v5570_v47 = vld [vmem:[#allocation3 + $0x724] ss:$16 sps:$4 sm:$0xff]   ;;  %v8941_v57 = vld [vmem:[#allocation25_spill] sm:$0xff] }
 0x147   :  { %v6664_v14 = vpop.f32.mrf.mxu0  ;;  %3400 = vmatpush2.bf16.msra.mxu0 %v5547_v12  ;;  %v6670_v7 = vpop.f32.mrf.mxu1  ;;  %8932 = vst [vmem:[#allocation17_spill] sm:$0xff] %v6672_v26  ;;  %3593 = vmatpush2.bf16.msra.mxu1 %v5550_v28  ;;  %v6679_v12 = vpack.c.bf16 %v1172_v61, %v1164_v11  ;;  %v5562_v11 = vld [vmem:[#allocation3 + $0x740] ss:$16 sps:$4 sm:$0xff]   ;;  %v1171_v39 = vmax.f32 %v579_v35, 0.0  ;;  %v392_v35 = vadd.f32 %v8941_v57, %v6341_v9  ;;  %v8944_v57 = vld [vmem:[#allocation27_spill] sm:$0xff] }
 0x148   :  { %3401 = vmatprep.subr.bf16.mxu0 %v5555_v34  ;;  %3594 = vmatprep.subr.bf16.mxu1 %v5558_v40  ;;  %v394_v34 = vadd.f32 %v8936_v20, %v6301_v21  ;;  %v5559_v40 = vld [vmem:[#allocation3 + $0x540] ss:$16 sps:$4 sm:$0xff]  }
 0x149   :  { %v6676_v0 = vpop.f32.mrf.mxu0  ;;  %3084 = vmatmul.mubr.bf16.gmra.mxu0 %v6658_v46  ;;  %8934 = vst [vmem:[#allocation52_spill] sm:$0xff] %v6679_v12  ;;  %v6685_v28 = vpop.f32.mrf.mxu1  ;;  %3277 = vmatmul.mubr.bf16.gmra.mxu1 %v6660_v49  ;;  %v1186_v46 = vmax.f32 %v398_v15, 0.0  ;;  %v5567_v49 = vld [vmem:[#allocation3 + $0x524] ss:$16 sps:$4 sm:$0xff]   ;;  %v1180_v15 = vmax.f32 %v587_v51, 0.0 }
 0x14a   :  { %8933 = vst [vmem:[#allocation21_spill] sm:$0xff] %v6676_v0  ;;  %8937 = vst [vmem:[#allocation19_spill] sm:$0xff] %v6685_v28  ;;  %3093 = vmatprep.mubr.bf16.mxu0 %v6672_v26  ;;  %3286 = vmatprep.mubr.bf16.mxu1 %v6679_v12  ;;  %v1188_v28 = vmax.f32 %v591_v45, 0.0  ;;  %v1163_v0 = vmax.f32 %v575_v27, 0.0  ;;  %v6698_v12 = vpack.c.bf16 %v1169_v62, %v1161_v5  ;;  %v5568_v51 = vld [vmem:[#allocation3 + $0x720] ss:$16 sps:$4 sm:$0xff]  }
 0x14b   :  { %v6692_v61 = vpop.f32.mrf.mxu0  ;;  %3402 = vmatpush2.bf16.msra.mxu0 %v5553_v59  ;;  %v6694_v20 = vpop.f32.mrf.mxu1  ;;  %3595 = vmatpush2.bf16.msra.mxu1 %v5556_v36  ;;  %v396_v36 = vadd.f32 %v6432_v42, %v6341_v9  ;;  %v408_v62 = vadd.f32 %v6488_v43, %v6301_v21  ;;  %v5573_v42 = vld [vmem:[#allocation3 + $0x504] ss:$16 sps:$4 sm:$0xff]  }
 0x14c   :  { %8938 = vst [vmem:[#allocation28_spill] sm:$0xff] %v6692_v61  ;;  %3403 = vmatprep.subr.bf16.mxu0 %v5561_v52  ;;  %3596 = vmatprep.subr.bf16.mxu1 %v5564_v55  ;;  %8939 = vst [vmem:[#allocation53_spill] sm:$0xff] %v6698_v12  ;;  %v1178_v61 = vmax.f32 %v394_v34, 0.0  ;;  %v589_v52 = vadd.f32 %v6436_v29, %v6346_v16  ;;  %v5565_v55 = vld [vmem:[#allocation3 + $0x520] ss:$16 sps:$4 sm:$0xff]   ;;  %v6710_v27 = vpack.c.bf16 %v1171_v39, %v1163_v0 }
 0x14d   :  { %v6696_v26 = vpop.f32.mrf.mxu0  ;;  %v6700_v59 = vpop.f32.mrf.mxu1  ;;  %v585_v29 = vadd.f32 %v8944_v57, %v6346_v16  ;;  %v6725_v0 = vpack.c.bf16 %v1188_v28, %v1180_v15  ;;  %v5576_v43 = vld [vmem:[#allocation3 + $0x704] ss:$16 sps:$4 sm:$0xff]   ;;  %v5571_v39 = vld [vmem:[#allocation3 + $0x500] ss:$16 sps:$4 sm:$0xff]   ;;  %v5579_v57 = vld [vmem:[#allocation3 + $0xec] ss:$16 sps:$4 sm:$0xff]  }
 0x14e   :  { %8940 = vst [vmem:[#allocation54_spill] sm:$0xff] %v6700_v59  ;;  %8942 = vst [vmem:[#allocation25_spill] sm:$0xff] %v6710_v27  ;;  %v6716_v5 = vpack.c.bf16 %v1186_v46, %v1178_v61  ;;  %v404_v46 = vadd.f32 %v6472_v19, %v6301_v21  ;;  %v1185_v61 = vmax.f32 %v396_v36, 0.0  ;;  %v5574_v19 = vld [vmem:[#allocation3 + $0x700] ss:$16 sps:$4 sm:$0xff]  }
 0x14f   :  { %v6708_v45 = vpop.f32.mrf.mxu0  ;;  %3404 = vmatpush2.bf16.msra.mxu0 %v5559_v40  ;;  %v6714_v34 = vpop.f32.mrf.mxu1  ;;  %3597 = vmatpush2.bf16.msra.mxu1 %v5562_v11  ;;  %v601_v40 = vadd.f32 %v6494_v60, %v6306_v22  ;;  %8945 = vst [vmem:[#allocation27_spill] sm:$0xff] %v6725_v0  ;;  %v1187_v11 = vmax.f32 %v589_v52, 0.0  ;;  %v597_v60 = vadd.f32 %v6474_v48, %v6306_v22  ;;  %v5582_v48 = vld [vmem:[#allocation3 + $0x2ec] ss:$16 sps:$4 sm:$0xff]  }
 0x150   :  { %8943 = vst [vmem:[#allocation55_spill] sm:$0xff] %v6716_v5  ;;  %3405 = vmatprep.subr.bf16.mxu0 %v5567_v49  ;;  %3598 = vmatprep.subr.bf16.mxu1 %v5570_v47  ;;  %v1202_v47 = vmax.f32 %v408_v62, 0.0 }
 0x151   :  { %v6722_v59 = vpop.f32.mrf.mxu0  ;;  %3094 = vmatmul.mubr.bf16.gmra.mxu0 %v6698_v12  ;;  %v6729_v49 = vpop.f32.mrf.mxu1  ;;  %3287 = vmatmul.mubr.bf16.gmra.mxu1 %v6710_v27  ;;  %v1177_v27 = vmax.f32 %v392_v35, 0.0  ;;  %v1204_v36 = vmax.f32 %v601_v40, 0.0  ;;  %v1194_v12 = vmax.f32 %v404_v46, 0.0  ;;  %v1196_v62 = vmax.f32 %v597_v60, 0.0 }
 0x152   :  { %8946 = vst [vmem:[#allocation56_spill] sm:$0xff] %v6729_v49  ;;  %3103 = vmatprep.mubr.bf16.mxu0 %v6716_v5  ;;  %3296 = vmatprep.mubr.bf16.mxu1 %v6725_v0  ;;  %v1179_v5 = vmax.f32 %v585_v29, 0.0  ;;  %v599_v35 = vadd.f32 %v6480_v37, %v6346_v16  ;;  %v418_v29 = vadd.f32 %v6532_v1, %v6301_v21 }
 0x153   :  { %v6736_v28 = vpop.f32.mrf.mxu0  ;;  %3406 = vmatpush2.bf16.msra.mxu0 %v5565_v55  ;;  %v6738_v15 = vpop.f32.mrf.mxu1  ;;  %3599 = vmatpush2.bf16.msra.mxu1 %v5568_v51  ;;  %v6744_v49 = vpack.c.bf16 %v1185_v61, %v1177_v27  ;;  %v406_v51 = vadd.f32 %v6476_v31, %v6341_v9  ;;  %v402_v27 = vadd.f32 %v6458_v24, %v6341_v9 }
 0x154   :  { %3407 = vmatprep.subr.bf16.mxu0 %v5573_v42  ;;  %3600 = vmatprep.subr.bf16.mxu1 %v5576_v43  ;;  %v6746_v55 = vpack.c.bf16 %v1187_v11, %v1179_v5  ;;  %v6758_v43 = vpack.c.bf16 %v1202_v47, %v1194_v12  ;;  %v611_v31 = vadd.f32 %v6538_v25, %v6306_v22  ;;  %v1203_v11 = vmax.f32 %v599_v35, 0.0 }
 0x155   :  { %v6740_v52 = vpop.f32.mrf.mxu0  ;;  %v6742_v0 = vpop.f32.mrf.mxu1  ;;  %8947 = vst [vmem:[#allocation57_spill] sm:$0xff] %v6744_v49  ;;  %v6767_v37 = vpack.c.bf16 %v1204_v36, %v1196_v62  ;;  %v595_v1 = vadd.f32 %v6465_v18, %v6346_v16  ;;  %v414_v12 = vadd.f32 %v6516_v56, %v6301_v21  ;;  %v1201_v24 = vmax.f32 %v406_v51, 0.0 }
 0x156   :  { %8948 = vst [vmem:[#allocation58_spill] sm:$0xff] %v6746_v55  ;;  %8949 = vst [vmem:[#allocation59_spill] sm:$0xff] %v6758_v43  ;;  %v607_v25 = vadd.f32 %v6518_v2, %v6306_v22  ;;  %v1218_v60 = vmax.f32 %v418_v29, 0.0  ;;  %v1220_v56 = vmax.f32 %v611_v31, 0.0  ;;  %v416_v2 = vadd.f32 %v6520_v38, %v6341_v9 }
 0x157   :  { %v6750_v42 = vpop.f32.mrf.mxu0  ;;  %3408 = vmatpush2.bf16.msra.mxu0 %v5571_v39  ;;  %v6756_v40 = vpop.f32.mrf.mxu1  ;;  %3601 = vmatpush2.bf16.msra.mxu1 %v5574_v19  ;;  %8950 = vst [vmem:[#allocation60_spill] sm:$0xff] %v6767_v37  ;;  %v1193_v39 = vmax.f32 %v402_v27, 0.0  ;;  %v1195_v19 = vmax.f32 %v595_v1, 0.0  ;;  %v609_v29 = vadd.f32 %v6524_v50, %v6346_v16  ;;  %v428_v27 = vadd.f32 %v6576_v6, %v6301_v21 }
 0x158   :  { %3763 = vmatprep.subr.bf16.mxu0 %v5579_v57  ;;  %3956 = vmatprep.subr.bf16.mxu1 %v5582_v48  ;;  %v1210_v57 = vmax.f32 %v414_v12, 0.0  ;;  %v1212_v62 = vmax.f32 %v607_v25, 0.0  ;;  %v412_v12 = vadd.f32 %v6500_v44, %v6341_v9  ;;  %v621_v38 = vadd.f32 %v6582_v23, %v6306_v22 }
 0x159   :  { %v6764_v5 = vpop.f32.mrf.mxu0  ;;  %3104 = vmatmul.mubr.bf16.gmra.mxu0 %v6744_v49  ;;  %v6773_v46 = vpop.f32.mrf.mxu1  ;;  %3297 = vmatmul.mubr.bf16.gmra.mxu1 %v6746_v55  ;;  %v6788_v48 = vpack.c.bf16 %v1201_v24, %v1193_v39  ;;  %v6794_v35 = vpack.c.bf16 %v1203_v11, %v1195_v19  ;;  %v605_v50 = vadd.f32 %v6509_v3, %v6346_v16  ;;  %v1217_v44 = vmax.f32 %v416_v2, 0.0 }
 0x15a   :  { %3113 = vmatprep.mubr.bf16.mxu0 %v6758_v43  ;;  %3306 = vmatprep.mubr.bf16.mxu1 %v6767_v37  ;;  %v6802_v1 = vpack.c.bf16 %v1218_v60, %v1210_v57  ;;  %v6811_v25 = vpack.c.bf16 %v1220_v56, %v1212_v62  ;;  %v424_v6 = vadd.f32 %v6560_v30, %v6301_v21  ;;  %v1219_v39 = vmax.f32 %v609_v29, 0.0 }
 0x15b   :  { %v6780_v61 = vpop.f32.mrf.mxu0  ;;  %v6782_v18 = vpop.f32.mrf.mxu1  ;;  %8951 = vst [vmem:[#allocation61_spill] sm:$0xff] %v6788_v48  ;;  %8952 = vst [vmem:[#allocation62_spill] sm:$0xff] %v6794_v35  ;;  %v617_v23 = vadd.f32 %v6562_v33, %v6306_v22  ;;  %v1234_v56 = vmax.f32 %v428_v27, 0.0  ;;  %v1209_v19 = vmax.f32 %v412_v12, 0.0  ;;  %v1236_v30 = vmax.f32 %v621_v38, 0.0 }
 0x15c   :  { %8953 = vst [vmem:[#allocation63_spill] sm:$0xff] %v6802_v1  ;;  %8954 = vst [vmem:[#allocation64_spill] sm:$0xff] %v6811_v25  ;;  %v1211_v62 = vmax.f32 %v605_v50, 0.0  ;;  %v426_v33 = vadd.f32 %v6564_v58, %v6341_v9  ;;  %v619_v27 = vadd.f32 %v6568_v54, %v6346_v16  ;;  %v438_v12 = vadd.f32 %v6620_v10, %v6301_v21 }
 0x15d   :  { %v6784_v47 = vpop.f32.mrf.mxu0  ;;  %v6786_v36 = vpop.f32.mrf.mxu1  ;;  %v6832_v2 = vpack.c.bf16 %v1217_v44, %v1209_v19  ;;  %v631_v58 = vadd.f32 %v6626_v17, %v6306_v22  ;;  %v615_v54 = vadd.f32 %v6553_v4, %v6346_v16  ;;  %v434_v10 = vadd.f32 %v6604_v53, %v6301_v21  ;;  %v8959_v17 = vld [vmem:[#allocation14_spill] sm:$0xff] }
 0x15e   :  { %v6838_v29 = vpack.c.bf16 %v1219_v39, %v1211_v62  ;;  %v627_v39 = vadd.f32 %v8959_v17, %v6306_v22  ;;  %v1250_v19 = vmax.f32 %v438_v12, 0.0  ;;  %v436_v17 = vadd.f32 %v6608_v41, %v6341_v9  ;;  %v8962_v12 = vld [vmem:[#allocation47_spill] sm:$0xff] }
 0x15f   :  { %v6792_v51 = vpop.f32.mrf.mxu0  ;;  %v6800_v31 = vpop.f32.mrf.mxu1  ;;  %8955 = vst [vmem:[#allocation65_spill] sm:$0xff] %v6832_v2  ;;  %v1252_v53 = vmax.f32 %v631_v58, 0.0  ;;  %v448_v58 = vadd.f32 %v6664_v14, %v6301_v21  ;;  %v641_v41 = vadd.f32 %v6670_v7, %v6306_v22  ;;  %v444_v14 = vadd.f32 %v6648_v8, %v6301_v21 }
 0x160   :  { %8956 = vst [vmem:[#allocation66_spill] sm:$0xff] %v6838_v29  ;;  %v637_v7 = vadd.f32 %v6650_v63, %v6306_v22  ;;  %v8970_v63 = vld [vmem:[#allocation20_spill] sm:$0xff] }
 0x161   :  { %v6808_v24 = vpop.f32.mrf.mxu0  ;;  %3114 = vmatmul.mubr.bf16.gmra.mxu0 %v6788_v48  ;;  %v6817_v11 = vpop.f32.mrf.mxu1  ;;  %3307 = vmatmul.mubr.bf16.gmra.mxu1 %v6794_v35  ;;  %v1226_v35 = vmax.f32 %v424_v6, 0.0  ;;  %v422_v6 = vadd.f32 %v6546_v32, %v6341_v9  ;;  %v1233_v32 = vmax.f32 %v426_v33, 0.0  ;;  %v1268_v8 = vmax.f32 %v641_v41, 0.0 }
 0x162   :  { %3123 = vmatprep.mubr.bf16.mxu0 %v6802_v1  ;;  %3316 = vmatprep.mubr.bf16.mxu1 %v6811_v25  ;;  %v1228_v1 = vmax.f32 %v617_v23, 0.0 }
 0x163   :  { %v6824_v60 = vpop.f32.mrf.mxu0  ;;  %v6826_v3 = vpop.f32.mrf.mxu1  ;;  %v6846_v50 = vpack.c.bf16 %v1234_v56, %v1226_v35  ;;  %v1235_v56 = vmax.f32 %v619_v27, 0.0 }
 0x164   :  { %v6855_v23 = vpack.c.bf16 %v1236_v30, %v1228_v1  ;;  %v1225_v30 = vmax.f32 %v422_v6, 0.0  ;;  %v629_v6 = vadd.f32 %v8962_v12, %v6346_v16 }
 0x165   :  { %v6828_v57 = vpop.f32.mrf.mxu0  ;;  %v6830_v48 = vpop.f32.mrf.mxu1  ;;  %8957 = vst [vmem:[#allocation67_spill] sm:$0xff] %v6846_v50 }
 0x166   :  { %8958 = vst [vmem:[#allocation68_spill] sm:$0xff] %v6855_v23  ;;  %v6876_v33 = vpack.c.bf16 %v1233_v32, %v1225_v30  ;;  %v8964_v32 = vld [vmem:[#allocation44_spill] sm:$0xff] }
 0x167   :  { %v6836_v25 = vpop.f32.mrf.mxu0  ;;  %v6844_v38 = vpop.f32.mrf.mxu1 }
 0x168   :  { %8960 = vst [vmem:[#allocation14_spill] sm:$0xff] %v6876_v33 }
 0x169   :  { %v6852_v44 = vpop.f32.mrf.mxu0  ;;  %3124 = vmatmul.mubr.bf16.gmra.mxu0 %v6832_v2  ;;  %v6861_v35 = vpop.f32.mrf.mxu1  ;;  %3317 = vmatmul.mubr.bf16.gmra.mxu1 %v6838_v29  ;;  %v1227_v2 = vmax.f32 %v615_v54, 0.0  ;;  %v1242_v29 = vmax.f32 %v434_v10, 0.0 }
 0x16a   :  { %3133 = vmatprep.mubr.bf16.mxu0 %v6846_v50  ;;  %3326 = vmatprep.mubr.bf16.mxu1 %v6855_v23  ;;  %v1244_v50 = vmax.f32 %v627_v39, 0.0  ;;  %v432_v39 = vadd.f32 %v8964_v32, %v6341_v9  ;;  %v1266_v32 = vmax.f32 %v448_v58, 0.0  ;;  %v639_v58 = vadd.f32 %v6656_v13, %v6346_v16  ;;  %v8976_v13 = vld [vmem:[#allocation49_spill] sm:$0xff] }
 0x16b   :  { %v6868_v1 = vpop.f32.mrf.mxu0  ;;  %v6870_v4 = vpop.f32.mrf.mxu1  ;;  %v6882_v27 = vpack.c.bf16 %v1235_v56, %v1227_v2  ;;  %v6890_v10 = vpack.c.bf16 %v1250_v19, %v1242_v29  ;;  %v8966_v56 = vld [vmem:[#allocation8_spill] sm:$0xff]  ;;  %v1249_v19 = vmax.f32 %v436_v17, 0.0 }
 0x16c   :  { %v6899_v2 = vpack.c.bf16 %v1252_v53, %v1244_v50  ;;  %v625_v12 = vadd.f32 %v8966_v56, %v6346_v16  ;;  %v1251_v53 = vmax.f32 %v629_v6, 0.0 }
 0x16d   :  { %v6872_v62 = vpop.f32.mrf.mxu0  ;;  %v6874_v37 = vpop.f32.mrf.mxu1  ;;  %8961 = vst [vmem:[#allocation69_spill] sm:$0xff] %v6882_v27  ;;  %8963 = vst [vmem:[#allocation47_spill] sm:$0xff] %v6890_v10 }
 0x16e   :  { %8965 = vst [vmem:[#allocation44_spill] sm:$0xff] %v6899_v2  ;;  %v1243_v55 = vmax.f32 %v625_v12, 0.0 }
 0x16f   :  { %v6880_v23 = vpop.f32.mrf.mxu0  ;;  %v6888_v54 = vpop.f32.mrf.mxu1 }
 0x170   :  { %v6926_v6 = vpack.c.bf16 %v1251_v53, %v1243_v55  ;;  %v635_v53 = vadd.f32 %v8976_v13, %v6346_v16 }
 0x171   :  { %v6896_v30 = vpop.f32.mrf.mxu0  ;;  %3134 = vmatmul.mubr.bf16.gmra.mxu0 %v6876_v33  ;;  %v6905_v29 = vpop.f32.mrf.mxu1  ;;  %3327 = vmatmul.mubr.bf16.gmra.mxu1 %v6882_v27  ;;  %v1241_v33 = vmax.f32 %v432_v39, 0.0  ;;  %v1258_v27 = vmax.f32 %v444_v14, 0.0  ;;  %v458_v39 = vadd.f32 %v6708_v45, %v6301_v21  ;;  %v8977_v45 = vld [vmem:[#allocation28_spill] sm:$0xff] }
 0x172   :  { %8967 = vst [vmem:[#allocation8_spill] sm:$0xff] %v6905_v29  ;;  %3143 = vmatprep.mubr.bf16.mxu0 %v6890_v10  ;;  %3336 = vmatprep.mubr.bf16.mxu1 %v6899_v2  ;;  %v1260_v10 = vmax.f32 %v637_v7, 0.0  ;;  %v446_v2 = vadd.f32 %v8970_v63, %v6341_v9  ;;  %8971 = vst [vmem:[#allocation20_spill] sm:$0xff] %v6926_v6  ;;  %v454_v63 = vadd.f32 %v8977_v45, %v6301_v21 }
 0x173   :  { %v6912_v50 = vpop.f32.mrf.mxu0  ;;  %v6914_v56 = vpop.f32.mrf.mxu1  ;;  %v6920_v17 = vpack.c.bf16 %v1249_v19, %v1241_v33  ;;  %v6934_v12 = vpack.c.bf16 %v1266_v32, %v1258_v27  ;;  %v8973_v33 = vld [vmem:[#allocation13_spill] sm:$0xff]  ;;  %v651_v19 = vadd.f32 %v6714_v34, %v6306_v22  ;;  %v647_v34 = vadd.f32 %v6694_v20, %v6306_v22 }
 0x174   :  { %v442_v14 = vadd.f32 %v8973_v33, %v6341_v9  ;;  %v6943_v55 = vpack.c.bf16 %v1268_v8, %v1260_v10  ;;  %v1265_v32 = vmax.f32 %v446_v2, 0.0  ;;  %v1267_v8 = vmax.f32 %v639_v58, 0.0 }
 0x175   :  { %v6916_v43 = vpop.f32.mrf.mxu0  ;;  %v6918_v49 = vpop.f32.mrf.mxu1  ;;  %8969 = vst [vmem:[#allocation71_spill] sm:$0xff] %v6920_v17  ;;  %8972 = vst [vmem:[#allocation72_spill] sm:$0xff] %v6934_v12  ;;  %v1282_v33 = vmax.f32 %v458_v39, 0.0  ;;  %v1284_v45 = vmax.f32 %v651_v19, 0.0  ;;  %v456_v20 = vadd.f32 %v6696_v26, %v6341_v9  ;;  %v8982_v39 = vld [vmem:[#allocation54_spill] sm:$0xff]  ;;  %v468_v19 = vadd.f32 %v6750_v42, %v6301_v21 }
 0x176   :  { %8968 = vst [vmem:[#allocation70_spill] sm:$0xff] %v6918_v49  ;;  %8975 = vst [vmem:[#allocation73_spill] sm:$0xff] %v6943_v55  ;;  %v661_v26 = vadd.f32 %v6756_v40, %v6306_v22  ;;  %v464_v42 = vadd.f32 %v6736_v28, %v6301_v21 }
 0x177   :  { %v6924_v29 = vpop.f32.mrf.mxu0  ;;  %v6932_v41 = vpop.f32.mrf.mxu1  ;;  %v1281_v40 = vmax.f32 %v456_v20, 0.0  ;;  %v1298_v21 = vmax.f32 %v468_v19, 0.0  ;;  %v466_v19 = vadd.f32 %v6740_v52, %v6341_v9 }
 0x179   :  { %v6940_v7 = vpop.f32.mrf.mxu0  ;;  %3144 = vmatmul.mubr.bf16.gmra.mxu0 %v6920_v17  ;;  %v6949_v27 = vpop.f32.mrf.mxu1  ;;  %3337 = vmatmul.mubr.bf16.gmra.mxu1 %v6926_v6  ;;  %v1257_v17 = vmax.f32 %v442_v14, 0.0  ;;  %v1274_v6 = vmax.f32 %v454_v63, 0.0  ;;  %v649_v14 = vadd.f32 %v8982_v39, %v6346_v16 }
 0x17a   :  { %8974 = vst [vmem:[#allocation13_spill] sm:$0xff] %v6940_v7  ;;  %8978 = vst [vmem:[#allocation49_spill] sm:$0xff] %v6949_v27  ;;  %3153 = vmatprep.mubr.bf16.mxu0 %v6934_v12  ;;  %3346 = vmatprep.mubr.bf16.mxu1 %v6943_v55  ;;  %v1259_v27 = vmax.f32 %v635_v53, 0.0  ;;  %v1276_v12 = vmax.f32 %v647_v34, 0.0 }
 0x17b   :  { %v6956_v10 = vpop.f32.mrf.mxu0  ;;  %v6958_v13 = vpop.f32.mrf.mxu1  ;;  %v6964_v2 = vpack.c.bf16 %v1265_v32, %v1257_v17  ;;  %v6978_v63 = vpack.c.bf16 %v1282_v33, %v1274_v6  ;;  %v8984_v17 = vld [vmem:[#allocation21_spill] sm:$0xff]  ;;  %v8988_v6 = vld [vmem:[#allocation6_spill] sm:$0xff] }
 0x17c   :  { %v6970_v58 = vpack.c.bf16 %v1267_v8, %v1259_v27  ;;  %v452_v32 = vadd.f32 %v8984_v17, %v6341_v9  ;;  %v6987_v27 = vpack.c.bf16 %v1284_v45, %v1276_v12  ;;  %v8987_v8 = vld [vmem:[#allocation19_spill] sm:$0xff]  ;;  %v130_v33 = vsub.s32 5, %v8988_v6 }
 0x17d   :  { %v6960_v7 = vpop.f32.mrf.mxu0  ;;  %v6962_v49 = vpop.f32.mrf.mxu1  ;;  %8980 = vst [vmem:[#allocation74_spill] sm:$0xff] %v6964_v2  ;;  %8983 = vst [vmem:[#allocation54_spill] sm:$0xff] %v6978_v63  ;;  %v645_v39 = vadd.f32 %v8987_v8, %v6346_v16  ;;  %v657_v17 = vadd.f32 %v6738_v15, %v6306_v22  ;;  %v138_v12 = vsub.s32 7, %v8988_v6  ;;  %v1283_v8 = vmax.f32 %v649_v14, 0.0  ;;  %v5769_v22 = vld [vmem:[%s8728_s2] sm:$0xff] }
 0x17e   :  { %8979 = vst [vmem:[#allocation28_spill] sm:$0xff] %v6962_v49  ;;  %8981 = vst [vmem:[#allocation75_spill] sm:$0xff] %v6970_v58  ;;  %v7011_v15 = vrot.slane %v5769_v22, %v130_v33  ;;  %v126_v52 = vsub.s32 4, %v8988_v6 }
 0x17f   :  { %v6968_v55 = vpop.f32.mrf.mxu0  ;;  %v6976_v53 = vpop.f32.mrf.mxu1  ;;  %8986 = vst [vmem:[#allocation76_spill] sm:$0xff] %v6987_v27  ;;  %v1292_v14 = vmax.f32 %v657_v17, 0.0 }
 0x180   :  { %v704_v33 = vadd.f32 %v6792_v51, %v7011_v15  ;;  %v8995_v51 = vld [vmem:[#allocation56_spill] sm:$0xff] }
 0x181   :  { %v6984_v34 = vpop.f32.mrf.mxu0  ;;  %3154 = vmatmul.mubr.bf16.gmra.mxu0 %v6964_v2  ;;  %v6994_v49 = vpop.f32.mrf.mxu1  ;;  %3347 = vmatmul.mubr.bf16.gmra.mxu1 %v6970_v58  ;;  %v1273_v2 = vmax.f32 %v452_v32, 0.0  ;;  %v1275_v58 = vmax.f32 %v645_v39, 0.0  ;;  %v7019_v32 = vrot.slane %v5769_v22, %v138_v12  ;;  %v655_v12 = vadd.f32 %v8995_v51, %v6346_v16 }
 0x182   :  { %8985 = vst [vmem:[#allocation21_spill] sm:$0xff] %v6984_v34  ;;  %8989 = vst [vmem:[#allocation19_spill] sm:$0xff] %v6994_v49  ;;  %3163 = vmatprep.mubr.bf16.mxu0 %v6978_v63  ;;  %3356 = vmatprep.mubr.bf16.mxu1 %v6987_v27  ;;  %v1300_v49 = vmax.f32 %v661_v26, 0.0  ;;  %v1290_v63 = vmax.f32 %v464_v42, 0.0  ;;  %v659_v42 = vadd.f32 %v6742_v0, %v6346_v16 }
 0x183   :  { %v7002_v45 = vpop.f32.mrf.mxu0  ;;  %v7004_v28 = vpop.f32.mrf.mxu1  ;;  %v7015_v27 = vpack.c.bf16 %v1281_v40, %v1273_v2  ;;  %v7023_v39 = vpack.c.bf16 %v1283_v8, %v1275_v58  ;;  %v462_v40 = vadd.f32 %v6722_v59, %v6341_v9  ;;  %v897_v17 = vadd.f32 %v6800_v31, %v7019_v32 }
 0x184   :  { %v7031_v2 = vpack.c.bf16 %v1298_v21, %v1290_v63  ;;  %v7041_v0 = vpack.c.bf16 %v1300_v49, %v1292_v14  ;;  %v134_v63 = vsub.s32 6, %v8988_v6  ;;  %v700_v8 = vadd.f32 %v6780_v61, %v7011_v15 }
 0x185   :  { %v7006_v34 = vpop.f32.mrf.mxu0  ;;  %v7013_v20 = vpop.f32.mrf.mxu1  ;;  %8991 = vst [vmem:[#allocation77_spill] sm:$0xff] %v7015_v27  ;;  %8992 = vst [vmem:[#allocation78_spill] sm:$0xff] %v7023_v39  ;;  %v1297_v59 = vmax.f32 %v466_v19, 0.0  ;;  %v893_v31 = vadd.f32 %v6782_v18, %v7019_v32  ;;  %v1299_v16 = vmax.f32 %v659_v42, 0.0  ;;  %v1062_v21 = vmax.f32 %v704_v33, 0.0 }
 0x186   :  { %8990 = vst [vmem:[#allocation6_spill] sm:$0xff] %v7006_v34  ;;  %8993 = vst [vmem:[#allocation79_spill] sm:$0xff] %v7031_v2  ;;  %v1289_v14 = vmax.f32 %v462_v40, 0.0  ;;  %v7059_v61 = vrot.slane %v5769_v22, %v126_v52  ;;  %v1064_v51 = vmax.f32 %v897_v17, 0.0  ;;  %v1054_v19 = vmax.f32 %v700_v8, 0.0 }
 0x187   :  { %v7021_v26 = vpop.f32.mrf.mxu0  ;;  %v7029_v34 = vpop.f32.mrf.mxu1  ;;  %8994 = vst [vmem:[#allocation80_spill] sm:$0xff] %v7041_v0 }
 0x188   :  { %v7067_v18 = vpack.c.bf16 %v1297_v59, %v1289_v14  ;;  %v702_v42 = vadd.f32 %v6784_v47, %v7059_v61  ;;  %v907_v47 = vadd.f32 %v6844_v38, %v7019_v32  ;;  %v903_v38 = vadd.f32 %v6826_v3, %v7019_v32 }
 0x189   :  { %v7038_v58 = vpop.f32.mrf.mxu0  ;;  %3164 = vmatmul.mubr.bf16.gmra.mxu0 %v7015_v27  ;;  %v7048_v9 = vpop.f32.mrf.mxu1  ;;  %3357 = vmatmul.mubr.bf16.gmra.mxu1 %v7023_v39  ;;  %v1291_v39 = vmax.f32 %v655_v12, 0.0  ;;  %v7081_v12 = vpack.c.bf16 %v1062_v21, %v1054_v19  ;;  %v712_v3 = vadd.f32 %v6828_v57, %v7059_v61  ;;  %v708_v57 = vadd.f32 %v6808_v24, %v7059_v61 }
 0x18a   :  { %8996 = vst [vmem:[#allocation56_spill] sm:$0xff] %v7048_v9  ;;  %3173 = vmatprep.mubr.bf16.mxu0 %v7031_v2  ;;  %3366 = vmatprep.mubr.bf16.mxu1 %v7041_v0  ;;  %v7063_v2 = vrot.slane %v5769_v22, %v134_v63  ;;  %8997 = vst [vmem:[#allocation81_spill] sm:$0xff] %v7067_v18  ;;  %v1056_v0 = vmax.f32 %v893_v31, 0.0  ;;  %v714_v22 = vadd.f32 %v6836_v25, %v7011_v15 }
 0x18b   :  { %v7055_v49 = vpop.f32.mrf.mxu0  ;;  %v7057_v6 = vpop.f32.mrf.mxu1  ;;  %v7073_v40 = vpack.c.bf16 %v1299_v16, %v1291_v39  ;;  %8999 = vst [vmem:[#allocation83_spill] sm:$0xff] %v7081_v12  ;;  %v698_v63 = vadd.f32 %v6764_v5, %v7059_v61  ;;  %v710_v25 = vadd.f32 %v6824_v60, %v7011_v15  ;;  %v1061_v5 = vmax.f32 %v702_v42, 0.0 }
 0x18c   :  { %v895_v52 = vadd.f32 %v6786_v36, %v7063_v2  ;;  %v7090_v39 = vpack.c.bf16 %v1064_v51, %v1056_v0  ;;  %v891_v36 = vadd.f32 %v6773_v46, %v7063_v2  ;;  %v1078_v16 = vmax.f32 %v714_v22, 0.0 }
 0x18d   :  { %v7061_v27 = vpop.f32.mrf.mxu0  ;;  %v7065_v9 = vpop.f32.mrf.mxu1  ;;  %8998 = vst [vmem:[#allocation82_spill] sm:$0xff] %v7073_v40  ;;  %v1053_v21 = vmax.f32 %v698_v63, 0.0  ;;  %v1080_v60 = vmax.f32 %v907_v47, 0.0  ;;  %v1070_v19 = vmax.f32 %v710_v25, 0.0  ;;  %v724_v47 = vadd.f32 %v6880_v23, %v7011_v15 }
 0x18e   :  { %9000 = vst [vmem:[#allocation84_spill] sm:$0xff] %v7090_v39  ;;  %v1063_v31 = vmax.f32 %v895_v52, 0.0  ;;  %v1055_v51 = vmax.f32 %v891_v36, 0.0  ;;  %v905_v52 = vadd.f32 %v6830_v48, %v7063_v2  ;;  %v901_v48 = vadd.f32 %v6817_v11, %v7063_v2 }
 0x18f   :  { %v7071_v33 = vpop.f32.mrf.mxu0  ;;  %v7079_v17 = vpop.f32.mrf.mxu1  ;;  %v7111_v42 = vpack.c.bf16 %v1061_v5, %v1053_v21  ;;  %v7125_v25 = vpack.c.bf16 %v1078_v16, %v1070_v19  ;;  %v5580_v5 = vld [vmem:[#allocation3 + $0x2e8] ss:$16 sps:$4 sm:$0xff]   ;;  %v917_v21 = vadd.f32 %v6888_v54, %v7019_v32  ;;  %v720_v16 = vadd.f32 %v6868_v1, %v7011_v15 }
 0x190   :  { %v7119_v63 = vpack.c.bf16 %v1063_v31, %v1055_v51  ;;  %v5588_v51 = vld [vmem:[#allocation3 + $0x2cc] ss:$16 sps:$4 sm:$0xff]   ;;  %v1077_v24 = vmax.f32 %v712_v3, 0.0  ;;  %v1079_v11 = vmax.f32 %v905_v52, 0.0  ;;  %v913_v54 = vadd.f32 %v6870_v4, %v7019_v32  ;;  %v5586_v1 = vld [vmem:[#allocation3 + $0x2c8] ss:$16 sps:$4 sm:$0xff]  }
 0x191   :  { %v7087_v8 = vpop.f32.mrf.mxu0  ;;  %3174 = vmatmul.mubr.bf16.gmra.mxu0 %v7067_v18  ;;  %v7096_v59 = vpop.f32.mrf.mxu1  ;;  %3367 = vmatmul.mubr.bf16.gmra.mxu1 %v7073_v40  ;;  %9001 = vst [vmem:[#allocation85_spill] sm:$0xff] %v7111_v42  ;;  %9003 = vst [vmem:[#allocation87_spill] sm:$0xff] %v7125_v25  ;;  %v1096_v3 = vmax.f32 %v917_v21, 0.0  ;;  %v5594_v4 = vld [vmem:[#allocation3 + $0x2ac] ss:$16 sps:$4 sm:$0xff]   ;;  %v915_v21 = vadd.f32 %v6874_v37, %v7063_v2 }
 0x192   :  { %3409 = vmatprep.mubr.bf16.mxu0 %v7081_v12  ;;  %3602 = vmatprep.mubr.bf16.mxu1 %v7090_v39  ;;  %v1072_v12 = vmax.f32 %v903_v38, 0.0  ;;  %v5577_v39 = vld [vmem:[#allocation3 + $0xe8] ss:$16 sps:$4 sm:$0xff]   ;;  %9002 = vst [vmem:[#allocation86_spill] sm:$0xff] %v7119_v63  ;;  %v5585_v38 = vld [vmem:[#allocation3 + $0xcc] ss:$16 sps:$4 sm:$0xff]  }
 0x193   :  { %v7103_v0 = vpop.f32.mrf.mxu0  ;;  %v7105_v46 = vpop.f32.mrf.mxu1  ;;  %v5600_v37 = vld [vmem:[#allocation3 + $0x28c] ss:$16 sps:$4 sm:$0xff]  }
 0x194   :  { %v7136_v23 = vpack.c.bf16 %v1080_v60, %v1072_v12  ;;  %v5583_v60 = vld [vmem:[#allocation3 + $0xc8] ss:$16 sps:$4 sm:$0xff]  }
 0x195   :  { %v7107_v14 = vpop.f32.mrf.mxu0  ;;  %v7109_v40 = vpop.f32.mrf.mxu1 }
 0x196   :  { %9005 = vst [vmem:[#allocation89_spill] sm:$0xff] %v7136_v23 }
 0x197   :  { %v7117_v22 = vpop.f32.mrf.mxu0  ;;  %v7123_v36 = vpop.f32.mrf.mxu1 }
 0x199   :  { %v7133_v31 = vpop.f32.mrf.mxu0  ;;  %3410 = vmatmul.mubr.bf16.vlgmr.msra.gmra.mxu0 %v7111_v42  ;;  %v7140_v19 = vpop.f32.mrf.mxu1  ;;  %3603 = vmatmul.mubr.bf16.vlgmr.msra.gmra.mxu1 %v7119_v63  ;;  %v1094_v42 = vmax.f32 %v724_v47, 0.0  ;;  %v5591_v63 = vld [vmem:[#allocation3 + $0xac] ss:$16 sps:$4 sm:$0xff]  }
 0x19a   :  { %9004 = vst [vmem:[#allocation88_spill] sm:$0xff] %v7133_v31  ;;  %9006 = vst [vmem:[#allocation90_spill] sm:$0xff] %v7140_v19  ;;  %3419 = vmatprep.mubr.bf16.mxu0 %v7125_v25  ;;  %3612 = vmatprep.mubr.bf16.mxu1 %v7136_v23  ;;  %v1069_v19 = vmax.f32 %v708_v57, 0.0  ;;  %v1071_v25 = vmax.f32 %v901_v48, 0.0  ;;  %v1086_v31 = vmax.f32 %v720_v16, 0.0 }
 0x19b   :  { %3764 = vmatpush1.bf16.msra.mxu0 %v5577_v39  ;;  %v7147_v12 = vpop.f32.mrf.mxu0  ;;  %v7149_v18 = vpop.f32.mrf.mxu1  ;;  %3957 = vmatpush1.bf16.msra.mxu1 %v5580_v5  ;;  %v722_v39 = vadd.f32 %v6872_v62, %v7059_v61  ;;  %v718_v5 = vadd.f32 %v6852_v44, %v7059_v61  ;;  %v5589_v48 = vld [vmem:[#allocation3 + $0xa8] ss:$16 sps:$4 sm:$0xff]   ;;  %v734_v62 = vadd.f32 %v6924_v29, %v7011_v15 }
 0x19c   :  { %9007 = vst [vmem:[#allocation91_spill] sm:$0xff] %v7149_v18  ;;  %3765 = vmatprep.subr.bf16.mxu0 %v5585_v38  ;;  %3958 = vmatprep.subr.bf16.mxu1 %v5588_v51  ;;  %v7157_v47 = vpack.c.bf16 %v1077_v24, %v1069_v19  ;;  %v7159_v18 = vpack.c.bf16 %v1079_v11, %v1071_v25  ;;  %v1088_v38 = vmax.f32 %v913_v54, 0.0  ;;  %v5592_v25 = vld [vmem:[#allocation3 + $0x2a8] ss:$16 sps:$4 sm:$0xff]   ;;  %v5597_v19 = vld [vmem:[#allocation3 + $0x8c] ss:$16 sps:$4 sm:$0xff]  }
 0x19d   :  { %v7151_v52 = vpop.f32.mrf.mxu0  ;;  %v7155_v23 = vpop.f32.mrf.mxu1  ;;  %v7171_v16 = vpack.c.bf16 %v1094_v42, %v1086_v31  ;;  %v927_v44 = vadd.f32 %v6932_v41, %v7019_v32  ;;  %v911_v29 = vadd.f32 %v6861_v35, %v7063_v2  ;;  %v1093_v42 = vmax.f32 %v722_v39, 0.0  ;;  %v5598_v35 = vld [vmem:[#allocation3 + $0x288] ss:$16 sps:$4 sm:$0xff]   ;;  %v5603_v39 = vld [vmem:[#allocation3 + $0x6c] ss:$16 sps:$4 sm:$0xff]  }
 0x19e   :  { %9008 = vst [vmem:[#allocation92_spill] sm:$0xff] %v7157_v47  ;;  %9009 = vst [vmem:[#allocation93_spill] sm:$0xff] %v7159_v18  ;;  %v7178_v11 = vpack.c.bf16 %v1096_v3, %v1088_v38  ;;  %v923_v41 = vadd.f32 %v6914_v56, %v7019_v32  ;;  %v1095_v3 = vmax.f32 %v915_v21, 0.0  ;;  %v5606_v56 = vld [vmem:[#allocation3 + $0x26c] ss:$16 sps:$4 sm:$0xff]  }
 0x19f   :  { %v7163_v57 = vpop.f32.mrf.mxu0  ;;  %3766 = vmatpush1.bf16.msra.mxu0 %v5583_v60  ;;  %v7169_v51 = vpop.f32.mrf.mxu1  ;;  %9010 = vst [vmem:[#allocation94_spill] sm:$0xff] %v7171_v16  ;;  %3959 = vmatpush1.bf16.msra.mxu1 %v5586_v1  ;;  %v5595_v60 = vld [vmem:[#allocation3 + $0x88] ss:$16 sps:$4 sm:$0xff]   ;;  %v1085_v1 = vmax.f32 %v718_v5, 0.0  ;;  %v1112_v38 = vmax.f32 %v927_v44, 0.0  ;;  %v728_v5 = vadd.f32 %v6896_v30, %v7059_v61 }
 0x1a0   :  { %3767 = vmatprep.subr.bf16.mxu0 %v5591_v63  ;;  %9011 = vst [vmem:[#allocation95_spill] sm:$0xff] %v7178_v11  ;;  %3960 = vmatprep.subr.bf16.mxu1 %v5594_v4  ;;  %v730_v63 = vadd.f32 %v6912_v50, %v7011_v15  ;;  %v1110_v4 = vmax.f32 %v734_v62, 0.0  ;;  %v1104_v21 = vmax.f32 %v923_v41, 0.0  ;;  %v732_v62 = vadd.f32 %v6916_v43, %v7059_v61  ;;  %v5604_v30 = vld [vmem:[#allocation3 + $0x268] ss:$16 sps:$4 sm:$0xff]   ;;  %v9017_v41 = vld [vmem:[#allocation8_spill] sm:$0xff] }
 0x1a1   :  { %v7175_v24 = vpop.f32.mrf.mxu0  ;;  %3420 = vmatmul.mubr.bf16.gmra.mxu0 %v7157_v47  ;;  %v7184_v31 = vpop.f32.mrf.mxu1  ;;  %3613 = vmatmul.mubr.bf16.gmra.mxu1 %v7159_v18  ;;  %v1087_v18 = vmax.f32 %v911_v29, 0.0  ;;  %v5609_v43 = vld [vmem:[#allocation3 + $0x4c] ss:$16 sps:$4 sm:$0xff]  }
 0x1a2   :  { %9012 = vst [vmem:[#allocation96_spill] sm:$0xff] %v7184_v31  ;;  %3429 = vmatprep.mubr.bf16.mxu0 %v7171_v16  ;;  %3622 = vmatprep.mubr.bf16.mxu1 %v7178_v11  ;;  %v7197_v11 = vpack.c.bf16 %v1093_v42, %v1085_v1  ;;  %v1102_v47 = vmax.f32 %v730_v63, 0.0  ;;  %v744_v42 = vadd.f32 %v6968_v55, %v7011_v15  ;;  %v5612_v55 = vld [vmem:[#allocation3 + $0x24c] ss:$16 sps:$4 sm:$0xff]  }
 0x1a3   :  { %v7191_v54 = vpop.f32.mrf.mxu0  ;;  %3768 = vmatpush1.bf16.msra.mxu0 %v5589_v48  ;;  %v7193_v50 = vpop.f32.mrf.mxu1  ;;  %3961 = vmatpush1.bf16.msra.mxu1 %v5592_v25  ;;  %v9014_v25 = vld [vmem:[#allocation70_spill] sm:$0xff]  ;;  %v7209_v29 = vpack.c.bf16 %v1095_v3, %v1087_v18  ;;  %v7224_v18 = vpack.c.bf16 %v1112_v38, %v1104_v21  ;;  %v1109_v3 = vmax.f32 %v732_v62, 0.0  ;;  %v5607_v38 = vld [vmem:[#allocation3 + $0x48] ss:$16 sps:$4 sm:$0xff]  }
 0x1a4   :  { %3769 = vmatprep.subr.bf16.mxu0 %v5597_v19  ;;  %3962 = vmatprep.subr.bf16.mxu1 %v5600_v37  ;;  %9013 = vst [vmem:[#allocation97_spill] sm:$0xff] %v7197_v11  ;;  %v925_v19 = vadd.f32 %v9014_v25, %v7063_v2  ;;  %v5601_v37 = vld [vmem:[#allocation3 + $0x68] ss:$16 sps:$4 sm:$0xff]   ;;  %v7215_v1 = vpack.c.bf16 %v1110_v4, %v1102_v47 }
 0x1a5   :  { %v7195_v16 = vpop.f32.mrf.mxu0  ;;  %v7199_v48 = vpop.f32.mrf.mxu1  ;;  %9015 = vst [vmem:[#allocation70_spill] sm:$0xff] %v7209_v29  ;;  %v921_v25 = vadd.f32 %v9017_v41, %v7063_v2  ;;  %9019 = vst [vmem:[#allocation99_spill] sm:$0xff] %v7224_v18  ;;  %v740_v47 = vadd.f32 %v6956_v10, %v7011_v15  ;;  %v5610_v10 = vld [vmem:[#allocation3 + $0x248] ss:$16 sps:$4 sm:$0xff]   ;;  %v5615_v41 = vld [vmem:[#allocation3 + $0x2c] ss:$16 sps:$4 sm:$0xff]  }
 0x1a6   :  { %9016 = vst [vmem:[#allocation98_spill] sm:$0xff] %v7215_v1  ;;  %v1111_v4 = vmax.f32 %v925_v19, 0.0 }
 0x1a7   :  { %v7207_v44 = vpop.f32.mrf.mxu0  ;;  %3770 = vmatpush1.bf16.msra.mxu0 %v5595_v60  ;;  %v7213_v63 = vpop.f32.mrf.mxu1  ;;  %3963 = vmatpush1.bf16.msra.mxu1 %v5598_v35  ;;  %v937_v60 = vadd.f32 %v6976_v53, %v7019_v32  ;;  %v933_v53 = vadd.f32 %v6958_v13, %v7019_v32  ;;  %v5618_v13 = vld [vmem:[#allocation3 + $0x22c] ss:$16 sps:$4 sm:$0xff]  }
 0x1a8   :  { %3771 = vmatprep.subr.bf16.mxu0 %v5603_v39  ;;  %3964 = vmatprep.subr.bf16.mxu1 %v5606_v56  ;;  %v1126_v56 = vmax.f32 %v744_v42, 0.0 }
 0x1a9   :  { %v7221_v31 = vpop.f32.mrf.mxu0  ;;  %3430 = vmatmul.mubr.bf16.gmra.mxu0 %v7197_v11  ;;  %v7228_v35 = vpop.f32.mrf.mxu1  ;;  %3623 = vmatmul.mubr.bf16.gmra.mxu1 %v7209_v29  ;;  %v1101_v29 = vmax.f32 %v728_v5, 0.0  ;;  %v1128_v62 = vmax.f32 %v937_v60, 0.0  ;;  %v1118_v11 = vmax.f32 %v740_v47, 0.0  ;;  %v1120_v5 = vmax.f32 %v933_v53, 0.0  ;;  %v5613_v60 = vld [vmem:[#allocation3 + $0x28] ss:$16 sps:$4 sm:$0xff]  }
 0x1aa   :  { %9018 = vst [vmem:[#allocation8_spill] sm:$0xff] %v7221_v31  ;;  %9020 = vst [vmem:[#allocation100_spill] sm:$0xff] %v7228_v35  ;;  %3439 = vmatprep.mubr.bf16.mxu0 %v7215_v1  ;;  %3632 = vmatprep.mubr.bf16.mxu1 %v7224_v18  ;;  %v1103_v1 = vmax.f32 %v921_v25, 0.0  ;;  %v742_v18 = vadd.f32 %v6960_v7, %v7059_v61  ;;  %v754_v7 = vadd.f32 %v7021_v26, %v7011_v15  ;;  %v9028_v26 = vld [vmem:[#allocation49_spill] sm:$0xff] }
 0x1ab   :  { %v7235_v39 = vpop.f32.mrf.mxu0  ;;  %3772 = vmatpush1.bf16.msra.mxu0 %v5601_v37  ;;  %v7237_v21 = vpop.f32.mrf.mxu1  ;;  %3965 = vmatpush1.bf16.msra.mxu1 %v5604_v30  ;;  %v7245_v42 = vpack.c.bf16 %v1109_v3, %v1101_v29  ;;  %v9023_v30 = vld [vmem:[#allocation13_spill] sm:$0xff]  ;;  %v7259_v29 = vpack.c.bf16 %v1126_v56, %v1118_v11  ;;  %v750_v56 = vadd.f32 %v7002_v45, %v7011_v15 }
 0x1ac   :  { %3773 = vmatprep.subr.bf16.mxu0 %v5609_v43  ;;  %3966 = vmatprep.subr.bf16.mxu1 %v5612_v55  ;;  %v7247_v35 = vpack.c.bf16 %v1111_v4, %v1103_v1  ;;  %v738_v43 = vadd.f32 %v9023_v30, %v7059_v61  ;;  %v9024_v55 = vld [vmem:[#allocation28_spill] sm:$0xff]  ;;  %v5616_v1 = vld [vmem:[#allocation3 + $0x228] ss:$16 sps:$4 sm:$0xff]   ;;  %v5621_v3 = vld [vmem:[#allocation3 + $0xc] ss:$16 sps:$4 sm:$0xff]   ;;  %v947_v4 = vadd.f32 %v7029_v34, %v7019_v32  ;;  %v1125_v11 = vmax.f32 %v742_v18, 0.0 }
 0x1ad   :  { %v7239_v19 = vpop.f32.mrf.mxu0  ;;  %v7243_v37 = vpop.f32.mrf.mxu1  ;;  %9021 = vst [vmem:[#allocation101_spill] sm:$0xff] %v7245_v42  ;;  %v935_v47 = vadd.f32 %v9024_v55, %v7063_v2  ;;  %9025 = vst [vmem:[#allocation13_spill] sm:$0xff] %v7259_v29  ;;  %v5624_v30 = vld [vmem:[#allocation3 + $0x20c] ss:$16 sps:$4 sm:$0xff]   ;;  %v931_v55 = vadd.f32 %v9028_v26, %v7063_v2  ;;  %v943_v34 = vadd.f32 %v7004_v28, %v7019_v32  ;;  %v1142_v26 = vmax.f32 %v754_v7, 0.0 }
 0x1ae   :  { %9022 = vst [vmem:[#allocation102_spill] sm:$0xff] %v7247_v35  ;;  %v1117_v18 = vmax.f32 %v738_v43, 0.0  ;;  %v5630_v28 = vld [vmem:[#allocation3 + $0x3ec] ss:$16 sps:$4 sm:$0xff]  }
 0x1af   :  { %v7251_v25 = vpop.f32.mrf.mxu0  ;;  %3774 = vmatpush1.bf16.msra.mxu0 %v5607_v38  ;;  %v7257_v31 = vpop.f32.mrf.mxu1  ;;  %3967 = vmatpush1.bf16.msra.mxu1 %v5610_v10  ;;  %v7266_v38 = vpack.c.bf16 %v1128_v62, %v1120_v5  ;;  %v5619_v62 = vld [vmem:[#allocation3 + $0x8] ss:$16 sps:$4 sm:$0xff]   ;;  %v1127_v5 = vmax.f32 %v935_v47, 0.0  ;;  %v1136_v7 = vmax.f32 %v943_v34, 0.0 }
 0x1b0   :  { %3775 = vmatprep.subr.bf16.mxu0 %v5615_v41  ;;  %3968 = vmatprep.subr.bf16.mxu1 %v5618_v13  ;;  %v5622_v13 = vld [vmem:[#allocation3 + $0x208] ss:$16 sps:$4 sm:$0xff]  }
 0x1b1   :  { %v7263_v53 = vpop.f32.mrf.mxu0  ;;  %3440 = vmatmul.mubr.bf16.gmra.mxu0 %v7245_v42  ;;  %9027 = vst [vmem:[#allocation103_spill] sm:$0xff] %v7266_v38  ;;  %v7272_v10 = vpop.f32.mrf.mxu1  ;;  %3633 = vmatmul.mubr.bf16.gmra.mxu1 %v7247_v35  ;;  %v5627_v35 = vld [vmem:[#allocation3 + $0x1ec] ss:$16 sps:$4 sm:$0xff]   ;;  %v1144_v42 = vmax.f32 %v947_v4, 0.0  ;;  %v5628_v34 = vld [vmem:[#allocation3 + $0x3e8] ss:$16 sps:$4 sm:$0xff]  }
 0x1b2   :  { %9026 = vst [vmem:[#allocation28_spill] sm:$0xff] %v7263_v53  ;;  %9029 = vst [vmem:[#allocation49_spill] sm:$0xff] %v7272_v10  ;;  %3449 = vmatprep.mubr.bf16.mxu0 %v7259_v29  ;;  %3642 = vmatprep.mubr.bf16.mxu1 %v7266_v38  ;;  %v1119_v10 = vmax.f32 %v931_v55, 0.0  ;;  %v7285_v38 = vpack.c.bf16 %v1125_v11, %v1117_v18  ;;  %v1134_v53 = vmax.f32 %v750_v56, 0.0  ;;  %v9033_v43 = vld [vmem:[#allocation21_spill] sm:$0xff] }
 0x1b3   :  { %v7279_v41 = vpop.f32.mrf.mxu0  ;;  %3776 = vmatpush1.bf16.msra.mxu0 %v5613_v60  ;;  %v7281_v45 = vpop.f32.mrf.mxu1  ;;  %3969 = vmatpush1.bf16.msra.mxu1 %v5616_v1  ;;  %v748_v47 = vadd.f32 %v9033_v43, %v7059_v61  ;;  %v764_v11 = vadd.f32 %v7071_v33, %v7011_v15  ;;  %v9037_v43 = vld [vmem:[#allocation19_spill] sm:$0xff] }
 0x1b4   :  { %9030 = vst [vmem:[#allocation104_spill] sm:$0xff] %v7281_v45  ;;  %3777 = vmatprep.subr.bf16.mxu0 %v5621_v3  ;;  %3970 = vmatprep.subr.bf16.mxu1 %v5624_v30  ;;  %9031 = vst [vmem:[#allocation105_spill] sm:$0xff] %v7285_v38  ;;  %v9034_v45 = vld [vmem:[#allocation6_spill] sm:$0xff]  ;;  %v945_v3 = vadd.f32 %v7013_v20, %v7063_v2  ;;  %v5625_v30 = vld [vmem:[#allocation3 + $0x1e8] ss:$16 sps:$4 sm:$0xff]   ;;  %v7297_v55 = vpack.c.bf16 %v1127_v5, %v1119_v10 }
 0x1b5   :  { %v7283_v29 = vpop.f32.mrf.mxu0  ;;  %v7287_v60 = vpop.f32.mrf.mxu1  ;;  %v752_v1 = vadd.f32 %v9034_v45, %v7059_v61  ;;  %v7303_v18 = vpack.c.bf16 %v1142_v26, %v1134_v53  ;;  %v5633_v45 = vld [vmem:[#allocation3 + $0x1cc] ss:$16 sps:$4 sm:$0xff]   ;;  %v941_v20 = vadd.f32 %v9037_v43, %v7063_v2  ;;  %v7312_v10 = vpack.c.bf16 %v1144_v42, %v1136_v7  ;;  %v5631_v26 = vld [vmem:[#allocation3 + $0x1c8] ss:$16 sps:$4 sm:$0xff]  }
 0x1b6   :  { %9032 = vst [vmem:[#allocation106_spill] sm:$0xff] %v7287_v60  ;;  %9035 = vst [vmem:[#allocation21_spill] sm:$0xff] %v7297_v55  ;;  %v5636_v33 = vld [vmem:[#allocation3 + $0x3cc] ss:$16 sps:$4 sm:$0xff]   ;;  %v760_v53 = vadd.f32 %v7055_v49, %v7011_v15  ;;  %v1143_v5 = vmax.f32 %v945_v3, 0.0 }
 0x1b7   :  { %v7295_v4 = vpop.f32.mrf.mxu0  ;;  %3778 = vmatpush1.bf16.msra.mxu0 %v5619_v62  ;;  %v7301_v56 = vpop.f32.mrf.mxu1  ;;  %9036 = vst [vmem:[#allocation6_spill] sm:$0xff] %v7303_v18  ;;  %3971 = vmatpush1.bf16.msra.mxu1 %v5622_v13  ;;  %v957_v62 = vadd.f32 %v7079_v17, %v7019_v32  ;;  %9038 = vst [vmem:[#allocation19_spill] sm:$0xff] %v7312_v10  ;;  %v1141_v13 = vmax.f32 %v752_v1, 0.0  ;;  %v953_v17 = vadd.f32 %v7057_v6, %v7019_v32  ;;  %v5634_v49 = vld [vmem:[#allocation3 + $0x3c8] ss:$16 sps:$4 sm:$0xff]  }
 0x1b8   :  { %3779 = vmatprep.subr.bf16.mxu0 %v5627_v35  ;;  %3972 = vmatprep.subr.bf16.mxu1 %v5630_v28  ;;  %v1158_v28 = vmax.f32 %v764_v11, 0.0  ;;  %v5639_v43 = vld [vmem:[#allocation3 + $0x1ac] ss:$16 sps:$4 sm:$0xff]  }
 0x1b9   :  { %v7309_v60 = vpop.f32.mrf.mxu0  ;;  %3450 = vmatmul.mubr.bf16.gmra.mxu0 %v7285_v38  ;;  %v7316_v35 = vpop.f32.mrf.mxu1  ;;  %3643 = vmatmul.mubr.bf16.gmra.mxu1 %v7297_v55  ;;  %v1133_v55 = vmax.f32 %v748_v47, 0.0  ;;  %v1160_v1 = vmax.f32 %v957_v62, 0.0  ;;  %v5642_v6 = vld [vmem:[#allocation3 + $0x3ac] ss:$16 sps:$4 sm:$0xff]   ;;  %v1150_v38 = vmax.f32 %v760_v53, 0.0  ;;  %v1152_v47 = vmax.f32 %v953_v17, 0.0 }
 0x1ba   :  { %9039 = vst [vmem:[#allocation107_spill] sm:$0xff] %v7316_v35  ;;  %3459 = vmatprep.mubr.bf16.mxu0 %v7303_v18  ;;  %3652 = vmatprep.mubr.bf16.mxu1 %v7312_v10  ;;  %v1135_v18 = vmax.f32 %v941_v20, 0.0  ;;  %v762_v10 = vadd.f32 %v7061_v27, %v7059_v61  ;;  %v5637_v20 = vld [vmem:[#allocation3 + $0x1a8] ss:$16 sps:$4 sm:$0xff]   ;;  %v955_v62 = vadd.f32 %v7065_v9, %v7063_v2  ;;  %v5645_v53 = vld [vmem:[#allocation3 + $0x18c] ss:$16 sps:$4 sm:$0xff]  }
 0x1bb   :  { %v7323_v42 = vpop.f32.mrf.mxu0  ;;  %3780 = vmatpush2.bf16.msra.mxu0 %v5625_v30  ;;  %v7325_v7 = vpop.f32.mrf.mxu1  ;;  %3973 = vmatpush2.bf16.msra.mxu1 %v5628_v34  ;;  %v7333_v11 = vpack.c.bf16 %v1141_v13, %v1133_v55  ;;  %v758_v34 = vadd.f32 %v7038_v58, %v7059_v61  ;;  %v774_v27 = vadd.f32 %v7117_v22, %v7011_v15  ;;  %v5648_v9 = vld [vmem:[#allocation3 + $0x38c] ss:$16 sps:$4 sm:$0xff]   ;;  %v9044_v22 = vld [vmem:[#allocation56_spill] sm:$0xff] }
 0x1bc   :  { %3781 = vmatprep.subr.bf16.mxu0 %v5633_v45  ;;  %3974 = vmatprep.subr.bf16.mxu1 %v5636_v33  ;;  %v7335_v35 = vpack.c.bf16 %v1143_v5, %v1135_v18  ;;  %v7347_v55 = vpack.c.bf16 %v1158_v28, %v1150_v38  ;;  %v5640_v18 = vld [vmem:[#allocation3 + $0x3a8] ss:$16 sps:$4 sm:$0xff]   ;;  %v967_v58 = vadd.f32 %v7123_v36, %v7019_v32  ;;  %v1157_v38 = vmax.f32 %v762_v10, 0.0 }
 0x1bd   :  { %v7327_v3 = vpop.f32.mrf.mxu0  ;;  %v7331_v30 = vpop.f32.mrf.mxu1  ;;  %9040 = vst [vmem:[#allocation108_spill] sm:$0xff] %v7333_v11  ;;  %v7354_v5 = vpack.c.bf16 %v1160_v1, %v1152_v47  ;;  %v951_v17 = vadd.f32 %v9044_v22, %v7063_v2  ;;  %v963_v36 = vadd.f32 %v7105_v46, %v7019_v32  ;;  %v5646_v1 = vld [vmem:[#allocation3 + $0x388] ss:$16 sps:$4 sm:$0xff]   ;;  %v1149_v10 = vmax.f32 %v758_v34, 0.0  ;;  %v5651_v22 = vld [vmem:[#allocation3 + $0x16c] ss:$16 sps:$4 sm:$0xff]  }
 0x1be   :  { %9041 = vst [vmem:[#allocation109_spill] sm:$0xff] %v7335_v35  ;;  %9042 = vst [vmem:[#allocation110_spill] sm:$0xff] %v7347_v55  ;;  %v1174_v47 = vmax.f32 %v774_v27, 0.0  ;;  %v5654_v46 = vld [vmem:[#allocation3 + $0x36c] ss:$16 sps:$4 sm:$0xff]   ;;  %v768_v34 = vadd.f32 %v7087_v8, %v7059_v61  ;;  %v772_v27 = vadd.f32 %v7107_v14, %v7059_v61 }
 0x1bf   :  { %v7339_v45 = vpop.f32.mrf.mxu0  ;;  %3782 = vmatpush2.bf16.msra.mxu0 %v5631_v26  ;;  %v7345_v33 = vpop.f32.mrf.mxu1  ;;  %3975 = vmatpush2.bf16.msra.mxu1 %v5634_v49  ;;  %9043 = vst [vmem:[#allocation111_spill] sm:$0xff] %v7354_v5  ;;  %v770_v26 = vadd.f32 %v7103_v0, %v7011_v15  ;;  %v5652_v8 = vld [vmem:[#allocation3 + $0x368] ss:$16 sps:$4 sm:$0xff]   ;;  %v5657_v14 = vld [vmem:[#allocation3 + $0x14c] ss:$16 sps:$4 sm:$0xff]  }
 0x1c0   :  { %3783 = vmatprep.subr.bf16.mxu0 %v5639_v43  ;;  %3976 = vmatprep.subr.bf16.mxu1 %v5642_v6  ;;  %v5643_v43 = vld [vmem:[#allocation3 + $0x188] ss:$16 sps:$4 sm:$0xff]   ;;  %v1159_v6 = vmax.f32 %v955_v62, 0.0  ;;  %v1168_v62 = vmax.f32 %v963_v36, 0.0  ;;  %v977_v36 = vadd.f32 %v7169_v51, %v7019_v32 }
 0x1c1   :  { %v7351_v13 = vpop.f32.mrf.mxu0  ;;  %3460 = vmatmul.mubr.bf16.gmra.mxu0 %v7333_v11  ;;  %v7360_v28 = vpop.f32.mrf.mxu1  ;;  %3653 = vmatmul.mubr.bf16.gmra.mxu1 %v7335_v35  ;;  %v1176_v35 = vmax.f32 %v967_v58, 0.0  ;;  %v1151_v11 = vmax.f32 %v951_v17, 0.0  ;;  %v5649_v58 = vld [vmem:[#allocation3 + $0x168] ss:$16 sps:$4 sm:$0xff]   ;;  %v784_v17 = vadd.f32 %v7163_v57, %v7011_v15  ;;  %v5660_v57 = vld [vmem:[#allocation3 + $0x34c] ss:$16 sps:$4 sm:$0xff]  }
 0x1c2   :  { %9045 = vst [vmem:[#allocation56_spill] sm:$0xff] %v7360_v28  ;;  %3469 = vmatprep.mubr.bf16.mxu0 %v7347_v55  ;;  %3662 = vmatprep.mubr.bf16.mxu1 %v7354_v5  ;;  %v7373_v5 = vpack.c.bf16 %v1157_v38, %v1149_v10  ;;  %v1166_v28 = vmax.f32 %v770_v26, 0.0  ;;  %v9051_v51 = vld [vmem:[#allocation91_spill] sm:$0xff] }
 0x1c3   :  { %v7367_v49 = vpop.f32.mrf.mxu0  ;;  %3784 = vmatpush2.bf16.msra.mxu0 %v5637_v20  ;;  %v7369_v0 = vpop.f32.mrf.mxu1  ;;  %3977 = vmatpush2.bf16.msra.mxu1 %v5640_v18  ;;  %v965_v18 = vadd.f32 %v7109_v40, %v7063_v2  ;;  %v961_v40 = vadd.f32 %v7096_v59, %v7063_v2  ;;  %v1173_v59 = vmax.f32 %v772_v27, 0.0  ;;  %v1192_v27 = vmax.f32 %v977_v36, 0.0 }
 0x1c4   :  { %3785 = vmatprep.subr.bf16.mxu0 %v5645_v53  ;;  %3978 = vmatprep.subr.bf16.mxu1 %v5648_v9  ;;  %9046 = vst [vmem:[#allocation112_spill] sm:$0xff] %v7373_v5  ;;  %v7385_v9 = vpack.c.bf16 %v1159_v6, %v1151_v11  ;;  %v7391_v26 = vpack.c.bf16 %v1174_v47, %v1166_v28  ;;  %v5655_v47 = vld [vmem:[#allocation3 + $0x148] ss:$16 sps:$4 sm:$0xff]  }
 0x1c5   :  { %v7371_v55 = vpop.f32.mrf.mxu0  ;;  %v7375_v20 = vpop.f32.mrf.mxu1  ;;  %v7400_v11 = vpack.c.bf16 %v1176_v35, %v1168_v62  ;;  %v780_v28 = vadd.f32 %v7147_v12, %v7011_v15  ;;  %v1175_v10 = vmax.f32 %v965_v18, 0.0  ;;  %v973_v6 = vadd.f32 %v9051_v51, %v7019_v32  ;;  %v5658_v12 = vld [vmem:[#allocation3 + $0x348] ss:$16 sps:$4 sm:$0xff]   ;;  %v5663_v62 = vld [vmem:[#allocation3 + $0x12c] ss:$16 sps:$4 sm:$0xff]  }
 0x1c6   :  { %9047 = vst [vmem:[#allocation113_spill] sm:$0xff] %v7385_v9  ;;  %9048 = vst [vmem:[#allocation114_spill] sm:$0xff] %v7391_v26  ;;  %v5666_v51 = vld [vmem:[#allocation3 + $0x32c] ss:$16 sps:$4 sm:$0xff]   ;;  %v794_v36 = vadd.f32 %v7207_v44, %v7011_v15 }
 0x1c7   :  { %v7383_v53 = vpop.f32.mrf.mxu0  ;;  %3786 = vmatpush2.bf16.msra.mxu0 %v5643_v43  ;;  %v7389_v38 = vpop.f32.mrf.mxu1  ;;  %3979 = vmatpush2.bf16.msra.mxu1 %v5646_v1  ;;  %9049 = vst [vmem:[#allocation115_spill] sm:$0xff] %v7400_v11  ;;  %v5672_v44 = vld [vmem:[#allocation3 + $0x30c] ss:$16 sps:$4 sm:$0xff]  }
 0x1c8   :  { %3787 = vmatprep.subr.bf16.mxu0 %v5651_v22  ;;  %3980 = vmatprep.subr.bf16.mxu1 %v5654_v46  ;;  %v1190_v22 = vmax.f32 %v784_v17, 0.0  ;;  %v1184_v17 = vmax.f32 %v973_v6, 0.0 }
 0x1c9   :  { %v7397_v43 = vpop.f32.mrf.mxu0  ;;  %3470 = vmatmul.mubr.bf16.gmra.mxu0 %v7373_v5  ;;  %v7404_v1 = vpop.f32.mrf.mxu1  ;;  %3663 = vmatmul.mubr.bf16.gmra.mxu1 %v7385_v9  ;;  %v1165_v9 = vmax.f32 %v768_v34, 0.0  ;;  %v1182_v5 = vmax.f32 %v780_v28, 0.0  ;;  %v5661_v34 = vld [vmem:[#allocation3 + $0x128] ss:$16 sps:$4 sm:$0xff]   ;;  %v5669_v28 = vld [vmem:[#allocation3 + $0x10c] ss:$16 sps:$4 sm:$0xff]  }
 0x1ca   :  { %9050 = vst [vmem:[#allocation116_spill] sm:$0xff] %v7404_v1  ;;  %3479 = vmatprep.mubr.bf16.mxu0 %v7391_v26  ;;  %3672 = vmatprep.mubr.bf16.mxu1 %v7400_v11  ;;  %v1167_v26 = vmax.f32 %v961_v40, 0.0  ;;  %v975_v40 = vadd.f32 %v7155_v23, %v7063_v2  ;;  %v7442_v23 = vpack.c.bf16 %v1192_v27, %v1184_v17 }
 0x1cb   :  { %v7411_v35 = vpop.f32.mrf.mxu0  ;;  %3788 = vmatpush2.bf16.msra.mxu0 %v5649_v58  ;;  %v7413_v46 = vpop.f32.mrf.mxu1  ;;  %3981 = vmatpush2.bf16.msra.mxu1 %v5652_v8  ;;  %v7419_v1 = vpack.c.bf16 %v1173_v59, %v1165_v9  ;;  %v782_v8 = vadd.f32 %v7151_v52, %v7059_v61  ;;  %v7433_v9 = vpack.c.bf16 %v1190_v22, %v1182_v5  ;;  %v9055_v52 = vld [vmem:[#allocation88_spill] sm:$0xff]  ;;  %v9058_v5 = vld [vmem:[#allocation90_spill] sm:$0xff] }
 0x1cc   :  { %3789 = vmatprep.subr.bf16.mxu0 %v5657_v14  ;;  %3982 = vmatprep.subr.bf16.mxu1 %v5660_v57  ;;  %v7421_v58 = vpack.c.bf16 %v1175_v10, %v1167_v26  ;;  %v5664_v26 = vld [vmem:[#allocation3 + $0x328] ss:$16 sps:$4 sm:$0xff]   ;;  %v778_v59 = vadd.f32 %v9055_v52, %v7059_v61  ;;  %v987_v10 = vadd.f32 %v7213_v63, %v7019_v32  ;;  %v1689_v63 = vld [vmem:[%s8730_s4] sm:$0xf]  ;;  %v1191_v17 = vmax.f32 %v975_v40, 0.0 }
 0x1cd   :  { %v7415_v18 = vpop.f32.mrf.mxu0  ;;  %v7417_v11 = vpop.f32.mrf.mxu1  ;;  %9052 = vst [vmem:[#allocation91_spill] sm:$0xff] %v7419_v1  ;;  %9054 = vst [vmem:[#allocation118_spill] sm:$0xff] %v7433_v9  ;;  %v790_v22 = vadd.f32 %v7191_v54, %v7011_v15  ;;  %v983_v27 = vadd.f32 %v7193_v50, %v7019_v32  ;;  %v5667_v54 = vld [vmem:[#allocation3 + $0x108] ss:$16 sps:$4 sm:$0xff]   ;;  %v1206_v52 = vmax.f32 %v794_v36, 0.0  ;;  %v792_v40 = vadd.f32 %v7195_v16, %v7059_v61 }
 0x1ce   :  { %9053 = vst [vmem:[#allocation117_spill] sm:$0xff] %v7421_v58  ;;  %9057 = vst [vmem:[#allocation119_spill] sm:$0xff] %v7442_v23  ;;  %v804_v16 = vadd.f32 %v7251_v25, %v7011_v15  ;;  %v800_v25 = vadd.f32 %v7235_v39, %v7011_v15 }
 0x1cf   :  { %v7425_v14 = vpop.f32.mrf.mxu0  ;;  %3790 = vmatpush2.bf16.msra.mxu0 %v5655_v47  ;;  %v7431_v57 = vpop.f32.mrf.mxu1  ;;  %3983 = vmatpush2.bf16.msra.mxu1 %v5658_v12  ;;  %v971_v47 = vadd.f32 %v9058_v5, %v7063_v2 }
 0x1d0   :  { %3791 = vmatprep.subr.bf16.mxu0 %v5663_v62  ;;  %3984 = vmatprep.subr.bf16.mxu1 %v5666_v51  ;;  %v1189_v62 = vmax.f32 %v782_v8, 0.0 }
 0x1d1   :  { %v7439_v6 = vpop.f32.mrf.mxu0  ;;  %3480 = vmatmul.mubr.bf16.gmra.mxu0 %v7419_v1  ;;  %v7448_v12 = vpop.f32.mrf.mxu1  ;;  %3673 = vmatmul.mubr.bf16.gmra.mxu1 %v7421_v58  ;;  %v5675_v58 = vld [vmem:[#allocation3 + $0x4ec] ss:$16 sps:$4 sm:$0xff]   ;;  %v1181_v1 = vmax.f32 %v778_v59, 0.0  ;;  %v788_v59 = vadd.f32 %v7175_v24, %v7059_v61  ;;  %v9067_v24 = vld [vmem:[#allocation96_spill] sm:$0xff] }
 0x1d2   :  { %9056 = vst [vmem:[#allocation88_spill] sm:$0xff] %v7439_v6  ;;  %9059 = vst [vmem:[#allocation90_spill] sm:$0xff] %v7448_v12  ;;  %3489 = vmatprep.mubr.bf16.mxu0 %v7433_v9  ;;  %3682 = vmatprep.mubr.bf16.mxu1 %v7442_v23  ;;  %v5670_v9 = vld [vmem:[#allocation3 + $0x308] ss:$16 sps:$4 sm:$0xff]   ;;  %v1208_v12 = vmax.f32 %v987_v10, 0.0  ;;  %v9062_v6 = vld [vmem:[#allocation10_spill] sm:$0xff] }
 0x1d3   :  { %v7458_v51 = vpop.f32.mrf.mxu0  ;;  %3792 = vmatpush2.bf16.msra.mxu0 %v5661_v34  ;;  %v7460_v5 = vpop.f32.mrf.mxu1  ;;  %3985 = vmatpush2.bf16.msra.mxu1 %v5664_v26  ;;  %v7465_v50 = vrot.slane %v1689_v63, %v9062_v6  ;;  %v5678_v23 = vld [vmem:[#allocation3 + $0x6ec] ss:$16 sps:$4 sm:$0xff]   ;;  %v1198_v34 = vmax.f32 %v790_v22, 0.0  ;;  %v1200_v10 = vmax.f32 %v983_v27, 0.0 }
 0x1d4   :  { %9060 = vst [vmem:[#allocation120_spill] sm:$0xff] %v7458_v51  ;;  %9061 = vst [vmem:[#allocation121_spill] sm:$0xff] %v7460_v5  ;;  %3793 = vmatprep.subr.bf16.mxu0 %v5669_v28  ;;  %3986 = vmatprep.subr.bf16.mxu1 %v5672_v44  ;;  %v1183_v51 = vmax.f32 %v971_v47, 0.0  ;;  %v9063_v26 = vld [vmem:[#allocation7_spill] sm:$0xff]  ;;  %v7474_v5 = vpack.c.bf16 %v1189_v62, %v1181_v1  ;;  %v985_v44 = vadd.f32 %v7199_v48, %v7063_v2 }
 0x1d5   :  { %v7462_v8 = vpop.f32.mrf.mxu0  ;;  %v7469_v36 = vpop.f32.mrf.mxu1  ;;  %v7472_v28 = vrot.slane %v1689_v63, %v9063_v26  ;;  %v7488_v63 = vpack.c.bf16 %v1206_v52, %v1198_v34  ;;  %v981_v1 = vadd.f32 %v9067_v24, %v7063_v2  ;;  %v997_v48 = vadd.f32 %v7257_v31, %v7019_v32 }
 0x1d6   :  { %9064 = vst [vmem:[#allocation7_spill] sm:$0xff] %v7474_v5  ;;  %v7482_v47 = vpack.c.bf16 %v1191_v17, %v1183_v51  ;;  %v7495_v27 = vpack.c.bf16 %v1208_v12, %v1200_v10  ;;  %v1205_v51 = vmax.f32 %v792_v40, 0.0  ;;  %v993_v31 = vadd.f32 %v7237_v21, %v7019_v32 }
 0x1d7   :  { %v7480_v6 = vpop.f32.mrf.mxu0  ;;  %3794 = vmatpush2.bf16.msra.mxu0 %v5667_v54  ;;  %v7486_v22 = vpop.f32.mrf.mxu1  ;;  %9066 = vst [vmem:[#allocation123_spill] sm:$0xff] %v7488_v63  ;;  %3987 = vmatpush2.bf16.msra.mxu1 %v5670_v9  ;;  %v1197_v17 = vmax.f32 %v788_v59, 0.0  ;;  %v1199_v40 = vmax.f32 %v981_v1, 0.0  ;;  %v802_v10 = vadd.f32 %v7239_v19, %v7059_v61  ;;  %v1224_v24 = vmax.f32 %v997_v48, 0.0 }
 0x1d8   :  { %9065 = vst [vmem:[#allocation122_spill] sm:$0xff] %v7482_v47  ;;  %4149 = vmatprep.subr.bf16.mxu0 %v5675_v58  ;;  %9068 = vst [vmem:[#allocation96_spill] sm:$0xff] %v7495_v27  ;;  %4342 = vmatprep.subr.bf16.mxu1 %v5678_v23  ;;  %v1207_v58 = vmax.f32 %v985_v44, 0.0  ;;  %v1222_v23 = vmax.f32 %v804_v16, 0.0  ;;  %v995_v1 = vadd.f32 %v7243_v37, %v7063_v2 }
 0x1d9   :  { %v3025_v62 = vpop.f32.mrf.mxu0  ;;  %3490 = vmatmul.mubr.bf16.gmra.mxu0 %v7474_v5  ;;  %v3218_v9 = vpop.f32.mrf.mxu1  ;;  %3683 = vmatmul.mubr.bf16.gmra.mxu1 %v7482_v47  ;;  %v7510_v44 = vpack.c.bf16 %v1205_v51, %v1197_v17  ;;  %v814_v48 = vadd.f32 %v7295_v4, %v7011_v15  ;;  %v810_v4 = vadd.f32 %v7279_v41, %v7011_v15  ;;  %v9125_v5 = vld [vmem:[#allocation38_spill] sm:$0xff] }
 0x1da   :  { %v3026_v54 = vadd.f32 %v3025_v62, %v7465_v50  ;;  %3499 = vmatprep.mubr.bf16.mxu0 %v7488_v63  ;;  %3692 = vmatprep.mubr.bf16.mxu1 %v7495_v27  ;;  %v1214_v63 = vmax.f32 %v800_v25, 0.0  ;;  %v7515_v16 = vpack.c.bf16 %v1207_v58, %v1199_v40  ;;  %v9073_v58 = vld [vmem:[#allocation100_spill] sm:$0xff]  ;;  %v1221_v40 = vmax.f32 %v802_v10, 0.0 }
 0x1db   :  { %v3027_v12 = vpop.f32.mrf.mxu0  ;;  %v3220_v34 = vpop.f32.mrf.mxu1  ;;  %9069 = vst [vmem:[#allocation124_spill] sm:$0xff] %v7510_v44 }
 0x1dc   :  { %v7505_v52 = vadd.f32 %v3218_v9, %v3026_v54  ;;  %v3028_v39 = vadd.f32 %v3027_v12, %v7472_v28  ;;  %9070 = vst [vmem:[#allocation125_spill] sm:$0xff] %v7515_v16  ;;  %v9071_v54 = vld [vmem:[#allocation8_spill] sm:$0xff]  ;;  %v1216_v12 = vmax.f32 %v993_v31, 0.0  ;;  %v1007_v31 = vadd.f32 %v7301_v56, %v7019_v32 }
 0x1dd   :  { %v3029_v62 = vpop.f32.mrf.mxu0  ;;  %v3222_v59 = vpop.f32.mrf.mxu1  ;;  %v798_v9 = vadd.f32 %v9071_v54, %v7059_v61  ;;  %v9075_v56 = vld [vmem:[#allocation104_spill] sm:$0xff] }
 0x1de   :  { %v7512_v21 = vadd.f32 %v3220_v34, %v3028_v39  ;;  %v3030_v27 = vadd.f32 %v3029_v62, %v7465_v50  ;;  %v7526_v39 = vpack.c.bf16 %v1222_v23, %v1214_v63  ;;  %v991_v34 = vadd.f32 %v9073_v58, %v7063_v2 }
 0x1df   :  { %v3031_v19 = vpop.f32.mrf.mxu0  ;;  %v3224_v17 = vpop.f32.mrf.mxu1  ;;  %v7533_v37 = vpack.c.bf16 %v1224_v24, %v1216_v12  ;;  %v1213_v10 = vmax.f32 %v798_v9, 0.0  ;;  %v1003_v54 = vadd.f32 %v9075_v56, %v7019_v32  ;;  %v1238_v12 = vmax.f32 %v814_v48, 0.0 }
 0x1e0   :  { %v7523_v51 = vadd.f32 %v3222_v59, %v3030_v27  ;;  %v3032_v25 = vadd.f32 %v3031_v19, %v7472_v28  ;;  %9072 = vst [vmem:[#allocation8_spill] sm:$0xff] %v7526_v39  ;;  %v1223_v59 = vmax.f32 %v995_v1, 0.0  ;;  %v812_v9 = vadd.f32 %v7283_v29, %v7059_v61 }
 0x1e1   :  { %v3035_v62 = vpop.f32.mrf.mxu0  ;;  %3500 = vmatmul.mubr.bf16.gmra.mxu0 %v7510_v44  ;;  %9074 = vst [vmem:[#allocation100_spill] sm:$0xff] %v7533_v37  ;;  %v3228_v23 = vpop.f32.mrf.mxu1  ;;  %3693 = vmatmul.mubr.bf16.gmra.mxu1 %v7515_v16  ;;  %v7548_v58 = vpack.c.bf16 %v1221_v40, %v1213_v10 }
 0x1e2   :  { %v7537_v27 = vadd.f32 %v3224_v17, %v3032_v25  ;;  %v3036_v63 = vadd.f32 %v3035_v62, %v7465_v50  ;;  %3509 = vmatprep.mubr.bf16.mxu0 %v7526_v39  ;;  %3702 = vmatprep.mubr.bf16.mxu1 %v7533_v37  ;;  %v1215_v17 = vmax.f32 %v991_v34, 0.0  ;;  %v1240_v62 = vmax.f32 %v1007_v31, 0.0  ;;  %v9079_v34 = vld [vmem:[#allocation106_spill] sm:$0xff] }
 0x1e3   :  { %v3037_v24 = vpop.f32.mrf.mxu0  ;;  %v3230_v25 = vpop.f32.mrf.mxu1  ;;  %9076 = vst [vmem:[#allocation104_spill] sm:$0xff] %v7548_v58  ;;  %v1230_v39 = vmax.f32 %v810_v4, 0.0  ;;  %v1005_v40 = vadd.f32 %v9079_v34, %v7063_v2  ;;  %v824_v4 = vadd.f32 %v7339_v45, %v7011_v15  ;;  %v1237_v34 = vmax.f32 %v812_v9, 0.0 }
 0x1e4   :  { %v7545_v19 = vadd.f32 %v3228_v23, %v3036_v63  ;;  %v3038_v41 = vadd.f32 %v3037_v24, %v7472_v28  ;;  %v7555_v48 = vpack.c.bf16 %v1223_v59, %v1215_v17  ;;  %v9078_v63 = vld [vmem:[#allocation28_spill] sm:$0xff]  ;;  %v1232_v24 = vmax.f32 %v1003_v54, 0.0  ;;  %v9081_v59 = vld [vmem:[#allocation49_spill] sm:$0xff] }
 0x1e5   :  { %v3039_v16 = vpop.f32.mrf.mxu0  ;;  %v3232_v37 = vpop.f32.mrf.mxu1  ;;  %v808_v23 = vadd.f32 %v9078_v63, %v7059_v61  ;;  %v1017_v54 = vadd.f32 %v7345_v33, %v7019_v32  ;;  %v820_v45 = vadd.f32 %v7323_v42, %v7011_v15  ;;  %v1013_v33 = vadd.f32 %v7325_v7, %v7019_v32 }
 0x1e6   :  { %v7552_v1 = vadd.f32 %v3230_v25, %v3038_v41  ;;  %v3040_v56 = vadd.f32 %v3039_v16, %v7465_v50  ;;  %9077 = vst [vmem:[#allocation126_spill] sm:$0xff] %v7555_v48  ;;  %v7566_v16 = vpack.c.bf16 %v1238_v12, %v1230_v39  ;;  %v1001_v25 = vadd.f32 %v9081_v59, %v7063_v2 }
 0x1e7   :  { %v3041_v31 = vpop.f32.mrf.mxu0  ;;  %v3234_v41 = vpop.f32.mrf.mxu1  ;;  %v7573_v63 = vpack.c.bf16 %v1240_v62, %v1232_v24  ;;  %v1229_v9 = vmax.f32 %v808_v23, 0.0  ;;  %v1254_v24 = vmax.f32 %v824_v4, 0.0  ;;  %v822_v59 = vadd.f32 %v7327_v3, %v7059_v61 }
 0x1e8   :  { %v7563_v10 = vadd.f32 %v3232_v37, %v3040_v56  ;;  %v3042_v29 = vadd.f32 %v3041_v31, %v7472_v28  ;;  %9080 = vst [vmem:[#allocation28_spill] sm:$0xff] %v7566_v16  ;;  %v1239_v56 = vmax.f32 %v1005_v40, 0.0 }
 0x1e9   :  { %v3045_v17 = vpop.f32.mrf.mxu0  ;;  %3510 = vmatmul.mubr.bf16.gmra.mxu0 %v7548_v58  ;;  %9082 = vst [vmem:[#allocation106_spill] sm:$0xff] %v7573_v63  ;;  %v3238_v12 = vpop.f32.mrf.mxu1  ;;  %3703 = vmatmul.mubr.bf16.gmra.mxu1 %v7555_v48  ;;  %v7590_v40 = vpack.c.bf16 %v1237_v34, %v1229_v9  ;;  %v1246_v48 = vmax.f32 %v820_v45, 0.0  ;;  %v5714_v58 = vld [vmem:[#allocation3 + $0x62c] ss:$16 sps:$4 sm:$0xff]  }
 0x1ea   :  { %v7577_v37 = vadd.f32 %v3234_v41, %v3042_v29  ;;  %v3046_v39 = vadd.f32 %v3045_v17, %v7465_v50  ;;  %3519 = vmatprep.mubr.bf16.mxu0 %v7566_v16  ;;  %3712 = vmatprep.mubr.bf16.mxu1 %v7573_v63  ;;  %v1231_v41 = vmax.f32 %v1001_v25, 0.0  ;;  %v1256_v17 = vmax.f32 %v1017_v54, 0.0 }
 0x1eb   :  { %v3047_v62 = vpop.f32.mrf.mxu0  ;;  %v3240_v29 = vpop.f32.mrf.mxu1  ;;  %9083 = vst [vmem:[#allocation49_spill] sm:$0xff] %v7590_v40  ;;  %v1015_v25 = vadd.f32 %v7331_v30, %v7063_v2  ;;  %v834_v54 = vadd.f32 %v7383_v53, %v7011_v15  ;;  %v830_v53 = vadd.f32 %v7367_v49, %v7011_v15 }
 0x1ec   :  { %v7585_v31 = vadd.f32 %v3238_v12, %v3046_v39  ;;  %v3048_v42 = vadd.f32 %v3047_v62, %v7472_v28  ;;  %v7595_v4 = vpack.c.bf16 %v1239_v56, %v1231_v41  ;;  %v818_v39 = vadd.f32 %v7309_v60, %v7059_v61  ;;  %v9086_v56 = vld [vmem:[#allocation107_spill] sm:$0xff] }
 0x1ed   :  { %v3049_v16 = vpop.f32.mrf.mxu0  ;;  %v3242_v23 = vpop.f32.mrf.mxu1  ;;  %v1248_v12 = vmax.f32 %v1013_v33, 0.0  ;;  %v1011_v9 = vadd.f32 %v9086_v56, %v7063_v2  ;;  %v1027_v60 = vadd.f32 %v7389_v38, %v7019_v32  ;;  %v1255_v41 = vmax.f32 %v1015_v25, 0.0 }
 0x1ee   :  { %v7592_v7 = vadd.f32 %v3240_v29, %v3048_v42  ;;  %v3050_v63 = vadd.f32 %v3049_v16, %v7465_v50  ;;  %9084 = vst [vmem:[#allocation127_spill] sm:$0xff] %v7595_v4  ;;  %v7606_v16 = vpack.c.bf16 %v1254_v24, %v1246_v48  ;;  %v1253_v42 = vmax.f32 %v822_v59, 0.0 }
 0x1ef   :  { %v3051_v3 = vpop.f32.mrf.mxu0  ;;  %v3244_v62 = vpop.f32.mrf.mxu1  ;;  %v7613_v30 = vpack.c.bf16 %v1256_v17, %v1248_v12  ;;  %v1245_v29 = vmax.f32 %v818_v39, 0.0  ;;  %v1023_v38 = vadd.f32 %v7369_v0, %v7019_v32  ;;  %v1270_v17 = vmax.f32 %v834_v54, 0.0 }
 0x1f0   :  { %v7603_v34 = vadd.f32 %v3242_v23, %v3050_v63  ;;  %v3052_v45 = vadd.f32 %v3051_v3, %v7472_v28  ;;  %9085 = vst [vmem:[#allocation128_spill] sm:$0xff] %v7606_v16  ;;  %v1247_v3 = vmax.f32 %v1011_v9, 0.0  ;;  %v832_v39 = vadd.f32 %v7371_v55, %v7059_v61 }
 0x1f1   :  { %v3055_v33 = vpop.f32.mrf.mxu0  ;;  %3520 = vmatmul.mubr.bf16.gmra.mxu0 %v7590_v40  ;;  %9087 = vst [vmem:[#allocation107_spill] sm:$0xff] %v7613_v30  ;;  %v3248_v24 = vpop.f32.mrf.mxu1  ;;  %3713 = vmatmul.mubr.bf16.gmra.mxu1 %v7595_v4  ;;  %v1025_v9 = vadd.f32 %v7375_v20, %v7063_v2  ;;  %v9119_v40 = vld [vmem:[#allocation34_spill] sm:$0xff] }
 0x1f2   :  { %v7617_v63 = vadd.f32 %v3244_v62, %v3052_v45  ;;  %v3056_v48 = vadd.f32 %v3055_v33, %v7465_v50  ;;  %3529 = vmatprep.mubr.bf16.mxu0 %v7606_v16  ;;  %3722 = vmatprep.mubr.bf16.mxu1 %v7613_v30  ;;  %v7628_v45 = vpack.c.bf16 %v1253_v42, %v1245_v29  ;;  %v1272_v62 = vmax.f32 %v1027_v60, 0.0 }
 0x1f3   :  { %v3057_v59 = vpop.f32.mrf.mxu0  ;;  %v3250_v12 = vpop.f32.mrf.mxu1  ;;  %v1262_v33 = vmax.f32 %v830_v53, 0.0  ;;  %v7635_v54 = vpack.c.bf16 %v1255_v41, %v1247_v3  ;;  %v844_v60 = vadd.f32 %v7425_v14, %v7011_v15  ;;  %v9091_v41 = vld [vmem:[#allocation56_spill] sm:$0xff]  ;;  %v840_v14 = vadd.f32 %v7411_v35, %v7011_v15 }
 0x1f4   :  { %v7625_v23 = vadd.f32 %v3248_v24, %v3056_v48  ;;  %v3058_v49 = vadd.f32 %v3057_v59, %v7472_v28  ;;  %9088 = vst [vmem:[#allocation129_spill] sm:$0xff] %v7628_v45  ;;  %v828_v48 = vadd.f32 %v7351_v13, %v7059_v61  ;;  %v1264_v24 = vmax.f32 %v1023_v38, 0.0 }
 0x1f5   :  { %v3059_v56 = vpop.f32.mrf.mxu0  ;;  %v3252_v30 = vpop.f32.mrf.mxu1  ;;  %9089 = vst [vmem:[#allocation130_spill] sm:$0xff] %v7635_v54  ;;  %v7646_v59 = vpack.c.bf16 %v1270_v17, %v1262_v33  ;;  %v1037_v13 = vadd.f32 %v7431_v57, %v7019_v32  ;;  %v1033_v57 = vadd.f32 %v7413_v46, %v7019_v32 }
 0x1f6   :  { %v7632_v25 = vadd.f32 %v3250_v12, %v3058_v49  ;;  %v3060_v0 = vadd.f32 %v3059_v56, %v7465_v50  ;;  %v1021_v49 = vadd.f32 %v9091_v41, %v7063_v2  ;;  %v7653_v20 = vpack.c.bf16 %v1272_v62, %v1264_v24 }
 0x1f7   :  { %v3061_v42 = vpop.f32.mrf.mxu0  ;;  %v3254_v29 = vpop.f32.mrf.mxu1  ;;  %9090 = vst [vmem:[#allocation131_spill] sm:$0xff] %v7646_v59  ;;  %v1269_v12 = vmax.f32 %v832_v39, 0.0  ;;  %v1271_v56 = vmax.f32 %v1025_v9, 0.0  ;;  %v1261_v33 = vmax.f32 %v828_v48, 0.0  ;;  %v1286_v39 = vmax.f32 %v844_v60, 0.0 }
 0x1f8   :  { %v7643_v53 = vadd.f32 %v3252_v30, %v3060_v0  ;;  %v3062_v55 = vadd.f32 %v3061_v42, %v7472_v28  ;;  %9092 = vst [vmem:[#allocation56_spill] sm:$0xff] %v7653_v20  ;;  %v1263_v42 = vmax.f32 %v1021_v49, 0.0  ;;  %v1280_v48 = vmax.f32 %v1033_v57, 0.0  ;;  %v9096_v57 = vld [vmem:[#allocation116_spill] sm:$0xff] }
 0x1f9   :  { %v3065_v38 = vpop.f32.mrf.mxu0  ;;  %3530 = vmatmul.mubr.bf16.gmra.mxu0 %v7628_v45  ;;  %v3258_v3 = vpop.f32.mrf.mxu1  ;;  %3723 = vmatmul.mubr.bf16.gmra.mxu1 %v7635_v54  ;;  %v7668_v41 = vpack.c.bf16 %v1269_v12, %v1261_v33  ;;  %v842_v60 = vadd.f32 %v7415_v18, %v7059_v61  ;;  %v1031_v18 = vadd.f32 %v9096_v57, %v7063_v2  ;;  %v9115_v54 = vld [vmem:[#allocation30_spill] sm:$0xff]  ;;  %v5702_v45 = vld [vmem:[#allocation3 + $0x66c] ss:$16 sps:$4 sm:$0xff]  }
 0x1fa   :  { %v7657_v30 = vadd.f32 %v3254_v29, %v3062_v55  ;;  %v3066_v17 = vadd.f32 %v3065_v38, %v7465_v50  ;;  %3539 = vmatprep.mubr.bf16.mxu0 %v7646_v59  ;;  %3732 = vmatprep.mubr.bf16.mxu1 %v7653_v20  ;;  %v1288_v55 = vmax.f32 %v1037_v13, 0.0  ;;  %v1278_v38 = vmax.f32 %v840_v14, 0.0 }
 0x1fb   :  { %v3067_v62 = vpop.f32.mrf.mxu0  ;;  %v3260_v24 = vpop.f32.mrf.mxu1  ;;  %9093 = vst [vmem:[#allocation132_spill] sm:$0xff] %v7668_v41  ;;  %v7673_v20 = vpack.c.bf16 %v1271_v56, %v1263_v42  ;;  %v854_v13 = vadd.f32 %v7480_v6, %v7011_v15  ;;  %v838_v56 = vadd.f32 %v7397_v43, %v7059_v61  ;;  %v1285_v43 = vmax.f32 %v842_v60, 0.0 }
 0x1fc   :  { %v7665_v0 = vadd.f32 %v3258_v3, %v3066_v17  ;;  %v3068_v35 = vadd.f32 %v3067_v62, %v7472_v28  ;;  %v1035_v17 = vadd.f32 %v7417_v11, %v7063_v2  ;;  %v7684_v62 = vpack.c.bf16 %v1286_v39, %v1278_v38 }
 0x1fd   :  { %v3069_v29 = vpop.f32.mrf.mxu0  ;;  %v3262_v59 = vpop.f32.mrf.mxu1  ;;  %9094 = vst [vmem:[#allocation133_spill] sm:$0xff] %v7673_v20  ;;  %v1047_v11 = vadd.f32 %v7486_v22, %v7019_v32  ;;  %v7693_v6 = vpack.c.bf16 %v1288_v55, %v1280_v48  ;;  %v9099_v22 = vld [vmem:[#allocation121_spill] sm:$0xff] }
 0x1fe   :  { %v7670_v9 = vadd.f32 %v3260_v24, %v3068_v35  ;;  %v3070_v46 = vadd.f32 %v3069_v29, %v7465_v50  ;;  %9095 = vst [vmem:[#allocation134_spill] sm:$0xff] %v7684_v62  ;;  %v1287_v29 = vmax.f32 %v1035_v17, 0.0  ;;  %v1043_v38 = vadd.f32 %v9099_v22, %v7019_v32 }
 0x1ff   :  { %v3071_v49 = vpop.f32.mrf.mxu0  ;;  %v3264_v3 = vpop.f32.mrf.mxu1  ;;  %9097 = vst [vmem:[#allocation116_spill] sm:$0xff] %v7693_v6  ;;  %v1304_v57 = vmax.f32 %v1047_v11, 0.0 }
 0x200   :  { %v7681_v12 = vadd.f32 %v3262_v59, %v3070_v46  ;;  %v3072_v14 = vadd.f32 %v3071_v49, %v7472_v28  ;;  %v9098_v59 = vld [vmem:[#allocation120_spill] sm:$0xff]  ;;  %v1302_v46 = vmax.f32 %v854_v13, 0.0  ;;  %v1296_v13 = vmax.f32 %v1043_v38, 0.0 }
 0x201   :  { %v3075_v33 = vpop.f32.mrf.mxu0  ;;  %3540 = vmatmul.mubr.bf16.gmra.mxu0 %v7668_v41  ;;  %v850_v35 = vadd.f32 %v9098_v59, %v7011_v15  ;;  %v3268_v42 = vpop.f32.mrf.mxu1  ;;  %3733 = vmatmul.mubr.bf16.gmra.mxu1 %v7673_v20  ;;  %v5685_v20 = vld [vmem:[#allocation3 + $0x4a8] ss:$16 sps:$4 sm:$0xff]  }
 0x202   :  { %v7697_v24 = vadd.f32 %v3264_v3, %v3072_v14  ;;  %v3076_v39 = vadd.f32 %v3075_v33, %v7465_v50  ;;  %3549 = vmatprep.mubr.bf16.mxu0 %v7684_v62  ;;  %3742 = vmatprep.mubr.bf16.mxu1 %v7693_v6  ;;  %v1277_v14 = vmax.f32 %v838_v56, 0.0  ;;  %v1279_v3 = vmax.f32 %v1031_v18, 0.0  ;;  %v5690_v6 = vld [vmem:[#allocation3 + $0x6ac] ss:$16 sps:$4 sm:$0xff]  }
 0x203   :  { %v3077_v55 = vpop.f32.mrf.mxu0  ;;  %v3270_v49 = vpop.f32.mrf.mxu1  ;;  %v1294_v59 = vmax.f32 %v850_v35, 0.0  ;;  %v1045_v56 = vadd.f32 %v7469_v36, %v7063_v2  ;;  %v7727_v38 = vpack.c.bf16 %v1304_v57, %v1296_v13 }
 0x204   :  { %v7705_v48 = vadd.f32 %v3268_v42, %v3076_v39  ;;  %v3078_v15 = vadd.f32 %v3077_v55, %v7472_v28  ;;  %v7711_v32 = vpack.c.bf16 %v1285_v43, %v1277_v14  ;;  %v7713_v22 = vpack.c.bf16 %v1287_v29, %v1279_v3  ;;  %v9103_v43 = vld [vmem:[#allocation88_spill] sm:$0xff] }
 0x205   :  { %v3079_v33 = vpop.f32.mrf.mxu0  ;;  %v3272_v17 = vpop.f32.mrf.mxu1  ;;  %v852_v39 = vadd.f32 %v7462_v8, %v7059_v61  ;;  %v7722_v55 = vpack.c.bf16 %v1302_v46, %v1294_v59  ;;  %9104 = vst [vmem:[#allocation88_spill] sm:$0xff] %v7727_v38  ;;  %v9105_v8 = vld [vmem:[#allocation90_spill] sm:$0xff] }
 0x206   :  { %v7708_v62 = vadd.f32 %v3270_v49, %v3078_v15  ;;  %v3080_v60 = vadd.f32 %v3079_v33, %v7465_v50  ;;  %9100 = vst [vmem:[#allocation120_spill] sm:$0xff] %v7711_v32  ;;  %9101 = vst [vmem:[#allocation121_spill] sm:$0xff] %v7713_v22  ;;  %v848_v15 = vadd.f32 %v9103_v43, %v7059_v61  ;;  %v1303_v33 = vmax.f32 %v1045_v56, 0.0 }
 0x207   :  { %v3081_v42 = vpop.f32.mrf.mxu0  ;;  %v3274_v35 = vpop.f32.mrf.mxu1  ;;  %9102 = vst [vmem:[#allocation135_spill] sm:$0xff] %v7722_v55  ;;  %v1041_v49 = vadd.f32 %v9105_v8, %v7063_v2  ;;  %v1301_v46 = vmax.f32 %v852_v39, 0.0 }
 0x208   :  { %v7719_v18 = vadd.f32 %v3272_v17, %v3080_v60  ;;  %v3082_v11 = vadd.f32 %v3081_v42, %v7472_v28  ;;  %v1293_v2 = vmax.f32 %v848_v15, 0.0 }
 0x209   :  { %v3085_v29 = vpop.f32.mrf.mxu0  ;;  %3550 = vmatmul.mubr.bf16.gmra.mxu0 %v7711_v32  ;;  %v3278_v3 = vpop.f32.mrf.mxu1  ;;  %3743 = vmatmul.mubr.bf16.gmra.mxu1 %v7713_v22  ;;  %v1295_v13 = vmax.f32 %v1041_v49, 0.0 }
 0x20a   :  { %v7731_v14 = vadd.f32 %v3274_v35, %v3082_v11  ;;  %v3086_v36 = vadd.f32 %v3085_v29, %v7465_v50  ;;  %3559 = vmatprep.mubr.bf16.mxu0 %v7722_v55  ;;  %3752 = vmatprep.mubr.bf16.mxu1 %v7727_v38  ;;  %v7743_v43 = vpack.c.bf16 %v1301_v46, %v1293_v2  ;;  %v9108_v46 = vld [vmem:[#allocation16_spill] sm:$0xff] }
 0x20b   :  { %v3087_v61 = vpop.f32.mrf.mxu0  ;;  %v3280_v60 = vpop.f32.mrf.mxu1  ;;  %v7745_v29 = vpack.c.bf16 %v1303_v33, %v1295_v13  ;;  %v9112_v55 = vld [vmem:[#allocation24_spill] sm:$0xff] }
 0x20c   :  { %v7737_v59 = vadd.f32 %v3278_v3, %v3086_v36  ;;  %v3088_v57 = vadd.f32 %v3087_v61, %v7472_v28  ;;  %9106 = vst [vmem:[#allocation90_spill] sm:$0xff] %v7743_v43 }
 0x20d   :  { %v3089_v17 = vpop.f32.mrf.mxu0  ;;  %v3282_v35 = vpop.f32.mrf.mxu1  ;;  %9107 = vst [vmem:[#allocation136_spill] sm:$0xff] %v7745_v29 }
 0x20e   :  { %v7740_v42 = vadd.f32 %v3280_v60, %v3088_v57  ;;  %v3090_v11 = vadd.f32 %v3089_v17, %v7465_v50  ;;  %v9109_v57 = vld [vmem:[#allocation18_spill] sm:$0xff] }
 0x20f   :  { %v3091_v39 = vpop.f32.mrf.mxu0  ;;  %v3284_v36 = vpop.f32.mrf.mxu1 }
 0x210   :  { %v7747_v8 = vadd.f32 %v3282_v35, %v3090_v11  ;;  %v3092_v56 = vadd.f32 %v3091_v39, %v7472_v28 }
 0x211   :  { %v3095_v3 = vpop.f32.mrf.mxu0  ;;  %3560 = vmatmul.mubr.bf16.gmra.mxu0 %v7743_v43  ;;  %v3288_v61 = vpop.f32.mrf.mxu1  ;;  %3753 = vmatmul.mubr.bf16.gmra.mxu1 %v7745_v29  ;;  %v5681_v43 = vld [vmem:[#allocation3 + $0x4cc] ss:$16 sps:$4 sm:$0xff]  }
 0x212   :  { %v7751_v15 = vadd.f32 %v3284_v36, %v3092_v56  ;;  %v3096_v49 = vadd.f32 %v3095_v3, %v7465_v50  ;;  %3795 = vmatprep.mubr.bf16.mxu0 %v9108_v46  ;;  %3988 = vmatprep.mubr.bf16.mxu1 %v9109_v57  ;;  %v5673_v36 = vld [vmem:[#allocation3 + $0x4e8] ss:$16 sps:$4 sm:$0xff]  }
 0x213   :  { %v3097_v33 = vpop.f32.mrf.mxu0  ;;  %v3290_v17 = vpop.f32.mrf.mxu1  ;;  %v5676_v57 = vld [vmem:[#allocation3 + $0x6e8] ss:$16 sps:$4 sm:$0xff]  }
 0x214   :  { %v7757_v60 = vadd.f32 %v3288_v61, %v3096_v49  ;;  %v3098_v2 = vadd.f32 %v3097_v33, %v7472_v28  ;;  %v9110_v61 = vld [vmem:[#allocation22_spill] sm:$0xff]  ;;  %v5684_v33 = vld [vmem:[#allocation3 + $0x6cc] ss:$16 sps:$4 sm:$0xff]  }
 0x215   :  { %v3099_v13 = vpop.f32.mrf.mxu0  ;;  %v3292_v39 = vpop.f32.mrf.mxu1 }
 0x216   :  { %v7760_v11 = vadd.f32 %v3290_v17, %v3098_v2  ;;  %v3100_v35 = vadd.f32 %v3099_v13, %v7465_v50  ;;  %v9111_v13 = vld [vmem:[#allocation23_spill] sm:$0xff] }
 0x217   :  { %v3101_v56 = vpop.f32.mrf.mxu0  ;;  %v3294_v29 = vpop.f32.mrf.mxu1 }
 0x218   :  { %v7763_v3 = vadd.f32 %v3292_v39, %v3100_v35  ;;  %v3102_v46 = vadd.f32 %v3101_v56, %v7472_v28  ;;  %v9113_v35 = vld [vmem:[#allocation26_spill] sm:$0xff]  ;;  %v5679_v56 = vld [vmem:[#allocation3 + $0x4c8] ss:$16 sps:$4 sm:$0xff]  }
 0x219   :  { %v3105_v49 = vpop.f32.mrf.mxu0  ;;  %3796 = vmatmul.mubr.bf16.vlgmr.msra.gmra.mxu0 %v9110_v61  ;;  %v3298_v17 = vpop.f32.mrf.mxu1  ;;  %3989 = vmatmul.mubr.bf16.vlgmr.msra.gmra.mxu1 %v9111_v13 }
 0x21a   :  { %v7767_v38 = vadd.f32 %v3294_v29, %v3102_v46  ;;  %v3106_v2 = vadd.f32 %v3105_v49, %v7465_v50  ;;  %3805 = vmatprep.mubr.bf16.mxu0 %v9112_v55  ;;  %3998 = vmatprep.mubr.bf16.mxu1 %v9113_v35  ;;  %v5682_v29 = vld [vmem:[#allocation3 + $0x6c8] ss:$16 sps:$4 sm:$0xff]   ;;  %v5687_v46 = vld [vmem:[#allocation3 + $0x4ac] ss:$16 sps:$4 sm:$0xff]  }
 0x21b   :  { %4150 = vmatpush1.bf16.msra.mxu0 %v5673_v36  ;;  %v3107_v39 = vpop.f32.mrf.mxu0  ;;  %v3300_v61 = vpop.f32.mrf.mxu1  ;;  %4343 = vmatpush1.bf16.msra.mxu1 %v5676_v57  ;;  %v5693_v57 = vld [vmem:[#allocation3 + $0x48c] ss:$16 sps:$4 sm:$0xff]  }
 0x21c   :  { %v7773_v22 = vadd.f32 %v3298_v17, %v3106_v2  ;;  %v3108_v32 = vadd.f32 %v3107_v39, %v7472_v28  ;;  %4151 = vmatprep.subr.bf16.mxu0 %v5681_v43  ;;  %4344 = vmatprep.subr.bf16.mxu1 %v5684_v33  ;;  %v5688_v43 = vld [vmem:[#allocation3 + $0x6a8] ss:$16 sps:$4 sm:$0xff]  }
 0x21d   :  { %v3109_v49 = vpop.f32.mrf.mxu0  ;;  %v3302_v35 = vpop.f32.mrf.mxu1  ;;  %v9114_v33 = vld [vmem:[#allocation29_spill] sm:$0xff] }
 0x21e   :  { %v7776_v13 = vadd.f32 %v3300_v61, %v3108_v32  ;;  %v3110_v55 = vadd.f32 %v3109_v49, %v7465_v50  ;;  %v5696_v32 = vld [vmem:[#allocation3 + $0x68c] ss:$16 sps:$4 sm:$0xff]  }
 0x21f   :  { %v3111_v36 = vpop.f32.mrf.mxu0  ;;  %4152 = vmatpush1.bf16.msra.mxu0 %v5679_v56  ;;  %v3304_v39 = vpop.f32.mrf.mxu1  ;;  %4345 = vmatpush1.bf16.msra.mxu1 %v5682_v29 }
 0x220   :  { %v7779_v2 = vadd.f32 %v3302_v35, %v3110_v55  ;;  %v3112_v17 = vadd.f32 %v3111_v36, %v7472_v28  ;;  %4153 = vmatprep.subr.bf16.mxu0 %v5687_v46  ;;  %4346 = vmatprep.subr.bf16.mxu1 %v5690_v6  ;;  %v9116_v55 = vld [vmem:[#allocation31_spill] sm:$0xff]  ;;  %v9117_v35 = vld [vmem:[#allocation32_spill] sm:$0xff] }
 0x221   :  { %v3115_v41 = vpop.f32.mrf.mxu0  ;;  %3806 = vmatmul.mubr.bf16.gmra.mxu0 %v9114_v33  ;;  %v3308_v56 = vpop.f32.mrf.mxu1  ;;  %3999 = vmatmul.mubr.bf16.gmra.mxu1 %v9115_v54  ;;  %v5691_v46 = vld [vmem:[#allocation3 + $0x488] ss:$16 sps:$4 sm:$0xff]  }
 0x222   :  { %v7783_v61 = vadd.f32 %v3304_v39, %v3112_v17  ;;  %v3116_v49 = vadd.f32 %v3115_v41, %v7465_v50  ;;  %3815 = vmatprep.mubr.bf16.mxu0 %v9116_v55  ;;  %4008 = vmatprep.mubr.bf16.mxu1 %v9117_v35  ;;  %v5694_v17 = vld [vmem:[#allocation3 + $0x688] ss:$16 sps:$4 sm:$0xff]   ;;  %v5699_v39 = vld [vmem:[#allocation3 + $0x46c] ss:$16 sps:$4 sm:$0xff]  }
 0x223   :  { %v3117_v29 = vpop.f32.mrf.mxu0  ;;  %4154 = vmatpush1.bf16.msra.mxu0 %v5685_v20  ;;  %v3310_v6 = vpop.f32.mrf.mxu1  ;;  %4347 = vmatpush1.bf16.msra.mxu1 %v5688_v43  ;;  %v5697_v20 = vld [vmem:[#allocation3 + $0x468] ss:$16 sps:$4 sm:$0xff]  }
 0x224   :  { %v7789_v36 = vadd.f32 %v3308_v56, %v3116_v49  ;;  %v3118_v33 = vadd.f32 %v3117_v29, %v7472_v28  ;;  %4155 = vmatprep.subr.bf16.mxu0 %v5693_v57  ;;  %4348 = vmatprep.subr.bf16.mxu1 %v5696_v32  ;;  %v5700_v43 = vld [vmem:[#allocation3 + $0x668] ss:$16 sps:$4 sm:$0xff]   ;;  %v5705_v57 = vld [vmem:[#allocation3 + $0x44c] ss:$16 sps:$4 sm:$0xff]  }
 0x225   :  { %v3119_v41 = vpop.f32.mrf.mxu0  ;;  %v3312_v35 = vpop.f32.mrf.mxu1  ;;  %v9118_v32 = vld [vmem:[#allocation33_spill] sm:$0xff] }
 0x226   :  { %v7792_v54 = vadd.f32 %v3310_v6, %v3118_v33  ;;  %v3120_v55 = vadd.f32 %v3119_v41, %v7465_v50  ;;  %v5708_v33 = vld [vmem:[#allocation3 + $0x64c] ss:$16 sps:$4 sm:$0xff]  }
 0x227   :  { %v3121_v16 = vpop.f32.mrf.mxu0  ;;  %4156 = vmatpush1.bf16.msra.mxu0 %v5691_v46  ;;  %v3314_v29 = vpop.f32.mrf.mxu1  ;;  %4349 = vmatpush1.bf16.msra.mxu1 %v5694_v17 }
 0x228   :  { %v7795_v49 = vadd.f32 %v3312_v35, %v3120_v55  ;;  %v3122_v56 = vadd.f32 %v3121_v16, %v7472_v28  ;;  %4157 = vmatprep.subr.bf16.mxu0 %v5699_v39  ;;  %4350 = vmatprep.subr.bf16.mxu1 %v5702_v45  ;;  %v9120_v55 = vld [vmem:[#allocation35_spill] sm:$0xff]  ;;  %v9121_v16 = vld [vmem:[#allocation36_spill] sm:$0xff] }
 0x229   :  { %v3125_v4 = vpop.f32.mrf.mxu0  ;;  %3816 = vmatmul.mubr.bf16.gmra.mxu0 %v9118_v32  ;;  %v3318_v46 = vpop.f32.mrf.mxu1  ;;  %4009 = vmatmul.mubr.bf16.gmra.mxu1 %v9119_v40  ;;  %v5703_v39 = vld [vmem:[#allocation3 + $0x448] ss:$16 sps:$4 sm:$0xff]  }
 0x22a   :  { %v7799_v6 = vadd.f32 %v3314_v29, %v3122_v56  ;;  %v3126_v41 = vadd.f32 %v3125_v4, %v7465_v50  ;;  %3825 = vmatprep.mubr.bf16.mxu0 %v9120_v55  ;;  %4018 = vmatprep.mubr.bf16.mxu1 %v9121_v16  ;;  %v5706_v56 = vld [vmem:[#allocation3 + $0x648] ss:$16 sps:$4 sm:$0xff]   ;;  %v5711_v29 = vld [vmem:[#allocation3 + $0x42c] ss:$16 sps:$4 sm:$0xff]  }
 0x22b   :  { %v3127_v17 = vpop.f32.mrf.mxu0  ;;  %4158 = vmatpush1.bf16.msra.mxu0 %v5697_v20  ;;  %v3320_v45 = vpop.f32.mrf.mxu1  ;;  %4351 = vmatpush1.bf16.msra.mxu1 %v5700_v43  ;;  %v5709_v20 = vld [vmem:[#allocation3 + $0x428] ss:$16 sps:$4 sm:$0xff]  }
 0x22c   :  { %v7805_v35 = vadd.f32 %v3318_v46, %v3126_v41  ;;  %v3128_v32 = vadd.f32 %v3127_v17, %v7472_v28  ;;  %4159 = vmatprep.subr.bf16.mxu0 %v5705_v57  ;;  %4352 = vmatprep.subr.bf16.mxu1 %v5708_v33  ;;  %v5712_v43 = vld [vmem:[#allocation3 + $0x628] ss:$16 sps:$4 sm:$0xff]   ;;  %v5717_v57 = vld [vmem:[#allocation3 + $0x40c] ss:$16 sps:$4 sm:$0xff]  }
 0x22d   :  { %v3129_v4 = vpop.f32.mrf.mxu0  ;;  %v3322_v16 = vpop.f32.mrf.mxu1  ;;  %v9123_v33 = vld [vmem:[#allocation37_spill] sm:$0xff] }
 0x22e   :  { %v7808_v40 = vadd.f32 %v3320_v45, %v3128_v32  ;;  %v3130_v55 = vadd.f32 %v3129_v4, %v7465_v50  ;;  %v5720_v32 = vld [vmem:[#allocation3 + $0x60c] ss:$16 sps:$4 sm:$0xff]  }
 0x22f   :  { %v3131_v44 = vpop.f32.mrf.mxu0  ;;  %4160 = vmatpush1.bf16.msra.mxu0 %v5703_v39  ;;  %v3324_v17 = vpop.f32.mrf.mxu1  ;;  %4353 = vmatpush1.bf16.msra.mxu1 %v5706_v56 }
 0x230   :  { %v7811_v41 = vadd.f32 %v3322_v16, %v3130_v55  ;;  %v3132_v46 = vadd.f32 %v3131_v44, %v7472_v28  ;;  %4161 = vmatprep.subr.bf16.mxu0 %v5711_v29  ;;  %4354 = vmatprep.subr.bf16.mxu1 %v5714_v58  ;;  %v9126_v55 = vld [vmem:[#allocation39_spill] sm:$0xff]  ;;  %v9127_v44 = vld [vmem:[#allocation40_spill] sm:$0xff] }
 0x231   :  { %v3135_v47 = vpop.f32.mrf.mxu0  ;;  %3826 = vmatmul.mubr.bf16.gmra.mxu0 %v9123_v33  ;;  %v3328_v39 = vpop.f32.mrf.mxu1  ;;  %4019 = vmatmul.mubr.bf16.gmra.mxu1 %v9125_v5  ;;  %v5715_v29 = vld [vmem:[#allocation3 + $0x408] ss:$16 sps:$4 sm:$0xff]  }
 0x232   :  { %9122 = vst [vmem:[#allocation16_spill] sm:$0xff] %v7811_v41  ;;  %v7815_v45 = vadd.f32 %v3324_v17, %v3132_v46  ;;  %v3136_v4 = vadd.f32 %v3135_v47, %v7465_v50  ;;  %3835 = vmatprep.mubr.bf16.mxu0 %v9126_v55  ;;  %4028 = vmatprep.mubr.bf16.mxu1 %v9127_v44  ;;  %v5718_v46 = vld [vmem:[#allocation3 + $0x608] ss:$16 sps:$4 sm:$0xff]   ;;  %v5723_v17 = vld [vmem:[#allocation3 + $0x5ec] ss:$16 sps:$4 sm:$0xff]  }
 0x233   :  { %v3137_v56 = vpop.f32.mrf.mxu0  ;;  %4162 = vmatpush1.bf16.msra.mxu0 %v5709_v20  ;;  %v3330_v58 = vpop.f32.mrf.mxu1  ;;  %4355 = vmatpush1.bf16.msra.mxu1 %v5712_v43  ;;  %v5721_v20 = vld [vmem:[#allocation3 + $0x5e8] ss:$16 sps:$4 sm:$0xff]  }
 0x234   :  { %9124 = vst [vmem:[#allocation18_spill] sm:$0xff] %v7815_v45  ;;  %v7821_v16 = vadd.f32 %v3328_v39, %v3136_v4  ;;  %v3138_v33 = vadd.f32 %v3137_v56, %v7472_v28  ;;  %4163 = vmatprep.subr.bf16.mxu0 %v5717_v57  ;;  %4356 = vmatprep.subr.bf16.mxu1 %v5720_v32  ;;  %v5726_v45 = vld [vmem:[#allocation3 + $0x7ec] ss:$16 sps:$4 sm:$0xff]   ;;  %v5724_v43 = vld [vmem:[#allocation3 + $0x7e8] ss:$16 sps:$4 sm:$0xff]  }
 0x235   :  { %v3139_v47 = vpop.f32.mrf.mxu0  ;;  %v3332_v44 = vpop.f32.mrf.mxu1  ;;  %v5729_v57 = vld [vmem:[#allocation3 + $0x5cc] ss:$16 sps:$4 sm:$0xff]  }
 0x236   :  { %9128 = vst [vmem:[#allocation22_spill] sm:$0xff] %v7821_v16  ;;  %v7824_v5 = vadd.f32 %v3330_v58, %v3138_v33  ;;  %v3140_v55 = vadd.f32 %v3139_v47, %v7465_v50  ;;  %v9131_v32 = vld [vmem:[#allocation41_spill] sm:$0xff] }
 0x237   :  { %v3141_v41 = vpop.f32.mrf.mxu0  ;;  %4164 = vmatpush1.bf16.msra.mxu0 %v5715_v29  ;;  %v3334_v56 = vpop.f32.mrf.mxu1  ;;  %4357 = vmatpush1.bf16.msra.mxu1 %v5718_v46  ;;  %v5732_v33 = vld [vmem:[#allocation3 + $0x7cc] ss:$16 sps:$4 sm:$0xff]  }
 0x238   :  { %9129 = vst [vmem:[#allocation23_spill] sm:$0xff] %v7824_v5  ;;  %v7827_v4 = vadd.f32 %v3332_v44, %v3140_v55  ;;  %v3142_v39 = vadd.f32 %v3141_v41, %v7472_v28  ;;  %4165 = vmatprep.subr.bf16.mxu0 %v5723_v17  ;;  %4358 = vmatprep.subr.bf16.mxu1 %v5726_v45  ;;  %v9133_v5 = vld [vmem:[#allocation42_spill] sm:$0xff]  ;;  %v9134_v55 = vld [vmem:[#allocation43_spill] sm:$0xff]  ;;  %v9135_v41 = vld [vmem:[#allocation45_spill] sm:$0xff] }
 0x239   :  { %v3145_v16 = vpop.f32.mrf.mxu0  ;;  %3836 = vmatmul.mubr.bf16.gmra.mxu0 %v9131_v32  ;;  %v3338_v29 = vpop.f32.mrf.mxu1  ;;  %4029 = vmatmul.mubr.bf16.gmra.mxu1 %v9133_v5  ;;  %v5727_v17 = vld [vmem:[#allocation3 + $0x5c8] ss:$16 sps:$4 sm:$0xff]  }
 0x23a   :  { %9130 = vst [vmem:[#allocation24_spill] sm:$0xff] %v7827_v4  ;;  %v7831_v58 = vadd.f32 %v3334_v56, %v3142_v39  ;;  %v3146_v47 = vadd.f32 %v3145_v16, %v7465_v50  ;;  %3845 = vmatprep.mubr.bf16.mxu0 %v9134_v55  ;;  %4038 = vmatprep.mubr.bf16.mxu1 %v9135_v41  ;;  %v5730_v39 = vld [vmem:[#allocation3 + $0x7c8] ss:$16 sps:$4 sm:$0xff]   ;;  %v5735_v56 = vld [vmem:[#allocation3 + $0x5ac] ss:$16 sps:$4 sm:$0xff]  }
 0x23b   :  { %v3147_v46 = vpop.f32.mrf.mxu0  ;;  %4166 = vmatpush2.bf16.msra.mxu0 %v5721_v20  ;;  %v3340_v45 = vpop.f32.mrf.mxu1  ;;  %4359 = vmatpush2.bf16.msra.mxu1 %v5724_v43  ;;  %v5733_v20 = vld [vmem:[#allocation3 + $0x5a8] ss:$16 sps:$4 sm:$0xff]  }
 0x23c   :  { %9132 = vst [vmem:[#allocation26_spill] sm:$0xff] %v7831_v58  ;;  %v7837_v44 = vadd.f32 %v3338_v29, %v3146_v47  ;;  %v3148_v32 = vadd.f32 %v3147_v46, %v7472_v28  ;;  %4167 = vmatprep.subr.bf16.mxu0 %v5729_v57  ;;  %4360 = vmatprep.subr.bf16.mxu1 %v5732_v33  ;;  %v5738_v58 = vld [vmem:[#allocation3 + $0x7ac] ss:$16 sps:$4 sm:$0xff]   ;;  %v5736_v43 = vld [vmem:[#allocation3 + $0x7a8] ss:$16 sps:$4 sm:$0xff]   ;;  %v9139_v33 = vld [vmem:[#allocation46_spill] sm:$0xff] }
 0x23d   :  { %v3149_v16 = vpop.f32.mrf.mxu0  ;;  %v3342_v41 = vpop.f32.mrf.mxu1  ;;  %v5741_v57 = vld [vmem:[#allocation3 + $0x58c] ss:$16 sps:$4 sm:$0xff]  }
 0x23e   :  { %9136 = vst [vmem:[#allocation29_spill] sm:$0xff] %v7837_v44  ;;  %v7840_v5 = vadd.f32 %v3340_v45, %v3148_v32  ;;  %v3150_v55 = vadd.f32 %v3149_v16, %v7465_v50  ;;  %v5744_v32 = vld [vmem:[#allocation3 + $0x78c] ss:$16 sps:$4 sm:$0xff]  }
 0x23f   :  { %v3151_v4 = vpop.f32.mrf.mxu0  ;;  %4168 = vmatpush2.bf16.msra.mxu0 %v5727_v17  ;;  %v3344_v46 = vpop.f32.mrf.mxu1  ;;  %4361 = vmatpush2.bf16.msra.mxu1 %v5730_v39 }
 0x240   :  { %9137 = vst [vmem:[#allocation30_spill] sm:$0xff] %v7840_v5  ;;  %v7843_v47 = vadd.f32 %v3342_v41, %v3150_v55  ;;  %v3152_v29 = vadd.f32 %v3151_v4, %v7472_v28  ;;  %4169 = vmatprep.subr.bf16.mxu0 %v5735_v56  ;;  %4362 = vmatprep.subr.bf16.mxu1 %v5738_v58  ;;  %v9141_v5 = vld [vmem:[#allocation11_spill] sm:$0xff]  ;;  %v9143_v4 = vld [vmem:[#allocation48_spill] sm:$0xff] }
 0x241   :  { %v3155_v44 = vpop.f32.mrf.mxu0  ;;  %3846 = vmatmul.mubr.bf16.gmra.mxu0 %v9139_v33  ;;  %v3348_v17 = vpop.f32.mrf.mxu1  ;;  %4039 = vmatmul.mubr.bf16.gmra.mxu1 %v9141_v5  ;;  %v9142_v55 = vld [vmem:[#allocation15_spill] sm:$0xff] }
 0x242   :  { %9138 = vst [vmem:[#allocation31_spill] sm:$0xff] %v7843_v47  ;;  %v7847_v45 = vadd.f32 %v3344_v46, %v3152_v29  ;;  %v3156_v16 = vadd.f32 %v3155_v44, %v7465_v50  ;;  %3855 = vmatprep.mubr.bf16.mxu0 %v9142_v55  ;;  %4048 = vmatprep.mubr.bf16.mxu1 %v9143_v4  ;;  %v5739_v56 = vld [vmem:[#allocation3 + $0x588] ss:$16 sps:$4 sm:$0xff]   ;;  %v5747_v46 = vld [vmem:[#allocation3 + $0x56c] ss:$16 sps:$4 sm:$0xff]  }
 0x243   :  { %v3157_v39 = vpop.f32.mrf.mxu0  ;;  %4170 = vmatpush2.bf16.msra.mxu0 %v5733_v20  ;;  %v3350_v58 = vpop.f32.mrf.mxu1  ;;  %4363 = vmatpush2.bf16.msra.mxu1 %v5736_v43  ;;  %v5742_v29 = vld [vmem:[#allocation3 + $0x788] ss:$16 sps:$4 sm:$0xff]  }
 0x244   :  { %9140 = vst [vmem:[#allocation32_spill] sm:$0xff] %v7847_v45  ;;  %v7853_v41 = vadd.f32 %v3348_v17, %v3156_v16  ;;  %v3158_v33 = vadd.f32 %v3157_v39, %v7472_v28  ;;  %4171 = vmatprep.subr.bf16.mxu0 %v5741_v57  ;;  %4364 = vmatprep.subr.bf16.mxu1 %v5744_v32  ;;  %v5750_v45 = vld [vmem:[#allocation3 + $0x76c] ss:$16 sps:$4 sm:$0xff]   ;;  %v5745_v20 = vld [vmem:[#allocation3 + $0x568] ss:$16 sps:$4 sm:$0xff]   ;;  %v9147_v32 = vld [vmem:[#allocation50_spill] sm:$0xff] }
 0x245   :  { %v3159_v44 = vpop.f32.mrf.mxu0  ;;  %v3352_v4 = vpop.f32.mrf.mxu1  ;;  %v5748_v43 = vld [vmem:[#allocation3 + $0x768] ss:$16 sps:$4 sm:$0xff]   ;;  %v5753_v57 = vld [vmem:[#allocation3 + $0x54c] ss:$16 sps:$4 sm:$0xff]  }
 0x246   :  { %9144 = vst [vmem:[#allocation33_spill] sm:$0xff] %v7853_v41  ;;  %v7856_v5 = vadd.f32 %v3350_v58, %v3158_v33  ;;  %v3160_v55 = vadd.f32 %v3159_v44, %v7465_v50  ;;  %v5756_v33 = vld [vmem:[#allocation3 + $0x74c] ss:$16 sps:$4 sm:$0xff]  }
 0x247   :  { %v3161_v47 = vpop.f32.mrf.mxu0  ;;  %4172 = vmatpush2.bf16.msra.mxu0 %v5739_v56  ;;  %v3354_v39 = vpop.f32.mrf.mxu1  ;;  %4365 = vmatpush2.bf16.msra.mxu1 %v5742_v29 }
 0x248   :  { %9145 = vst [vmem:[#allocation34_spill] sm:$0xff] %v7856_v5  ;;  %v7859_v16 = vadd.f32 %v3352_v4, %v3160_v55  ;;  %v3162_v17 = vadd.f32 %v3161_v47, %v7472_v28  ;;  %4173 = vmatprep.subr.bf16.mxu0 %v5747_v46  ;;  %4366 = vmatprep.subr.bf16.mxu1 %v5750_v45  ;;  %v9149_v5 = vld [vmem:[#allocation51_spill] sm:$0xff]  ;;  %v9150_v55 = vld [vmem:[#allocation17_spill] sm:$0xff]  ;;  %v9151_v47 = vld [vmem:[#allocation52_spill] sm:$0xff] }
 0x249   :  { %v3165_v41 = vpop.f32.mrf.mxu0  ;;  %3856 = vmatmul.mubr.bf16.gmra.mxu0 %v9147_v32  ;;  %v3358_v56 = vpop.f32.mrf.mxu1  ;;  %4049 = vmatmul.mubr.bf16.gmra.mxu1 %v9149_v5  ;;  %v5751_v46 = vld [vmem:[#allocation3 + $0x548] ss:$16 sps:$4 sm:$0xff]  }
 0x24a   :  { %9146 = vst [vmem:[#allocation35_spill] sm:$0xff] %v7859_v16  ;;  %v7863_v58 = vadd.f32 %v3354_v39, %v3162_v17  ;;  %v3166_v44 = vadd.f32 %v3165_v41, %v7465_v50  ;;  %3865 = vmatprep.mubr.bf16.mxu0 %v9150_v55  ;;  %4058 = vmatprep.mubr.bf16.mxu1 %v9151_v47  ;;  %v5754_v17 = vld [vmem:[#allocation3 + $0x748] ss:$16 sps:$4 sm:$0xff]   ;;  %v5759_v39 = vld [vmem:[#allocation3 + $0x52c] ss:$16 sps:$4 sm:$0xff]  }
 0x24b   :  { %v3167_v29 = vpop.f32.mrf.mxu0  ;;  %4174 = vmatpush2.bf16.msra.mxu0 %v5745_v20  ;;  %v3360_v45 = vpop.f32.mrf.mxu1  ;;  %4367 = vmatpush2.bf16.msra.mxu1 %v5748_v43  ;;  %v5757_v20 = vld [vmem:[#allocation3 + $0x528] ss:$16 sps:$4 sm:$0xff]  }
 0x24c   :  { %9148 = vst [vmem:[#allocation36_spill] sm:$0xff] %v7863_v58  ;;  %v7869_v4 = vadd.f32 %v3358_v56, %v3166_v44  ;;  %v3168_v32 = vadd.f32 %v3167_v29, %v7472_v28  ;;  %4175 = vmatprep.subr.bf16.mxu0 %v5753_v57  ;;  %4368 = vmatprep.subr.bf16.mxu1 %v5756_v33  ;;  %v5762_v58 = vld [vmem:[#allocation3 + $0x72c] ss:$16 sps:$4 sm:$0xff]   ;;  %v5760_v43 = vld [vmem:[#allocation3 + $0x728] ss:$16 sps:$4 sm:$0xff]  }
 0x24d   :  { %v3169_v41 = vpop.f32.mrf.mxu0  ;;  %v3362_v47 = vpop.f32.mrf.mxu1  ;;  %v5765_v57 = vld [vmem:[#allocation3 + $0x50c] ss:$16 sps:$4 sm:$0xff]  }
 0x24e   :  { %9152 = vst [vmem:[#allocation37_spill] sm:$0xff] %v7869_v4  ;;  %v7872_v5 = vadd.f32 %v3360_v45, %v3168_v32  ;;  %v3170_v55 = vadd.f32 %v3169_v41, %v7465_v50  ;;  %v9154_v33 = vld [vmem:[#allocation53_spill] sm:$0xff] }
 0x24f   :  { %v3171_v16 = vpop.f32.mrf.mxu0  ;;  %4176 = vmatpush2.bf16.msra.mxu0 %v5751_v46  ;;  %v3364_v29 = vpop.f32.mrf.mxu1  ;;  %4369 = vmatpush2.bf16.msra.mxu1 %v5754_v17  ;;  %v5768_v32 = vld [vmem:[#allocation3 + $0x70c] ss:$16 sps:$4 sm:$0xff]  }
 0x250   :  { %9153 = vst [vmem:[#allocation38_spill] sm:$0xff] %v7872_v5  ;;  %v7875_v44 = vadd.f32 %v3362_v47, %v3170_v55  ;;  %v3172_v56 = vadd.f32 %v3171_v16, %v7472_v28  ;;  %4177 = vmatprep.subr.bf16.mxu0 %v5759_v39  ;;  %4370 = vmatprep.subr.bf16.mxu1 %v5762_v58  ;;  %v9156_v5 = vld [vmem:[#allocation25_spill] sm:$0xff]  ;;  %v9157_v55 = vld [vmem:[#allocation55_spill] sm:$0xff] }
 0x251   :  { %v3175_v4 = vpop.f32.mrf.mxu0  ;;  %3866 = vmatmul.mubr.bf16.gmra.mxu0 %v9154_v33  ;;  %v3368_v46 = vpop.f32.mrf.mxu1  ;;  %4059 = vmatmul.mubr.bf16.gmra.mxu1 %v9156_v5  ;;  %v9158_v16 = vld [vmem:[#allocation27_spill] sm:$0xff] }
 0x252   :  { %v7879_v45 = vadd.f32 %v3364_v29, %v3172_v56  ;;  %v3176_v41 = vadd.f32 %v3175_v4, %v7465_v50  ;;  %3875 = vmatprep.mubr.bf16.mxu0 %v9157_v55  ;;  %4068 = vmatprep.mubr.bf16.mxu1 %v9158_v16  ;;  %v5763_v39 = vld [vmem:[#allocation3 + $0x508] ss:$16 sps:$4 sm:$0xff]  }
 0x253   :  { %v3177_v17 = vpop.f32.mrf.mxu0  ;;  %4178 = vmatpush2.bf16.msra.mxu0 %v5757_v20  ;;  %v3370_v58 = vpop.f32.mrf.mxu1  ;;  %4371 = vmatpush2.bf16.msra.mxu1 %v5760_v43  ;;  %v5766_v56 = vld [vmem:[#allocation3 + $0x708] ss:$16 sps:$4 sm:$0xff]  }
 0x254   :  { %9155 = vst [vmem:[#allocation39_spill] sm:$0xff] %v7879_v45  ;;  %v7885_v47 = vadd.f32 %v3368_v46, %v3176_v41  ;;  %v3178_v33 = vadd.f32 %v3177_v17, %v7472_v28  ;;  %4179 = vmatprep.subr.bf16.mxu0 %v5765_v57  ;;  %4372 = vmatprep.subr.bf16.mxu1 %v5768_v32  ;;  %v9160_v17 = vld [vmem:[#allocation57_spill] sm:$0xff] }
 0x255   :  { %v3179_v29 = vpop.f32.mrf.mxu0  ;;  %v3372_v55 = vpop.f32.mrf.mxu1 }
 0x256   :  { %v7888_v4 = vadd.f32 %v3370_v58, %v3178_v33  ;;  %v3180_v5 = vadd.f32 %v3179_v29, %v7465_v50  ;;  %v9162_v33 = vld [vmem:[#allocation58_spill] sm:$0xff]  ;;  %v9163_v50 = vld [vmem:[#allocation59_spill] sm:$0xff]  ;;  %v9164_v58 = vld [vmem:[#allocation60_spill] sm:$0xff] }
 0x257   :  { %v3181_v45 = vpop.f32.mrf.mxu0  ;;  %4180 = vmatpush2.bf16.msra.mxu0 %v5763_v39  ;;  %v3374_v41 = vpop.f32.mrf.mxu1  ;;  %4373 = vmatpush2.bf16.msra.mxu1 %v5766_v56 }
 0x258   :  { %v7891_v16 = vadd.f32 %v3372_v55, %v3180_v5  ;;  %v3182_v20 = vadd.f32 %v3181_v45, %v7472_v28  ;;  %v4663_v28 = vld [vmem:[%s8731_s5] sm:$0xf] }
 0x259   :  { %v3411_v46 = vpop.f32.mrf.mxu0  ;;  %3876 = vmatmul.mubr.bf16.gmra.mxu0 %v9160_v17  ;;  %v3604_v32 = vpop.f32.mrf.mxu1  ;;  %4069 = vmatmul.mubr.bf16.gmra.mxu1 %v9162_v33  ;;  %v9165_v17 = vld [vmem:[#allocation10_spill] sm:$0xff] }
 0x25a   :  { %9159 = vst [vmem:[#allocation40_spill] sm:$0xff] %v7891_v16  ;;  %v7895_v43 = vadd.f32 %v3374_v41, %v3182_v20  ;;  %v3412_v57 = vadd.f32 %v3411_v46, %v7505_v52  ;;  %3885 = vmatprep.mubr.bf16.mxu0 %v9163_v50  ;;  %4078 = vmatprep.mubr.bf16.mxu1 %v9164_v58 }
 0x25b   :  { %v3413_v39 = vpop.f32.mrf.mxu0  ;;  %v3606_v56 = vpop.f32.mrf.mxu1  ;;  %v7906_v52 = vrot.slane %v4663_v28, %v9063_v26  ;;  %v7910_v33 = vrot.slane %v4663_v28, %v9165_v17 }
 0x25c   :  { %9161 = vst [vmem:[#allocation41_spill] sm:$0xff] %v7895_v43  ;;  %v3605_v29 = vadd.f32 %v3604_v32, %v3412_v57  ;;  %v3414_v45 = vadd.f32 %v3413_v39, %v7512_v21  ;;  %v9166_v39 = vld [vmem:[#allocation61_spill] sm:$0xff] }
 0x25d   :  { %v3415_v5 = vpop.f32.mrf.mxu0  ;;  %v3608_v41 = vpop.f32.mrf.mxu1 }
 0x25e   :  { %v3607_v55 = vadd.f32 %v3606_v56, %v3414_v45  ;;  %v3416_v20 = vadd.f32 %v3415_v5, %v7523_v51  ;;  %v4535_v46 = vmax.f32 %v3605_v29, 0.0  ;;  %v9167_v5 = vld [vmem:[#allocation62_spill] sm:$0xff]  ;;  %v9168_v29 = vld [vmem:[#allocation63_spill] sm:$0xff] }
 0x25f   :  { %v3417_v57 = vpop.f32.mrf.mxu0  ;;  %v3610_v43 = vpop.f32.mrf.mxu1 }
 0x260   :  { %v4536_v32 = vmax.f32 %v3607_v55, 0.0  ;;  %v3609_v50 = vadd.f32 %v3608_v41, %v3416_v20  ;;  %v3418_v58 = vadd.f32 %v3417_v57, %v7537_v27  ;;  %v4685_v28 = vmul.f32 %v7910_v33, %v4535_v46  ;;  %v9169_v20 = vld [vmem:[#allocation64_spill] sm:$0xff] }
 0x261   :  { %v3421_v21 = vpop.f32.mrf.mxu0  ;;  %3886 = vmatmul.mubr.bf16.gmra.mxu0 %v9166_v39  ;;  %v3614_v51 = vpop.f32.mrf.mxu1  ;;  %4079 = vmatmul.mubr.bf16.gmra.mxu1 %v9167_v5 }
 0x262   :  { %v4686_v45 = vmul.f32 %v7906_v52, %v4536_v32  ;;  %v3611_v26 = vadd.f32 %v3610_v43, %v3418_v58  ;;  %v3422_v56 = vadd.f32 %v3421_v21, %v7545_v19  ;;  %3895 = vmatprep.mubr.bf16.mxu0 %v9168_v29  ;;  %v4539_v55 = vmax.f32 %v3609_v50, 0.0  ;;  %4088 = vmatprep.mubr.bf16.mxu1 %v9169_v20 }
 0x263   :  { %v3423_v27 = vpop.f32.mrf.mxu0  ;;  %v3616_v39 = vpop.f32.mrf.mxu1 }
 0x264   :  { %v4540_v41 = vmax.f32 %v3611_v26, 0.0  ;;  %v3615_v17 = vadd.f32 %v3614_v51, %v3422_v56  ;;  %v3424_v57 = vadd.f32 %v3423_v27, %v7552_v1  ;;  %v7921_v43 = vadd.f32 %v4686_v45, %v4685_v28  ;;  %v9170_v51 = vld [vmem:[#allocation65_spill] sm:$0xff] }
 0x265   :  { %v3425_v32 = vpop.f32.mrf.mxu0  ;;  %v3618_v5 = vpop.f32.mrf.mxu1  ;;  %v4689_v46 = vmul.f32 %v7910_v33, %v4539_v55  ;;  %v9172_v55 = vld [vmem:[#allocation67_spill] sm:$0xff] }
 0x266   :  { %v4690_v19 = vmul.f32 %v7906_v52, %v4540_v41  ;;  %v3617_v58 = vadd.f32 %v3616_v39, %v3424_v57  ;;  %v3426_v21 = vadd.f32 %v3425_v32, %v7563_v10  ;;  %v4543_v50 = vmax.f32 %v3615_v17, 0.0  ;;  %v9171_v57 = vld [vmem:[#allocation66_spill] sm:$0xff] }
 0x267   :  { %v3427_v29 = vpop.f32.mrf.mxu0  ;;  %v3620_v56 = vpop.f32.mrf.mxu1 }
 0x268   :  { %v4544_v20 = vmax.f32 %v3617_v58, 0.0  ;;  %v3619_v16 = vadd.f32 %v3618_v5, %v3426_v21  ;;  %v3428_v26 = vadd.f32 %v3427_v29, %v7577_v37  ;;  %v7928_v45 = vadd.f32 %v4690_v19, %v4689_v46  ;;  %v9173_v37 = vld [vmem:[#allocation68_spill] sm:$0xff] }
 0x269   :  { %v3431_v1 = vpop.f32.mrf.mxu0  ;;  %3896 = vmatmul.mubr.bf16.gmra.mxu0 %v9170_v51  ;;  %v3624_v41 = vpop.f32.mrf.mxu1  ;;  %4089 = vmatmul.mubr.bf16.gmra.mxu1 %v9171_v57  ;;  %v4693_v17 = vmul.f32 %v7910_v33, %v4543_v50 }
 0x26a   :  { %v4694_v28 = vmul.f32 %v7906_v52, %v4544_v20  ;;  %v3621_v27 = vadd.f32 %v3620_v56, %v3428_v26  ;;  %v3432_v10 = vadd.f32 %v3431_v1, %v7585_v31  ;;  %3905 = vmatprep.mubr.bf16.mxu0 %v9172_v55  ;;  %v4547_v39 = vmax.f32 %v3619_v16, 0.0  ;;  %4098 = vmatprep.mubr.bf16.mxu1 %v9173_v37 }
 0x26b   :  { %v3433_v32 = vpop.f32.mrf.mxu0  ;;  %v3626_v5 = vpop.f32.mrf.mxu1 }
 0x26c   :  { %v4548_v58 = vmax.f32 %v3621_v27, 0.0  ;;  %v3625_v21 = vadd.f32 %v3624_v41, %v3432_v10  ;;  %v3434_v19 = vadd.f32 %v3433_v32, %v7592_v7  ;;  %v7937_v29 = vadd.f32 %v4694_v28, %v4693_v17  ;;  %v9174_v28 = vld [vmem:[#allocation14_spill] sm:$0xff] }
 0x26d   :  { %v3435_v46 = vpop.f32.mrf.mxu0  ;;  %v3628_v1 = vpop.f32.mrf.mxu1  ;;  %v4697_v16 = vmul.f32 %v7910_v33, %v4547_v39 }
 0x26e   :  { %v4698_v31 = vmul.f32 %v7906_v52, %v4548_v58  ;;  %v4551_v20 = vmax.f32 %v3625_v21, 0.0  ;;  %v3627_v26 = vadd.f32 %v3626_v5, %v3434_v19  ;;  %v3436_v56 = vadd.f32 %v3435_v46, %v7603_v34  ;;  %v9175_v58 = vld [vmem:[#allocation69_spill] sm:$0xff]  ;;  %v9176_v21 = vld [vmem:[#allocation47_spill] sm:$0xff] }
 0x26f   :  { %v3437_v50 = vpop.f32.mrf.mxu0  ;;  %v3630_v10 = vpop.f32.mrf.mxu1 }
 0x270   :  { %v4552_v51 = vmax.f32 %v3627_v26, 0.0  ;;  %v3629_v57 = vadd.f32 %v3628_v1, %v3436_v56  ;;  %v3438_v27 = vadd.f32 %v3437_v50, %v7617_v63  ;;  %v4701_v7 = vmul.f32 %v7910_v33, %v4551_v20  ;;  %v9177_v63 = vld [vmem:[#allocation44_spill] sm:$0xff] }
 0x271   :  { %v3441_v41 = vpop.f32.mrf.mxu0  ;;  %3906 = vmatmul.mubr.bf16.gmra.mxu0 %v9174_v28  ;;  %v7945_v55 = vadd.f32 %v4698_v31, %v4697_v16  ;;  %v3634_v39 = vpop.f32.mrf.mxu1  ;;  %4099 = vmatmul.mubr.bf16.gmra.mxu1 %v9175_v58  ;;  %v9179_v58 = vld [vmem:[#allocation20_spill] sm:$0xff] }
 0x272   :  { %v4702_v17 = vmul.f32 %v7906_v52, %v4552_v51  ;;  %v4555_v37 = vmax.f32 %v3629_v57, 0.0  ;;  %v3631_v34 = vadd.f32 %v3630_v10, %v3438_v27  ;;  %v3442_v32 = vadd.f32 %v3441_v41, %v7625_v23  ;;  %3915 = vmatprep.mubr.bf16.mxu0 %v9176_v21  ;;  %4108 = vmatprep.mubr.bf16.mxu1 %v9177_v63 }
 0x273   :  { %v3443_v19 = vpop.f32.mrf.mxu0  ;;  %v3636_v31 = vpop.f32.mrf.mxu1 }
 0x274   :  { %v7952_v5 = vadd.f32 %v4702_v17, %v4701_v7  ;;  %v4556_v46 = vmax.f32 %v3631_v34, 0.0  ;;  %v3635_v20 = vadd.f32 %v3634_v39, %v3442_v32  ;;  %v3444_v26 = vadd.f32 %v3443_v19, %v7632_v25  ;;  %v9178_v25 = vld [vmem:[#allocation71_spill] sm:$0xff]  ;;  %v9181_v19 = vld [vmem:[#allocation73_spill] sm:$0xff] }
 0x275   :  { %v3445_v56 = vpop.f32.mrf.mxu0  ;;  %v4705_v1 = vmul.f32 %v7910_v33, %v4555_v37  ;;  %v3638_v50 = vpop.f32.mrf.mxu1 }
 0x276   :  { %v4706_v23 = vmul.f32 %v7906_v52, %v4556_v46  ;;  %v3446_v16 = vadd.f32 %v3445_v56, %v7643_v53  ;;  %v4559_v51 = vmax.f32 %v3635_v20, 0.0  ;;  %v3637_v57 = vadd.f32 %v3636_v31, %v3444_v26  ;;  %v9180_v53 = vld [vmem:[#allocation72_spill] sm:$0xff] }
 0x277   :  { %v3447_v27 = vpop.f32.mrf.mxu0  ;;  %v3640_v41 = vpop.f32.mrf.mxu1 }
 0x278   :  { %v3639_v10 = vadd.f32 %v3638_v50, %v3446_v16  ;;  %v3448_v7 = vadd.f32 %v3447_v27, %v7657_v30  ;;  %v7959_v28 = vadd.f32 %v4706_v23, %v4705_v1  ;;  %v4560_v17 = vmax.f32 %v3637_v57, 0.0 }
 0x279   :  { %v3451_v34 = vpop.f32.mrf.mxu0  ;;  %3916 = vmatmul.mubr.bf16.gmra.mxu0 %v9178_v25  ;;  %v3644_v39 = vpop.f32.mrf.mxu1  ;;  %4109 = vmatmul.mubr.bf16.gmra.mxu1 %v9179_v58  ;;  %v4709_v21 = vmul.f32 %v7910_v33, %v4559_v51 }
 0x27a   :  { %v3641_v32 = vadd.f32 %v3640_v41, %v3448_v7  ;;  %v3452_v37 = vadd.f32 %v3451_v34, %v7665_v0  ;;  %3925 = vmatprep.mubr.bf16.mxu0 %v9180_v53  ;;  %v4710_v63 = vmul.f32 %v7906_v52, %v4560_v17  ;;  %v4563_v30 = vmax.f32 %v3639_v10, 0.0  ;;  %4118 = vmatprep.mubr.bf16.mxu1 %v9181_v19 }
 0x27b   :  { %v3453_v46 = vpop.f32.mrf.mxu0  ;;  %v3646_v56 = vpop.f32.mrf.mxu1 }
 0x27c   :  { %v4564_v20 = vmax.f32 %v3641_v32, 0.0  ;;  %v3645_v31 = vadd.f32 %v3644_v39, %v3452_v37  ;;  %v3454_v26 = vadd.f32 %v3453_v46, %v7670_v9  ;;  %v7969_v1 = vadd.f32 %v4710_v63, %v4709_v21  ;;  %v9182_v32 = vld [vmem:[#allocation74_spill] sm:$0xff]  ;;  %v9183_v63 = vld [vmem:[#allocation75_spill] sm:$0xff] }
 0x27d   :  { %v3455_v0 = vpop.f32.mrf.mxu0  ;;  %v3648_v57 = vpop.f32.mrf.mxu1  ;;  %v4713_v27 = vmul.f32 %v7910_v33, %v4563_v30  ;;  %v9184_v30 = vld [vmem:[#allocation54_spill] sm:$0xff] }
 0x27e   :  { %v4714_v23 = vmul.f32 %v7906_v52, %v4564_v20  ;;  %v4567_v16 = vmax.f32 %v3645_v31, 0.0  ;;  %v3647_v50 = vadd.f32 %v3646_v56, %v3454_v26  ;;  %v3456_v51 = vadd.f32 %v3455_v0, %v7681_v12 }
 0x27f   :  { %v3457_v10 = vpop.f32.mrf.mxu0  ;;  %v3650_v34 = vpop.f32.mrf.mxu1 }
 0x280   :  { %v4568_v7 = vmax.f32 %v3647_v50, 0.0  ;;  %v3649_v41 = vadd.f32 %v3648_v57, %v3456_v51  ;;  %v3458_v17 = vadd.f32 %v3457_v10, %v7697_v24  ;;  %v4717_v9 = vmul.f32 %v7910_v33, %v4567_v16  ;;  %v9185_v24 = vld [vmem:[#allocation76_spill] sm:$0xff] }
 0x281   :  { %v3461_v25 = vpop.f32.mrf.mxu0  ;;  %3926 = vmatmul.mubr.bf16.gmra.mxu0 %v9182_v32  ;;  %v7977_v37 = vadd.f32 %v4714_v23, %v4713_v27  ;;  %v3654_v21 = vpop.f32.mrf.mxu1  ;;  %4119 = vmatmul.mubr.bf16.gmra.mxu1 %v9183_v63 }
 0x282   :  { %v4718_v39 = vmul.f32 %v7906_v52, %v4568_v7  ;;  %v4571_v58 = vmax.f32 %v3649_v41, 0.0  ;;  %v3651_v12 = vadd.f32 %v3650_v34, %v3458_v17  ;;  %v3462_v53 = vadd.f32 %v3461_v25, %v7705_v48  ;;  %3935 = vmatprep.mubr.bf16.mxu0 %v9184_v30  ;;  %4128 = vmatprep.mubr.bf16.mxu1 %v9185_v24 }
 0x283   :  { %v3463_v19 = vpop.f32.mrf.mxu0  ;;  %v3656_v26 = vpop.f32.mrf.mxu1 }
 0x284   :  { %v7984_v46 = vadd.f32 %v4718_v39, %v4717_v9  ;;  %v4572_v20 = vmax.f32 %v3651_v12, 0.0  ;;  %v3655_v31 = vadd.f32 %v3654_v21, %v3462_v53  ;;  %v3464_v56 = vadd.f32 %v3463_v19, %v7708_v62  ;;  %v9186_v62 = vld [vmem:[#allocation77_spill] sm:$0xff]  ;;  %v9189_v21 = vld [vmem:[#allocation80_spill] sm:$0xff] }
 0x285   :  { %v3465_v0 = vpop.f32.mrf.mxu0  ;;  %v4721_v23 = vmul.f32 %v7910_v33, %v4571_v58  ;;  %v3658_v50 = vpop.f32.mrf.mxu1  ;;  %v9187_v58 = vld [vmem:[#allocation78_spill] sm:$0xff] }
 0x286   :  { %v4722_v48 = vmul.f32 %v7906_v52, %v4572_v20  ;;  %v3466_v16 = vadd.f32 %v3465_v0, %v7719_v18  ;;  %v4575_v51 = vmax.f32 %v3655_v31, 0.0  ;;  %v3657_v57 = vadd.f32 %v3656_v26, %v3464_v56  ;;  %v9188_v18 = vld [vmem:[#allocation79_spill] sm:$0xff] }
 0x287   :  { %v3467_v27 = vpop.f32.mrf.mxu0  ;;  %v3660_v41 = vpop.f32.mrf.mxu1 }
 0x288   :  { %v3659_v10 = vadd.f32 %v3658_v50, %v3466_v16  ;;  %v3468_v7 = vadd.f32 %v3467_v27, %v7731_v14  ;;  %v7991_v17 = vadd.f32 %v4722_v48, %v4721_v23  ;;  %v4576_v34 = vmax.f32 %v3657_v57, 0.0 }
 0x289   :  { %v3471_v9 = vpop.f32.mrf.mxu0  ;;  %3936 = vmatmul.mubr.bf16.gmra.mxu0 %v9186_v62  ;;  %v3664_v39 = vpop.f32.mrf.mxu1  ;;  %4129 = vmatmul.mubr.bf16.gmra.mxu1 %v9187_v58  ;;  %v4725_v12 = vmul.f32 %v7910_v33, %v4575_v51  ;;  %v9192_v58 = vld [vmem:[#allocation83_spill] sm:$0xff] }
 0x28a   :  { %v3661_v25 = vadd.f32 %v3660_v41, %v3468_v7  ;;  %v3472_v32 = vadd.f32 %v3471_v9, %v7737_v59  ;;  %3945 = vmatprep.mubr.bf16.mxu0 %v9188_v18  ;;  %v4726_v53 = vmul.f32 %v7906_v52, %v4576_v34  ;;  %v4579_v14 = vmax.f32 %v3659_v10, 0.0  ;;  %4138 = vmatprep.mubr.bf16.mxu1 %v9189_v21  ;;  %v9190_v41 = vld [vmem:[#allocation81_spill] sm:$0xff] }
 0x28b   :  { %v3473_v63 = vpop.f32.mrf.mxu0  ;;  %v3666_v20 = vpop.f32.mrf.mxu1 }
 0x28c   :  { %v4580_v30 = vmax.f32 %v3661_v25, 0.0  ;;  %v3665_v24 = vadd.f32 %v3664_v39, %v3472_v32  ;;  %v3474_v19 = vadd.f32 %v3473_v63, %v7740_v42  ;;  %v8001_v31 = vadd.f32 %v4726_v53, %v4725_v12  ;;  %v9191_v39 = vld [vmem:[#allocation82_spill] sm:$0xff] }
 0x28d   :  { %v3475_v59 = vpop.f32.mrf.mxu0  ;;  %v3668_v48 = vpop.f32.mrf.mxu1  ;;  %v4729_v16 = vmul.f32 %v7910_v33, %v4579_v14 }
 0x28e   :  { %v4730_v26 = vmul.f32 %v7906_v52, %v4580_v30  ;;  %v4583_v56 = vmax.f32 %v3665_v24, 0.0  ;;  %v3667_v0 = vadd.f32 %v3666_v20, %v3474_v19  ;;  %v3476_v23 = vadd.f32 %v3475_v59, %v7747_v8 }
 0x28f   :  { %v3477_v50 = vpop.f32.mrf.mxu0  ;;  %v3670_v10 = vpop.f32.mrf.mxu1 }
 0x290   :  { %v4584_v51 = vmax.f32 %v3667_v0, 0.0  ;;  %v3669_v57 = vadd.f32 %v3668_v48, %v3476_v23  ;;  %v3478_v27 = vadd.f32 %v3477_v50, %v7751_v15  ;;  %v4733_v42 = vmul.f32 %v7910_v33, %v4583_v56  ;;  %v9193_v15 = vld [vmem:[#allocation84_spill] sm:$0xff] }
 0x291   :  { %v3481_v7 = vpop.f32.mrf.mxu0  ;;  %3946 = vmatmul.mubr.bf16.gmra.mxu0 %v9190_v41  ;;  %v8009_v34 = vadd.f32 %v4730_v26, %v4729_v16  ;;  %v3674_v32 = vpop.f32.mrf.mxu1  ;;  %4139 = vmatmul.mubr.bf16.gmra.mxu1 %v9191_v39 }
 0x292   :  { %v4734_v9 = vmul.f32 %v7906_v52, %v4584_v51  ;;  %v4587_v62 = vmax.f32 %v3669_v57, 0.0  ;;  %v3671_v8 = vadd.f32 %v3670_v10, %v3478_v27  ;;  %v3482_v25 = vadd.f32 %v3481_v7, %v7757_v60  ;;  %4181 = vmatprep.mubr.bf16.mxu0 %v9192_v58  ;;  %4374 = vmatprep.mubr.bf16.mxu1 %v9193_v15 }
 0x293   :  { %v3483_v18 = vpop.f32.mrf.mxu0  ;;  %v3676_v21 = vpop.f32.mrf.mxu1 }
 0x294   :  { %v8016_v12 = vadd.f32 %v4734_v9, %v4733_v42  ;;  %v4588_v53 = vmax.f32 %v3671_v8, 0.0  ;;  %v3675_v14 = vadd.f32 %v3674_v32, %v3482_v25  ;;  %v3484_v63 = vadd.f32 %v3483_v18, %v7760_v11  ;;  %v9195_v11 = vld [vmem:[#allocation85_spill] sm:$0xff]  ;;  %v9196_v42 = vld [vmem:[#allocation86_spill] sm:$0xff] }
 0x295   :  { %v3485_v30 = vpop.f32.mrf.mxu0  ;;  %v4737_v24 = vmul.f32 %v7910_v33, %v4587_v62  ;;  %v3678_v20 = vpop.f32.mrf.mxu1  ;;  %v9198_v9 = vld [vmem:[#allocation89_spill] sm:$0xff] }
 0x296   :  { %v4738_v60 = vmul.f32 %v7906_v52, %v4588_v53  ;;  %v3486_v19 = vadd.f32 %v3485_v30, %v7763_v3  ;;  %v4591_v59 = vmax.f32 %v3675_v14, 0.0  ;;  %v3677_v26 = vadd.f32 %v3676_v21, %v3484_v63  ;;  %v9197_v3 = vld [vmem:[#allocation87_spill] sm:$0xff] }
 0x297   :  { %v3487_v56 = vpop.f32.mrf.mxu0  ;;  %v3680_v48 = vpop.f32.mrf.mxu1 }
 0x298   :  { %v3679_v0 = vadd.f32 %v3678_v20, %v3486_v19  ;;  %v3488_v23 = vadd.f32 %v3487_v56, %v7767_v38  ;;  %v8023_v16 = vadd.f32 %v4738_v60, %v4737_v24  ;;  %v4592_v50 = vmax.f32 %v3677_v26, 0.0  ;;  %v9200_v26 = vld [vmem:[#allocation92_spill] sm:$0xff] }
 0x299   :  { %v3491_v51 = vpop.f32.mrf.mxu0  ;;  %4182 = vmatmul.mubr.bf16.vlgmr.msra.gmra.mxu0 %v9195_v11  ;;  %v3684_v10 = vpop.f32.mrf.mxu1  ;;  %4375 = vmatmul.mubr.bf16.vlgmr.msra.gmra.mxu1 %v9196_v42  ;;  %v4741_v7 = vmul.f32 %v7910_v33, %v4591_v59  ;;  %v9203_v11 = vld [vmem:[#allocation94_spill] sm:$0xff] }
 0x29a   :  { %9194 = vst [vmem:[#allocation42_spill] sm:$0xff] %v8023_v16  ;;  %v3681_v57 = vadd.f32 %v3680_v48, %v3488_v23  ;;  %v3492_v27 = vadd.f32 %v3491_v51, %v7773_v22  ;;  %4191 = vmatprep.mubr.bf16.mxu0 %v9197_v3  ;;  %v4742_v41 = vmul.f32 %v7906_v52, %v4592_v50  ;;  %v4595_v38 = vmax.f32 %v3679_v0, 0.0  ;;  %v9202_v51 = vld [vmem:[#allocation93_spill] sm:$0xff] }
 0x29b   :  { %4384 = vmatprep.mubr.bf16.mxu1 %v9198_v9  ;;  %v3493_v62 = vpop.f32.mrf.mxu0  ;;  %v3686_v39 = vpop.f32.mrf.mxu1 }
 0x29c   :  { %v4596_v8 = vmax.f32 %v3681_v57, 0.0  ;;  %v3685_v25 = vadd.f32 %v3684_v10, %v3492_v27  ;;  %v3494_v32 = vadd.f32 %v3493_v62, %v7776_v13  ;;  %v8033_v58 = vadd.f32 %v4742_v41, %v4741_v7 }
 0x29d   :  { %v3495_v22 = vpop.f32.mrf.mxu0  ;;  %v3688_v21 = vpop.f32.mrf.mxu1  ;;  %v4745_v63 = vmul.f32 %v7910_v33, %v4595_v38 }
 0x29e   :  { %9199 = vst [vmem:[#allocation43_spill] sm:$0xff] %v8033_v58  ;;  %v4746_v15 = vmul.f32 %v7906_v52, %v4596_v8  ;;  %v4599_v18 = vmax.f32 %v3685_v25, 0.0  ;;  %v3687_v53 = vadd.f32 %v3686_v39, %v3494_v32  ;;  %v3496_v14 = vadd.f32 %v3495_v22, %v7779_v2 }
 0x29f   :  { %v3497_v30 = vpop.f32.mrf.mxu0  ;;  %v3690_v20 = vpop.f32.mrf.mxu1 }
 0x2a0   :  { %v4600_v24 = vmax.f32 %v3687_v53, 0.0  ;;  %v3689_v60 = vadd.f32 %v3688_v21, %v3496_v14  ;;  %v3498_v19 = vadd.f32 %v3497_v30, %v7783_v61  ;;  %v4749_v13 = vmul.f32 %v7910_v33, %v4599_v18  ;;  %v9204_v61 = vld [vmem:[#allocation95_spill] sm:$0xff] }
 0x2a1   :  { %v3501_v59 = vpop.f32.mrf.mxu0  ;;  %4192 = vmatmul.mubr.bf16.gmra.mxu0 %v9200_v26  ;;  %v8041_v56 = vadd.f32 %v4746_v15, %v4745_v63  ;;  %v3694_v50 = vpop.f32.mrf.mxu1  ;;  %4385 = vmatmul.mubr.bf16.gmra.mxu1 %v9202_v51 }
 0x2a2   :  { %v4750_v0 = vmul.f32 %v7906_v52, %v4600_v24  ;;  %v4603_v23 = vmax.f32 %v3689_v60, 0.0  ;;  %v3691_v2 = vadd.f32 %v3690_v20, %v3498_v19  ;;  %v3502_v48 = vadd.f32 %v3501_v59, %v7789_v36  ;;  %4201 = vmatprep.mubr.bf16.mxu0 %v9203_v11  ;;  %4394 = vmatprep.mubr.bf16.mxu1 %v9204_v61  ;;  %v9208_v24 = vld [vmem:[#allocation70_spill] sm:$0xff]  ;;  %v9210_v20 = vld [vmem:[#allocation99_spill] sm:$0xff]  ;;  %v9212_v11 = vld [vmem:[#allocation16_spill] sm:$0xff] }
 0x2a3   :  { %9201 = vst [vmem:[#allocation45_spill] sm:$0xff] %v8041_v56  ;;  %v3503_v57 = vpop.f32.mrf.mxu0  ;;  %v3696_v3 = vpop.f32.mrf.mxu1 }
 0x2a4   :  { %v8048_v27 = vadd.f32 %v4750_v0, %v4749_v13  ;;  %v4604_v10 = vmax.f32 %v3691_v2, 0.0  ;;  %v3695_v42 = vadd.f32 %v3694_v50, %v3502_v48  ;;  %v3504_v7 = vadd.f32 %v3503_v57, %v7792_v54  ;;  %v9207_v54 = vld [vmem:[#allocation97_spill] sm:$0xff] }
 0x2a5   :  { %v3505_v41 = vpop.f32.mrf.mxu0  ;;  %v4753_v38 = vmul.f32 %v7910_v33, %v4603_v23  ;;  %v3698_v62 = vpop.f32.mrf.mxu1 }
 0x2a6   :  { %9205 = vst [vmem:[#allocation46_spill] sm:$0xff] %v8048_v27  ;;  %v4754_v36 = vmul.f32 %v7906_v52, %v4604_v10  ;;  %v3506_v9 = vadd.f32 %v3505_v41, %v7795_v49  ;;  %v4607_v8 = vmax.f32 %v3695_v42, 0.0  ;;  %v3697_v25 = vadd.f32 %v3696_v3, %v3504_v7  ;;  %v9209_v49 = vld [vmem:[#allocation98_spill] sm:$0xff] }
 0x2a7   :  { %v3507_v32 = vpop.f32.mrf.mxu0  ;;  %v3700_v15 = vpop.f32.mrf.mxu1  ;;  %v9213_v41 = vld [vmem:[#allocation18_spill] sm:$0xff] }
 0x2a8   :  { %v3699_v39 = vadd.f32 %v3698_v62, %v3506_v9  ;;  %v3508_v22 = vadd.f32 %v3507_v32, %v7799_v6  ;;  %v8055_v18 = vadd.f32 %v4754_v36, %v4753_v38  ;;  %v4608_v53 = vmax.f32 %v3697_v25, 0.0  ;;  %v9214_v62 = vld [vmem:[#allocation101_spill] sm:$0xff] }
 0x2a9   :  { %v3511_v14 = vpop.f32.mrf.mxu0  ;;  %4202 = vmatmul.mubr.bf16.gmra.mxu0 %v9207_v54  ;;  %v3704_v30 = vpop.f32.mrf.mxu1  ;;  %4395 = vmatmul.mubr.bf16.gmra.mxu1 %v9208_v24  ;;  %v4757_v60 = vmul.f32 %v7910_v33, %v4607_v8  ;;  %v9218_v54 = vld [vmem:[#allocation13_spill] sm:$0xff] }
 0x2aa   :  { %9206 = vst [vmem:[#allocation11_spill] sm:$0xff] %v8055_v18  ;;  %v3701_v21 = vadd.f32 %v3700_v15, %v3508_v22  ;;  %v3512_v63 = vadd.f32 %v3511_v14, %v7805_v35  ;;  %4211 = vmatprep.mubr.bf16.mxu0 %v9209_v49  ;;  %v4758_v19 = vmul.f32 %v7906_v52, %v4608_v53  ;;  %v4611_v6 = vmax.f32 %v3699_v39, 0.0  ;;  %v9216_v22 = vld [vmem:[#allocation22_spill] sm:$0xff] }
 0x2ab   :  { %4404 = vmatprep.mubr.bf16.mxu1 %v9210_v20  ;;  %v3513_v13 = vpop.f32.mrf.mxu0  ;;  %v3706_v23 = vpop.f32.mrf.mxu1  ;;  %v9217_v14 = vld [vmem:[#allocation102_spill] sm:$0xff] }
 0x2ac   :  { %v4612_v59 = vmax.f32 %v3701_v21, 0.0  ;;  %v3705_v26 = vadd.f32 %v3704_v30, %v3512_v63  ;;  %v3514_v0 = vadd.f32 %v3513_v13, %v7808_v40  ;;  %v8065_v2 = vadd.f32 %v4758_v19, %v4757_v60  ;;  %v9219_v21 = vld [vmem:[#allocation103_spill] sm:$0xff] }
 0x2ad   :  { %v3515_v35 = vpop.f32.mrf.mxu0  ;;  %v3708_v57 = vpop.f32.mrf.mxu1  ;;  %v4761_v10 = vmul.f32 %v7910_v33, %v4611_v6  ;;  %v9221_v19 = vld [vmem:[#allocation23_spill] sm:$0xff] }
 0x2ae   :  { %9211 = vst [vmem:[#allocation15_spill] sm:$0xff] %v8065_v2  ;;  %v4762_v48 = vmul.f32 %v7906_v52, %v4612_v59  ;;  %v4615_v50 = vmax.f32 %v3705_v26, 0.0  ;;  %v3707_v51 = vadd.f32 %v3706_v23, %v3514_v0  ;;  %v3516_v61 = vadd.f32 %v3515_v35, %v9212_v11  ;;  %v9222_v26 = vld [vmem:[#allocation24_spill] sm:$0xff]  ;;  %v9223_v11 = vld [vmem:[#allocation26_spill] sm:$0xff] }
 0x2af   :  { %v3517_v42 = vpop.f32.mrf.mxu0  ;;  %v3710_v36 = vpop.f32.mrf.mxu1 }
 0x2b0   :  { %v4616_v3 = vmax.f32 %v3707_v51, 0.0  ;;  %v3709_v7 = vadd.f32 %v3708_v57, %v3516_v61  ;;  %v3518_v38 = vadd.f32 %v3517_v42, %v9213_v41  ;;  %v4765_v40 = vmul.f32 %v7910_v33, %v4615_v50 }
 0x2b1   :  { %v3521_v9 = vpop.f32.mrf.mxu0  ;;  %4212 = vmatmul.mubr.bf16.gmra.mxu0 %v9214_v62  ;;  %v8073_v8 = vadd.f32 %v4762_v48, %v4761_v10  ;;  %v3714_v53 = vpop.f32.mrf.mxu1  ;;  %4405 = vmatmul.mubr.bf16.gmra.mxu1 %v9217_v14  ;;  %v9228_v62 = vld [vmem:[#allocation6_spill] sm:$0xff] }
 0x2b2   :  { %v4766_v25 = vmul.f32 %v7906_v52, %v4616_v3  ;;  %v4619_v32 = vmax.f32 %v3709_v7, 0.0  ;;  %v3711_v39 = vadd.f32 %v3710_v36, %v3518_v38  ;;  %v3522_v15 = vadd.f32 %v3521_v9, %v9216_v22  ;;  %4221 = vmatprep.mubr.bf16.mxu0 %v9218_v54  ;;  %4414 = vmatprep.mubr.bf16.mxu1 %v9219_v21  ;;  %v9225_v7 = vld [vmem:[#allocation105_spill] sm:$0xff]  ;;  %v9229_v22 = vld [vmem:[#allocation19_spill] sm:$0xff]  ;;  %v9230_v54 = vld [vmem:[#allocation30_spill] sm:$0xff] }
 0x2b3   :  { %9215 = vst [vmem:[#allocation48_spill] sm:$0xff] %v8073_v8  ;;  %v3523_v63 = vpop.f32.mrf.mxu0  ;;  %v3716_v60 = vpop.f32.mrf.mxu1  ;;  %v9226_v38 = vld [vmem:[#allocation29_spill] sm:$0xff]  ;;  %v9295_v8 = vld [vmem:[#allocation136_spill] sm:$0xff] }
 0x2b4   :  { %v8080_v30 = vadd.f32 %v4766_v25, %v4765_v40  ;;  %v4620_v24 = vmax.f32 %v3711_v39, 0.0  ;;  %v3715_v49 = vadd.f32 %v3714_v53, %v3522_v15  ;;  %v3524_v6 = vadd.f32 %v3523_v63, %v9221_v19  ;;  %v9227_v9 = vld [vmem:[#allocation21_spill] sm:$0xff] }
 0x2b5   :  { %v3525_v20 = vpop.f32.mrf.mxu0  ;;  %v4769_v13 = vmul.f32 %v7910_v33, %v4619_v32  ;;  %v3718_v23 = vpop.f32.mrf.mxu1 }
 0x2b6   :  { %9220 = vst [vmem:[#allocation50_spill] sm:$0xff] %v8080_v30  ;;  %v4770_v59 = vmul.f32 %v7906_v52, %v4620_v24  ;;  %v3526_v0 = vadd.f32 %v3525_v20, %v9222_v26  ;;  %v4623_v35 = vmax.f32 %v3715_v49, 0.0  ;;  %v3717_v48 = vadd.f32 %v3716_v60, %v3524_v6  ;;  %v9232_v20 = vld [vmem:[#allocation31_spill] sm:$0xff] }
 0x2b7   :  { %v3527_v50 = vpop.f32.mrf.mxu0  ;;  %v3720_v57 = vpop.f32.mrf.mxu1 }
 0x2b8   :  { %v3719_v51 = vadd.f32 %v3718_v23, %v3526_v0  ;;  %v3528_v61 = vadd.f32 %v3527_v50, %v9223_v11  ;;  %v8087_v10 = vadd.f32 %v4770_v59, %v4769_v13  ;;  %v4624_v42 = vmax.f32 %v3717_v48, 0.0  ;;  %v9233_v48 = vld [vmem:[#allocation32_spill] sm:$0xff] }
 0x2b9   :  { %v3531_v3 = vpop.f32.mrf.mxu0  ;;  %4222 = vmatmul.mubr.bf16.gmra.mxu0 %v9225_v7  ;;  %v3724_v40 = vpop.f32.mrf.mxu1  ;;  %4415 = vmatmul.mubr.bf16.gmra.mxu1 %v9227_v9  ;;  %v4773_v25 = vmul.f32 %v7910_v33, %v4623_v35  ;;  %v9237_v9 = vld [vmem:[#allocation109_spill] sm:$0xff] }
 0x2ba   :  { %9224 = vst [vmem:[#allocation51_spill] sm:$0xff] %v8087_v10  ;;  %v3721_v41 = vadd.f32 %v3720_v57, %v3528_v61  ;;  %v3532_v36 = vadd.f32 %v3531_v3, %v9226_v38  ;;  %4231 = vmatprep.mubr.bf16.mxu0 %v9228_v62  ;;  %v4774_v32 = vmul.f32 %v7906_v52, %v4624_v42  ;;  %v4627_v39 = vmax.f32 %v3719_v51, 0.0  ;;  %v9234_v57 = vld [vmem:[#allocation108_spill] sm:$0xff]  ;;  %v9236_v38 = vld [vmem:[#allocation33_spill] sm:$0xff]  ;;  %v9238_v62 = vld [vmem:[#allocation110_spill] sm:$0xff] }
 0x2bb   :  { %4424 = vmatprep.mubr.bf16.mxu1 %v9229_v22  ;;  %v3533_v15 = vpop.f32.mrf.mxu0  ;;  %v3726_v63 = vpop.f32.mrf.mxu1 }
 0x2bc   :  { %v4628_v53 = vmax.f32 %v3721_v41, 0.0  ;;  %v3725_v14 = vadd.f32 %v3724_v40, %v3532_v36  ;;  %v3534_v21 = vadd.f32 %v3533_v15, %v9230_v54  ;;  %v8097_v24 = vadd.f32 %v4774_v32, %v4773_v25  ;;  %v9239_v25 = vld [vmem:[#allocation111_spill] sm:$0xff] }
 0x2bd   :  { %v3535_v49 = vpop.f32.mrf.mxu0  ;;  %v3728_v59 = vpop.f32.mrf.mxu1  ;;  %v4777_v26 = vmul.f32 %v7910_v33, %v4627_v39 }
 0x2be   :  { %9231 = vst [vmem:[#allocation17_spill] sm:$0xff] %v8097_v24  ;;  %v4778_v60 = vmul.f32 %v7906_v52, %v4628_v53  ;;  %v4631_v19 = vmax.f32 %v3725_v14, 0.0  ;;  %v3727_v6 = vadd.f32 %v3726_v63, %v3534_v21  ;;  %v3536_v13 = vadd.f32 %v3535_v49, %v9232_v20  ;;  %v9241_v14 = vld [vmem:[#allocation34_spill] sm:$0xff] }
 0x2bf   :  { %v3537_v0 = vpop.f32.mrf.mxu0  ;;  %v3730_v51 = vpop.f32.mrf.mxu1 }
 0x2c0   :  { %v4632_v23 = vmax.f32 %v3727_v6, 0.0  ;;  %v3729_v35 = vadd.f32 %v3728_v59, %v3536_v13  ;;  %v3538_v50 = vadd.f32 %v3537_v0, %v9233_v48  ;;  %v4781_v11 = vmul.f32 %v7910_v33, %v4631_v19  ;;  %v9243_v0 = vld [vmem:[#allocation36_spill] sm:$0xff] }
 0x2c1   :  { %v3541_v61 = vpop.f32.mrf.mxu0  ;;  %4232 = vmatmul.mubr.bf16.gmra.mxu0 %v9234_v57  ;;  %v8105_v42 = vadd.f32 %v4778_v60, %v4777_v26  ;;  %v3734_v40 = vpop.f32.mrf.mxu1  ;;  %4425 = vmatmul.mubr.bf16.gmra.mxu1 %v9237_v9  ;;  %v9242_v60 = vld [vmem:[#allocation35_spill] sm:$0xff]  ;;  %v9246_v57 = vld [vmem:[#allocation37_spill] sm:$0xff] }
 0x2c2   :  { %v4782_v3 = vmul.f32 %v7906_v52, %v4632_v23  ;;  %v4635_v7 = vmax.f32 %v3729_v35, 0.0  ;;  %v3731_v41 = vadd.f32 %v3730_v51, %v3538_v50  ;;  %v3542_v36 = vadd.f32 %v3541_v61, %v9236_v38  ;;  %4241 = vmatprep.mubr.bf16.mxu0 %v9238_v62  ;;  %4434 = vmatprep.mubr.bf16.mxu1 %v9239_v25  ;;  %v9248_v38 = vld [vmem:[#allocation114_spill] sm:$0xff]  ;;  %v9249_v62 = vld [vmem:[#allocation115_spill] sm:$0xff] }
 0x2c3   :  { %9235 = vst [vmem:[#allocation52_spill] sm:$0xff] %v8105_v42  ;;  %v3543_v32 = vpop.f32.mrf.mxu0  ;;  %v3736_v53 = vpop.f32.mrf.mxu1  ;;  %v9291_v42 = vld [vmem:[#allocation121_spill] sm:$0xff] }
 0x2c4   :  { %v8112_v39 = vadd.f32 %v4782_v3, %v4781_v11  ;;  %v4636_v22 = vmax.f32 %v3731_v41, 0.0  ;;  %v3735_v15 = vadd.f32 %v3734_v40, %v3542_v36  ;;  %v3544_v54 = vadd.f32 %v3543_v32, %v9241_v14  ;;  %v9245_v11 = vld [vmem:[#allocation112_spill] sm:$0xff]  ;;  %v9247_v41 = vld [vmem:[#allocation113_spill] sm:$0xff] }
 0x2c5   :  { %v3545_v21 = vpop.f32.mrf.mxu0  ;;  %v4785_v63 = vmul.f32 %v7910_v33, %v4635_v7  ;;  %v3738_v6 = vpop.f32.mrf.mxu1 }
 0x2c6   :  { %9240 = vst [vmem:[#allocation53_spill] sm:$0xff] %v8112_v39  ;;  %v4786_v49 = vmul.f32 %v7906_v52, %v4636_v22  ;;  %v3546_v19 = vadd.f32 %v3545_v21, %v9242_v60  ;;  %v4639_v20 = vmax.f32 %v3735_v15, 0.0  ;;  %v3737_v13 = vadd.f32 %v3736_v53, %v3544_v54  ;;  %v9250_v15 = vld [vmem:[#allocation38_spill] sm:$0xff] }
 0x2c7   :  { %v3547_v59 = vpop.f32.mrf.mxu0  ;;  %v3740_v35 = vpop.f32.mrf.mxu1 }
 0x2c8   :  { %v3739_v26 = vadd.f32 %v3738_v6, %v3546_v19  ;;  %v3548_v23 = vadd.f32 %v3547_v59, %v9243_v0  ;;  %v8119_v48 = vadd.f32 %v4786_v49, %v4785_v63  ;;  %v4640_v50 = vmax.f32 %v3737_v13, 0.0  ;;  %v9252_v0 = vld [vmem:[#allocation39_spill] sm:$0xff] }
 0x2c9   :  { %v3551_v51 = vpop.f32.mrf.mxu0  ;;  %4242 = vmatmul.mubr.bf16.gmra.mxu0 %v9245_v11  ;;  %v3744_v7 = vpop.f32.mrf.mxu1  ;;  %4435 = vmatmul.mubr.bf16.gmra.mxu1 %v9247_v41  ;;  %v4789_v36 = vmul.f32 %v7910_v33, %v4639_v20  ;;  %v9253_v11 = vld [vmem:[#allocation91_spill] sm:$0xff] }
 0x2ca   :  { %9244 = vst [vmem:[#allocation25_spill] sm:$0xff] %v8119_v48  ;;  %v3741_v61 = vadd.f32 %v3740_v35, %v3548_v23  ;;  %v3552_v3 = vadd.f32 %v3551_v51, %v9246_v57  ;;  %4251 = vmatprep.mubr.bf16.mxu0 %v9248_v38  ;;  %v4790_v40 = vmul.f32 %v7906_v52, %v4640_v50  ;;  %v4643_v9 = vmax.f32 %v3739_v26, 0.0  ;;  %v9255_v38 = vld [vmem:[#allocation117_spill] sm:$0xff] }
 0x2cb   :  { %4444 = vmatprep.mubr.bf16.mxu1 %v9249_v62  ;;  %v3553_v25 = vpop.f32.mrf.mxu0  ;;  %v3746_v14 = vpop.f32.mrf.mxu1 }
 0x2cc   :  { %v4644_v32 = vmax.f32 %v3741_v61, 0.0  ;;  %v3745_v22 = vadd.f32 %v3744_v7, %v3552_v3  ;;  %v3554_v53 = vadd.f32 %v3553_v25, %v9250_v15  ;;  %v8129_v54 = vadd.f32 %v4790_v40, %v4789_v36  ;;  %v9256_v36 = vld [vmem:[#allocation118_spill] sm:$0xff]  ;;  %v9257_v40 = vld [vmem:[#allocation119_spill] sm:$0xff] }
 0x2cd   :  { %v3555_v21 = vpop.f32.mrf.mxu0  ;;  %v3748_v6 = vpop.f32.mrf.mxu1  ;;  %v4793_v20 = vmul.f32 %v7910_v33, %v4643_v9 }
 0x2ce   :  { %9251 = vst [vmem:[#allocation55_spill] sm:$0xff] %v8129_v54  ;;  %v4794_v63 = vmul.f32 %v7906_v52, %v4644_v32  ;;  %v4647_v49 = vmax.f32 %v3745_v22, 0.0  ;;  %v3747_v60 = vadd.f32 %v3746_v14, %v3554_v53  ;;  %v3556_v19 = vadd.f32 %v3555_v21, %v7875_v44  ;;  %v9259_v21 = vld [vmem:[#allocation40_spill] sm:$0xff] }
 0x2cf   :  { %v3557_v13 = vpop.f32.mrf.mxu0  ;;  %v3750_v35 = vpop.f32.mrf.mxu1 }
 0x2d0   :  { %v4648_v59 = vmax.f32 %v3747_v60, 0.0  ;;  %v3749_v26 = vadd.f32 %v3748_v6, %v3556_v19  ;;  %v3558_v23 = vadd.f32 %v3557_v13, %v9252_v0  ;;  %v4797_v50 = vmul.f32 %v7910_v33, %v4647_v49  ;;  %v5770_v60 = vld [vmem:[%s8730_s4] sm:$0xf]  ;;  %v9260_v19 = vld [vmem:[#allocation12_spill] sm:$0xff] }
 0x2d1   :  { %v3561_v51 = vpop.f32.mrf.mxu0  ;;  %4252 = vmatmul.mubr.bf16.gmra.mxu0 %v9253_v11  ;;  %v8137_v61 = vadd.f32 %v4794_v63, %v4793_v20  ;;  %v3754_v41 = vpop.f32.mrf.mxu1  ;;  %4445 = vmatmul.mubr.bf16.gmra.mxu1 %v9255_v38  ;;  %v8154_v6 = vrot.slane %v5770_v60, %v9260_v19 }
 0x2d2   :  { %v4798_v57 = vmul.f32 %v7906_v52, %v4648_v59  ;;  %v4651_v3 = vmax.f32 %v3749_v26, 0.0  ;;  %v3751_v44 = vadd.f32 %v3750_v35, %v3558_v23  ;;  %v3562_v7 = vadd.f32 %v3561_v51, %v7885_v47  ;;  %4261 = vmatprep.mubr.bf16.mxu0 %v9256_v36  ;;  %4454 = vmatprep.mubr.bf16.mxu1 %v9257_v40  ;;  %v9262_v35 = vld [vmem:[#allocation9_spill] sm:$0xff]  ;;  %v9265_v36 = vld [vmem:[#allocation122_spill] sm:$0xff]  ;;  %v9266_v40 = vld [vmem:[#allocation123_spill] sm:$0xff] }
 0x2d3   :  { %9254 = vst [vmem:[#allocation27_spill] sm:$0xff] %v8137_v61  ;;  %v3563_v9 = vpop.f32.mrf.mxu0  ;;  %v3756_v22 = vpop.f32.mrf.mxu1  ;;  %v9287_v61 = vld [vmem:[#allocation133_spill] sm:$0xff] }
 0x2d4   :  { %v8144_v62 = vadd.f32 %v4798_v57, %v4797_v50  ;;  %v4652_v25 = vmax.f32 %v3751_v44, 0.0  ;;  %v3755_v32 = vadd.f32 %v3754_v41, %v3562_v7  ;;  %v3564_v15 = vadd.f32 %v3563_v9, %v7888_v4  ;;  %v9261_v4 = vld [vmem:[#allocation41_spill] sm:$0xff] }
 0x2d5   :  { %v3565_v53 = vpop.f32.mrf.mxu0  ;;  %v4801_v14 = vmul.f32 %v7910_v33, %v4651_v3  ;;  %v3758_v49 = vpop.f32.mrf.mxu1  ;;  %v8158_v50 = vrot.slane %v5770_v60, %v9262_v35  ;;  %v9264_v3 = vld [vmem:[#allocation7_spill] sm:$0xff] }
 0x2d6   :  { %9258 = vst [vmem:[#allocation57_spill] sm:$0xff] %v8144_v62  ;;  %v4802_v47 = vmul.f32 %v7906_v52, %v4652_v25  ;;  %v3566_v63 = vadd.f32 %v3565_v53, %v9259_v21  ;;  %v4655_v20 = vmax.f32 %v3755_v32, 0.0  ;;  %v3757_v13 = vadd.f32 %v3756_v22, %v3564_v15  ;;  %v9267_v32 = vld [vmem:[#allocation96_spill] sm:$0xff] }
 0x2d7   :  { %v3567_v59 = vpop.f32.mrf.mxu0  ;;  %v3760_v23 = vpop.f32.mrf.mxu1 }
 0x2d8   :  { %v3759_v26 = vadd.f32 %v3758_v49, %v3566_v63  ;;  %v3568_v0 = vadd.f32 %v3567_v59, %v9261_v4  ;;  %v8160_v51 = vadd.f32 %v4802_v47, %v4801_v14  ;;  %v4656_v11 = vmax.f32 %v3757_v13, 0.0 }
 0x2d9   :  { %v3797_v57 = vpop.f32.mrf.mxu0  ;;  %4262 = vmatmul.mubr.bf16.gmra.mxu0 %v9264_v3  ;;  %v3990_v38 = vpop.f32.mrf.mxu1  ;;  %4455 = vmatmul.mubr.bf16.gmra.mxu1 %v9265_v36  ;;  %v4805_v9 = vmul.f32 %v7910_v33, %v4655_v20  ;;  %v9270_v3 = vld [vmem:[#allocation124_spill] sm:$0xff] }
 0x2da   :  { %9263 = vst [vmem:[#allocation58_spill] sm:$0xff] %v8160_v51  ;;  %v4659_v44 = vmax.f32 %v3759_v26, 0.0  ;;  %v3761_v7 = vadd.f32 %v3760_v23, %v3568_v0  ;;  %v3798_v41 = vadd.f32 %v3797_v57, %v8154_v6  ;;  %4271 = vmatprep.mubr.bf16.mxu0 %v9266_v40  ;;  %v4806_v25 = vmul.f32 %v7906_v52, %v4656_v11 }
 0x2db   :  { %4464 = vmatprep.mubr.bf16.mxu1 %v9267_v32  ;;  %v3799_v22 = vpop.f32.mrf.mxu0  ;;  %v3992_v47 = vpop.f32.mrf.mxu1 }
 0x2dc   :  { %v4660_v15 = vmax.f32 %v3761_v7, 0.0  ;;  %v8169_v53 = vadd.f32 %v3990_v38, %v3798_v41  ;;  %v3800_v14 = vadd.f32 %v3799_v22, %v8158_v50  ;;  %v8172_v21 = vadd.f32 %v4806_v25, %v4805_v9  ;;  %v9272_v41 = vld [vmem:[#allocation8_spill] sm:$0xff] }
 0x2dd   :  { %v3801_v63 = vpop.f32.mrf.mxu0  ;;  %v4809_v49 = vmul.f32 %v7910_v33, %v4659_v44  ;;  %v3994_v59 = vpop.f32.mrf.mxu1  ;;  %v9271_v44 = vld [vmem:[#allocation125_spill] sm:$0xff]  ;;  %v9273_v38 = vld [vmem:[#allocation100_spill] sm:$0xff] }
 0x2de   :  { %9268 = vst [vmem:[#allocation59_spill] sm:$0xff] %v8172_v21  ;;  %v4810_v60 = vmul.f32 %v7906_v52, %v4660_v15  ;;  %v8176_v13 = vadd.f32 %v3992_v47, %v3800_v14  ;;  %v3802_v20 = vadd.f32 %v3801_v63, %v8154_v6 }
 0x2df   :  { %v3803_v26 = vpop.f32.mrf.mxu0  ;;  %v3996_v23 = vpop.f32.mrf.mxu1 }
 0x2e0   :  { %v8179_v4 = vadd.f32 %v3994_v59, %v3802_v20  ;;  %v3804_v0 = vadd.f32 %v3803_v26, %v8158_v50  ;;  %v8182_v11 = vadd.f32 %v4810_v60, %v4809_v49  ;;  %v9274_v59 = vld [vmem:[#allocation104_spill] sm:$0xff] }
 0x2e1   :  { %v3807_v57 = vpop.f32.mrf.mxu0  ;;  %4272 = vmatmul.mubr.bf16.gmra.mxu0 %v9270_v3  ;;  %v4000_v33 = vpop.f32.mrf.mxu1  ;;  %4465 = vmatmul.mubr.bf16.gmra.mxu1 %v9271_v44  ;;  %v9276_v3 = vld [vmem:[#allocation28_spill] sm:$0xff] }
 0x2e2   :  { %9269 = vst [vmem:[#allocation60_spill] sm:$0xff] %v8182_v11  ;;  %v8185_v7 = vadd.f32 %v3996_v23, %v3804_v0  ;;  %v3808_v52 = vadd.f32 %v3807_v57, %v8154_v6  ;;  %4281 = vmatprep.mubr.bf16.mxu0 %v9272_v41  ;;  %4474 = vmatprep.mubr.bf16.mxu1 %v9273_v38  ;;  %v9275_v57 = vld [vmem:[#allocation126_spill] sm:$0xff] }
 0x2e3   :  { %v3809_v36 = vpop.f32.mrf.mxu0  ;;  %v4002_v25 = vpop.f32.mrf.mxu1  ;;  %v9283_v11 = vld [vmem:[#allocation130_spill] sm:$0xff] }
 0x2e4   :  { %v8191_v40 = vadd.f32 %v4000_v33, %v3808_v52  ;;  %v3810_v9 = vadd.f32 %v3809_v36, %v8158_v50  ;;  %v9277_v52 = vld [vmem:[#allocation106_spill] sm:$0xff] }
 0x2e5   :  { %v3811_v32 = vpop.f32.mrf.mxu0  ;;  %v4004_v14 = vpop.f32.mrf.mxu1 }
 0x2e6   :  { %v8194_v22 = vadd.f32 %v4002_v25, %v3810_v9  ;;  %v3812_v15 = vadd.f32 %v3811_v32, %v8154_v6 }
 0x2e7   :  { %v3813_v47 = vpop.f32.mrf.mxu0  ;;  %v4006_v60 = vpop.f32.mrf.mxu1 }
 0x2e8   :  { %v8197_v63 = vadd.f32 %v4004_v14, %v3812_v15  ;;  %v3814_v49 = vadd.f32 %v3813_v47, %v8158_v50 }
 0x2e9   :  { %v3817_v20 = vpop.f32.mrf.mxu0  ;;  %4282 = vmatmul.mubr.bf16.gmra.mxu0 %v9274_v59  ;;  %v4010_v23 = vpop.f32.mrf.mxu1  ;;  %4475 = vmatmul.mubr.bf16.gmra.mxu1 %v9275_v57  ;;  %v9279_v57 = vld [vmem:[#allocation127_spill] sm:$0xff] }
 0x2ea   :  { %v8201_v26 = vadd.f32 %v4006_v60, %v3814_v49  ;;  %v3818_v0 = vadd.f32 %v3817_v20, %v8154_v6  ;;  %4291 = vmatprep.mubr.bf16.mxu0 %v9276_v3  ;;  %4484 = vmatprep.mubr.bf16.mxu1 %v9277_v52  ;;  %v9278_v20 = vld [vmem:[#allocation49_spill] sm:$0xff]  ;;  %v9280_v3 = vld [vmem:[#allocation128_spill] sm:$0xff]  ;;  %v9281_v52 = vld [vmem:[#allocation107_spill] sm:$0xff] }
 0x2eb   :  { %v3819_v33 = vpop.f32.mrf.mxu0  ;;  %v4012_v38 = vpop.f32.mrf.mxu1 }
 0x2ec   :  { %v8207_v44 = vadd.f32 %v4010_v23, %v3818_v0  ;;  %v3820_v41 = vadd.f32 %v3819_v33, %v8158_v50 }
 0x2ed   :  { %v3821_v36 = vpop.f32.mrf.mxu0  ;;  %v4014_v32 = vpop.f32.mrf.mxu1 }
 0x2ee   :  { %v8210_v9 = vadd.f32 %v4012_v38, %v3820_v41  ;;  %v3822_v25 = vadd.f32 %v3821_v36, %v8154_v6 }
 0x2ef   :  { %v3823_v15 = vpop.f32.mrf.mxu0  ;;  %v4016_v49 = vpop.f32.mrf.mxu1 }
 0x2f0   :  { %v8213_v14 = vadd.f32 %v4014_v32, %v3822_v25  ;;  %v3824_v47 = vadd.f32 %v3823_v15, %v8158_v50 }
 0x2f1   :  { %v3827_v60 = vpop.f32.mrf.mxu0  ;;  %4292 = vmatmul.mubr.bf16.gmra.mxu0 %v9278_v20  ;;  %v4020_v23 = vpop.f32.mrf.mxu1  ;;  %4485 = vmatmul.mubr.bf16.gmra.mxu1 %v9279_v57 }
 0x2f2   :  { %v8217_v59 = vadd.f32 %v4016_v49, %v3824_v47  ;;  %v3828_v0 = vadd.f32 %v3827_v60, %v8154_v6  ;;  %4301 = vmatprep.mubr.bf16.mxu0 %v9280_v3  ;;  %4494 = vmatprep.mubr.bf16.mxu1 %v9281_v52  ;;  %v9282_v52 = vld [vmem:[#allocation129_spill] sm:$0xff] }
 0x2f3   :  { %v3829_v33 = vpop.f32.mrf.mxu0  ;;  %v4022_v36 = vpop.f32.mrf.mxu1 }
 0x2f4   :  { %v8223_v41 = vadd.f32 %v4020_v23, %v3828_v0  ;;  %v3830_v38 = vadd.f32 %v3829_v33, %v8158_v50 }
 0x2f5   :  { %v3831_v25 = vpop.f32.mrf.mxu0  ;;  %v4024_v47 = vpop.f32.mrf.mxu1 }
 0x2f6   :  { %v8226_v32 = vadd.f32 %v4022_v36, %v3830_v38  ;;  %v3832_v15 = vadd.f32 %v3831_v25, %v8154_v6  ;;  %v9284_v38 = vld [vmem:[#allocation131_spill] sm:$0xff]  ;;  %v9285_v36 = vld [vmem:[#allocation56_spill] sm:$0xff] }
 0x2f7   :  { %v3833_v49 = vpop.f32.mrf.mxu0  ;;  %v4026_v57 = vpop.f32.mrf.mxu1 }
 0x2f8   :  { %v8229_v60 = vadd.f32 %v4024_v47, %v3832_v15  ;;  %v3834_v20 = vadd.f32 %v3833_v49, %v8158_v50 }
 0x2f9   :  { %v3837_v3 = vpop.f32.mrf.mxu0  ;;  %4302 = vmatmul.mubr.bf16.gmra.mxu0 %v9282_v52  ;;  %v4030_v33 = vpop.f32.mrf.mxu1  ;;  %4495 = vmatmul.mubr.bf16.gmra.mxu1 %v9283_v11 }
 0x2fa   :  { %v8233_v0 = vadd.f32 %v4026_v57, %v3834_v20  ;;  %v3838_v23 = vadd.f32 %v3837_v3, %v8154_v6  ;;  %4311 = vmatprep.mubr.bf16.mxu0 %v9284_v38  ;;  %4504 = vmatprep.mubr.bf16.mxu1 %v9285_v36  ;;  %v9286_v36 = vld [vmem:[#allocation132_spill] sm:$0xff] }
 0x2fb   :  { %v3839_v25 = vpop.f32.mrf.mxu0  ;;  %v4032_v49 = vpop.f32.mrf.mxu1 }
 0x2fc   :  { %v8239_v15 = vadd.f32 %v4030_v33, %v3838_v23  ;;  %v3840_v47 = vadd.f32 %v3839_v25, %v8158_v50 }
 0x2fd   :  { %v3841_v21 = vpop.f32.mrf.mxu0  ;;  %v4034_v57 = vpop.f32.mrf.mxu1 }
 0x2fe   :  { %v8242_v51 = vadd.f32 %v4032_v49, %v3840_v47  ;;  %v3842_v20 = vadd.f32 %v3841_v21, %v8154_v6  ;;  %v9288_v47 = vld [vmem:[#allocation134_spill] sm:$0xff]  ;;  %v9289_v21 = vld [vmem:[#allocation116_spill] sm:$0xff] }
 0x2ff   :  { %v3843_v3 = vpop.f32.mrf.mxu0  ;;  %v4036_v38 = vpop.f32.mrf.mxu1 }
 0x300   :  { %v8245_v52 = vadd.f32 %v4034_v57, %v3842_v20  ;;  %v3844_v11 = vadd.f32 %v3843_v3, %v8158_v50 }
 0x301   :  { %v3847_v62 = vpop.f32.mrf.mxu0  ;;  %4312 = vmatmul.mubr.bf16.gmra.mxu0 %v9286_v36  ;;  %v4040_v25 = vpop.f32.mrf.mxu1  ;;  %4505 = vmatmul.mubr.bf16.gmra.mxu1 %v9287_v61 }
 0x302   :  { %v8249_v23 = vadd.f32 %v4036_v38, %v3844_v11  ;;  %v3848_v33 = vadd.f32 %v3847_v62, %v8154_v6  ;;  %4321 = vmatprep.mubr.bf16.mxu0 %v9288_v47  ;;  %4514 = vmatprep.mubr.bf16.mxu1 %v9289_v21  ;;  %v9290_v21 = vld [vmem:[#allocation120_spill] sm:$0xff] }
 0x303   :  { %v3849_v49 = vpop.f32.mrf.mxu0  ;;  %v4042_v3 = vpop.f32.mrf.mxu1 }
 0x304   :  { %v8255_v20 = vadd.f32 %v4040_v25, %v3848_v33  ;;  %v3850_v57 = vadd.f32 %v3849_v49, %v8158_v50 }
 0x305   :  { %v3851_v54 = vpop.f32.mrf.mxu0  ;;  %v4044_v38 = vpop.f32.mrf.mxu1 }
 0x306   :  { %v8258_v48 = vadd.f32 %v4042_v3, %v3850_v57  ;;  %v3852_v11 = vadd.f32 %v3851_v54, %v8154_v6  ;;  %v9292_v57 = vld [vmem:[#allocation135_spill] sm:$0xff]  ;;  %v9293_v54 = vld [vmem:[#allocation88_spill] sm:$0xff] }
 0x307   :  { %v3853_v62 = vpop.f32.mrf.mxu0  ;;  %v4046_v47 = vpop.f32.mrf.mxu1 }
 0x308   :  { %v8261_v36 = vadd.f32 %v4044_v38, %v3852_v11  ;;  %v3854_v61 = vadd.f32 %v3853_v62, %v8158_v50 }
 0x309   :  { %v3857_v39 = vpop.f32.mrf.mxu0  ;;  %4322 = vmatmul.mubr.bf16.gmra.mxu0 %v9290_v21  ;;  %v4050_v49 = vpop.f32.mrf.mxu1  ;;  %4515 = vmatmul.mubr.bf16.gmra.mxu1 %v9291_v42 }
 0x30a   :  { %v8265_v33 = vadd.f32 %v4046_v47, %v3854_v61  ;;  %v3858_v25 = vadd.f32 %v3857_v39, %v8154_v6  ;;  %4331 = vmatprep.mubr.bf16.mxu0 %v9292_v57  ;;  %4524 = vmatprep.mubr.bf16.mxu1 %v9293_v54  ;;  %v9294_v54 = vld [vmem:[#allocation90_spill] sm:$0xff] }
 0x30b   :  { %v3859_v3 = vpop.f32.mrf.mxu0  ;;  %v4052_v62 = vpop.f32.mrf.mxu1 }
 0x30c   :  { %v8271_v11 = vadd.f32 %v4050_v49, %v3858_v25  ;;  %v3860_v38 = vadd.f32 %v3859_v3, %v8158_v50 }
 0x30d   :  { %v3861_v24 = vpop.f32.mrf.mxu0  ;;  %v4054_v47 = vpop.f32.mrf.mxu1 }
 0x30e   :  { %v8274_v10 = vadd.f32 %v4052_v62, %v3860_v38  ;;  %v3862_v61 = vadd.f32 %v3861_v24, %v8154_v6 }
 0x30f   :  { %v3863_v39 = vpop.f32.mrf.mxu0  ;;  %v4056_v57 = vpop.f32.mrf.mxu1 }
 0x310   :  { %v8277_v21 = vadd.f32 %v4054_v47, %v3862_v61  ;;  %v3864_v42 = vadd.f32 %v3863_v39, %v8158_v50 }
 0x311   :  { %v3867_v30 = vpop.f32.mrf.mxu0  ;;  %4332 = vmatmul.mubr.bf16.gmra.mxu0 %v9294_v54  ;;  %v4060_v3 = vpop.f32.mrf.mxu1  ;;  %4525 = vmatmul.mubr.bf16.gmra.mxu1 %v9295_v8 }
 0x312   :  { %v8281_v25 = vadd.f32 %v4056_v57, %v3864_v42  ;;  %v3868_v49 = vadd.f32 %v3867_v30, %v8154_v6 }
 0x313   :  { %v3869_v38 = vpop.f32.mrf.mxu0  ;;  %v4062_v61 = vpop.f32.mrf.mxu1 }
 0x314   :  { %v8285_v62 = vadd.f32 %v4060_v3, %v3868_v49  ;;  %v3870_v24 = vadd.f32 %v3869_v38, %v8158_v50 }
 0x315   :  { %v3871_v47 = vpop.f32.mrf.mxu0  ;;  %v4064_v18 = vpop.f32.mrf.mxu1 }
 0x316   :  { %v8288_v2 = vadd.f32 %v4062_v61, %v3870_v24  ;;  %v3872_v39 = vadd.f32 %v3871_v47, %v8154_v6 }
 0x317   :  { %v3873_v54 = vpop.f32.mrf.mxu0  ;;  %v4066_v57 = vpop.f32.mrf.mxu1 }
 0x318   :  { %v8291_v42 = vadd.f32 %v4064_v18, %v3872_v39  ;;  %v3874_v30 = vadd.f32 %v3873_v54, %v8158_v50 }
 0x319   :  { %v3877_v27 = vpop.f32.mrf.mxu0  ;;  %v4070_v3 = vpop.f32.mrf.mxu1 }
 0x31a   :  { %v8294_v8 = vadd.f32 %v4066_v57, %v3874_v30  ;;  %v3878_v49 = vadd.f32 %v3877_v27, %v8154_v6 }
 0x31b   :  { %v3879_v38 = vpop.f32.mrf.mxu0  ;;  %v4072_v61 = vpop.f32.mrf.mxu1 }
 0x31c   :  { %9296 = vst [vmem:[#allocation10_spill] sm:$0xff] %v8294_v8  ;;  %v8297_v56 = vadd.f32 %v4070_v3, %v3878_v49  ;;  %v3880_v24 = vadd.f32 %v3879_v38, %v8158_v50 }
 0x31d   :  { %v3881_v47 = vpop.f32.mrf.mxu0  ;;  %v4074_v39 = vpop.f32.mrf.mxu1 }
 0x31e   :  { %9297 = vst [vmem:[#allocation61_spill] sm:$0xff] %v8297_v56  ;;  %v8300_v58 = vadd.f32 %v4072_v61, %v3880_v24  ;;  %v3882_v18 = vadd.f32 %v3881_v47, %v8154_v6 }
 0x31f   :  { %v3883_v54 = vpop.f32.mrf.mxu0  ;;  %v4076_v57 = vpop.f32.mrf.mxu1 }
 0x320   :  { %9298 = vst [vmem:[#allocation62_spill] sm:$0xff] %v8300_v58  ;;  %v8303_v16 = vadd.f32 %v4074_v39, %v3882_v18  ;;  %v3884_v30 = vadd.f32 %v3883_v54, %v8158_v50 }
 0x321   :  { %v3887_v27 = vpop.f32.mrf.mxu0  ;;  %v4080_v3 = vpop.f32.mrf.mxu1 }
 0x322   :  { %9299 = vst [vmem:[#allocation63_spill] sm:$0xff] %v8303_v16  ;;  %v8306_v8 = vadd.f32 %v4076_v57, %v3884_v30  ;;  %v3888_v49 = vadd.f32 %v3887_v27, %v8154_v6 }
 0x323   :  { %v3889_v38 = vpop.f32.mrf.mxu0  ;;  %v4082_v61 = vpop.f32.mrf.mxu1 }
 0x324   :  { %9300 = vst [vmem:[#allocation64_spill] sm:$0xff] %v8306_v8  ;;  %v8309_v56 = vadd.f32 %v4080_v3, %v3888_v49  ;;  %v3890_v24 = vadd.f32 %v3889_v38, %v8158_v50 }
 0x325   :  { %v3891_v47 = vpop.f32.mrf.mxu0  ;;  %v4084_v39 = vpop.f32.mrf.mxu1 }
 0x326   :  { %9301 = vst [vmem:[#allocation65_spill] sm:$0xff] %v8309_v56  ;;  %v8312_v58 = vadd.f32 %v4082_v61, %v3890_v24  ;;  %v3892_v18 = vadd.f32 %v3891_v47, %v8154_v6 }
 0x327   :  { %v3893_v54 = vpop.f32.mrf.mxu0  ;;  %v4086_v57 = vpop.f32.mrf.mxu1 }
 0x328   :  { %9302 = vst [vmem:[#allocation66_spill] sm:$0xff] %v8312_v58  ;;  %v8315_v16 = vadd.f32 %v4084_v39, %v3892_v18  ;;  %v3894_v30 = vadd.f32 %v3893_v54, %v8158_v50 }
 0x329   :  { %v3897_v27 = vpop.f32.mrf.mxu0  ;;  %v4090_v3 = vpop.f32.mrf.mxu1 }
 0x32a   :  { %9303 = vst [vmem:[#allocation67_spill] sm:$0xff] %v8315_v16  ;;  %v8318_v8 = vadd.f32 %v4086_v57, %v3894_v30  ;;  %v3898_v49 = vadd.f32 %v3897_v27, %v8154_v6 }
 0x32b   :  { %v3899_v38 = vpop.f32.mrf.mxu0  ;;  %v4092_v61 = vpop.f32.mrf.mxu1 }
 0x32c   :  { %9304 = vst [vmem:[#allocation68_spill] sm:$0xff] %v8318_v8  ;;  %v8321_v56 = vadd.f32 %v4090_v3, %v3898_v49  ;;  %v3900_v24 = vadd.f32 %v3899_v38, %v8158_v50 }
 0x32d   :  { %v3901_v47 = vpop.f32.mrf.mxu0  ;;  %v4094_v39 = vpop.f32.mrf.mxu1 }
 0x32e   :  { %9305 = vst [vmem:[#allocation14_spill] sm:$0xff] %v8321_v56  ;;  %v8324_v58 = vadd.f32 %v4092_v61, %v3900_v24  ;;  %v3902_v18 = vadd.f32 %v3901_v47, %v8154_v6 }
 0x32f   :  { %v3903_v54 = vpop.f32.mrf.mxu0  ;;  %v4096_v57 = vpop.f32.mrf.mxu1 }
 0x330   :  { %9306 = vst [vmem:[#allocation69_spill] sm:$0xff] %v8324_v58  ;;  %v8327_v16 = vadd.f32 %v4094_v39, %v3902_v18  ;;  %v3904_v30 = vadd.f32 %v3903_v54, %v8158_v50 }
 0x331   :  { %v3907_v27 = vpop.f32.mrf.mxu0  ;;  %v4100_v3 = vpop.f32.mrf.mxu1 }
 0x332   :  { %9307 = vst [vmem:[#allocation47_spill] sm:$0xff] %v8327_v16  ;;  %v8330_v8 = vadd.f32 %v4096_v57, %v3904_v30  ;;  %v3908_v49 = vadd.f32 %v3907_v27, %v8154_v6 }
 0x333   :  { %v3909_v38 = vpop.f32.mrf.mxu0  ;;  %v4102_v61 = vpop.f32.mrf.mxu1 }
 0x334   :  { %9308 = vst [vmem:[#allocation44_spill] sm:$0xff] %v8330_v8  ;;  %v8333_v56 = vadd.f32 %v4100_v3, %v3908_v49  ;;  %v3910_v24 = vadd.f32 %v3909_v38, %v8158_v50 }
 0x335   :  { %v3911_v47 = vpop.f32.mrf.mxu0  ;;  %v4104_v39 = vpop.f32.mrf.mxu1 }
 0x336   :  { %9309 = vst [vmem:[#allocation71_spill] sm:$0xff] %v8333_v56  ;;  %v8336_v58 = vadd.f32 %v4102_v61, %v3910_v24  ;;  %v3912_v18 = vadd.f32 %v3911_v47, %v8154_v6 }
 0x337   :  { %v3913_v54 = vpop.f32.mrf.mxu0  ;;  %v4106_v57 = vpop.f32.mrf.mxu1 }
 0x338   :  { %9310 = vst [vmem:[#allocation20_spill] sm:$0xff] %v8336_v58  ;;  %v8339_v16 = vadd.f32 %v4104_v39, %v3912_v18  ;;  %v3914_v30 = vadd.f32 %v3913_v54, %v8158_v50 }
 0x339   :  { %v3917_v27 = vpop.f32.mrf.mxu0  ;;  %v4110_v3 = vpop.f32.mrf.mxu1 }
 0x33a   :  { %9311 = vst [vmem:[#allocation72_spill] sm:$0xff] %v8339_v16  ;;  %v8342_v8 = vadd.f32 %v4106_v57, %v3914_v30  ;;  %v3918_v49 = vadd.f32 %v3917_v27, %v8154_v6 }
 0x33b   :  { %v3919_v38 = vpop.f32.mrf.mxu0  ;;  %v4112_v61 = vpop.f32.mrf.mxu1 }
 0x33c   :  { %9312 = vst [vmem:[#allocation73_spill] sm:$0xff] %v8342_v8  ;;  %v8345_v56 = vadd.f32 %v4110_v3, %v3918_v49  ;;  %v3920_v24 = vadd.f32 %v3919_v38, %v8158_v50 }
 0x33d   :  { %v3921_v47 = vpop.f32.mrf.mxu0  ;;  %v4114_v39 = vpop.f32.mrf.mxu1 }
 0x33e   :  { %9313 = vst [vmem:[#allocation74_spill] sm:$0xff] %v8345_v56  ;;  %v8348_v58 = vadd.f32 %v4112_v61, %v3920_v24  ;;  %v3922_v18 = vadd.f32 %v3921_v47, %v8154_v6 }
 0x33f   :  { %v3923_v54 = vpop.f32.mrf.mxu0  ;;  %v4116_v57 = vpop.f32.mrf.mxu1 }
 0x340   :  { %9314 = vst [vmem:[#allocation75_spill] sm:$0xff] %v8348_v58  ;;  %v8351_v16 = vadd.f32 %v4114_v39, %v3922_v18  ;;  %v3924_v30 = vadd.f32 %v3923_v54, %v8158_v50 }
 0x341   :  { %v3927_v27 = vpop.f32.mrf.mxu0  ;;  %v4120_v3 = vpop.f32.mrf.mxu1 }
 0x342   :  { %9315 = vst [vmem:[#allocation54_spill] sm:$0xff] %v8351_v16  ;;  %v8354_v8 = vadd.f32 %v4116_v57, %v3924_v30  ;;  %v3928_v49 = vadd.f32 %v3927_v27, %v8154_v6 }
 0x343   :  { %v3929_v38 = vpop.f32.mrf.mxu0  ;;  %v4122_v61 = vpop.f32.mrf.mxu1 }
 0x344   :  { %9316 = vst [vmem:[#allocation76_spill] sm:$0xff] %v8354_v8  ;;  %v8357_v56 = vadd.f32 %v4120_v3, %v3928_v49  ;;  %v3930_v24 = vadd.f32 %v3929_v38, %v8158_v50 }
 0x345   :  { %v3931_v47 = vpop.f32.mrf.mxu0  ;;  %v4124_v39 = vpop.f32.mrf.mxu1 }
 0x346   :  { %9317 = vst [vmem:[#allocation77_spill] sm:$0xff] %v8357_v56  ;;  %v8360_v58 = vadd.f32 %v4122_v61, %v3930_v24  ;;  %v3932_v18 = vadd.f32 %v3931_v47, %v8154_v6 }
 0x347   :  { %v3933_v54 = vpop.f32.mrf.mxu0  ;;  %v4126_v57 = vpop.f32.mrf.mxu1 }
 0x348   :  { %9318 = vst [vmem:[#allocation78_spill] sm:$0xff] %v8360_v58  ;;  %v8363_v16 = vadd.f32 %v4124_v39, %v3932_v18  ;;  %v3934_v30 = vadd.f32 %v3933_v54, %v8158_v50 }
 0x349   :  { %v3937_v27 = vpop.f32.mrf.mxu0  ;;  %v4130_v3 = vpop.f32.mrf.mxu1 }
 0x34a   :  { %9319 = vst [vmem:[#allocation79_spill] sm:$0xff] %v8363_v16  ;;  %v8366_v8 = vadd.f32 %v4126_v57, %v3934_v30  ;;  %v3938_v49 = vadd.f32 %v3937_v27, %v8154_v6 }
 0x34b   :  { %v3939_v38 = vpop.f32.mrf.mxu0  ;;  %v4132_v61 = vpop.f32.mrf.mxu1 }
 0x34c   :  { %9320 = vst [vmem:[#allocation80_spill] sm:$0xff] %v8366_v8  ;;  %v8369_v56 = vadd.f32 %v4130_v3, %v3938_v49  ;;  %v3940_v24 = vadd.f32 %v3939_v38, %v8158_v50 }
 0x34d   :  { %v3941_v47 = vpop.f32.mrf.mxu0  ;;  %v4134_v39 = vpop.f32.mrf.mxu1 }
 0x34e   :  { %9321 = vst [vmem:[#allocation81_spill] sm:$0xff] %v8369_v56  ;;  %v8372_v58 = vadd.f32 %v4132_v61, %v3940_v24  ;;  %v3942_v18 = vadd.f32 %v3941_v47, %v8154_v6 }
 0x34f   :  { %v3943_v54 = vpop.f32.mrf.mxu0  ;;  %v4136_v57 = vpop.f32.mrf.mxu1 }
 0x350   :  { %9322 = vst [vmem:[#allocation82_spill] sm:$0xff] %v8372_v58  ;;  %v8375_v16 = vadd.f32 %v4134_v39, %v3942_v18  ;;  %v3944_v30 = vadd.f32 %v3943_v54, %v8158_v50 }
 0x351   :  { %v3947_v27 = vpop.f32.mrf.mxu0  ;;  %v4140_v3 = vpop.f32.mrf.mxu1 }
 0x352   :  { %9323 = vst [vmem:[#allocation83_spill] sm:$0xff] %v8375_v16  ;;  %v8378_v8 = vadd.f32 %v4136_v57, %v3944_v30  ;;  %v3948_v49 = vadd.f32 %v3947_v27, %v8154_v6 }
 0x353   :  { %v3949_v38 = vpop.f32.mrf.mxu0  ;;  %v4142_v61 = vpop.f32.mrf.mxu1 }
 0x354   :  { %9324 = vst [vmem:[#allocation84_spill] sm:$0xff] %v8378_v8  ;;  %v8381_v56 = vadd.f32 %v4140_v3, %v3948_v49  ;;  %v3950_v24 = vadd.f32 %v3949_v38, %v8158_v50 }
 0x355   :  { %v3951_v47 = vpop.f32.mrf.mxu0  ;;  %v4144_v39 = vpop.f32.mrf.mxu1 }
 0x356   :  { %9325 = vst [vmem:[#allocation85_spill] sm:$0xff] %v8381_v56  ;;  %v8384_v58 = vadd.f32 %v4142_v61, %v3950_v24  ;;  %v3952_v18 = vadd.f32 %v3951_v47, %v8154_v6  ;;  %v5771_v24 = vld [vmem:[%s8731_s5] sm:$0xf] }
 0x357   :  { %v3953_v54 = vpop.f32.mrf.mxu0  ;;  %v4146_v57 = vpop.f32.mrf.mxu1  ;;  %v8397_v6 = vrot.slane %v5771_v24, %v9260_v19 }
 0x358   :  { %v8387_v16 = vadd.f32 %v4144_v39, %v3952_v18  ;;  %v3954_v30 = vadd.f32 %v3953_v54, %v8158_v50 }
 0x359   :  { %v4183_v27 = vpop.f32.mrf.mxu0  ;;  %v4376_v3 = vpop.f32.mrf.mxu1 }
 0x35a   :  { %9326 = vst [vmem:[#allocation86_spill] sm:$0xff] %v8387_v16  ;;  %v8390_v8 = vadd.f32 %v4146_v57, %v3954_v30  ;;  %v4184_v49 = vadd.f32 %v4183_v27, %v8169_v53  ;;  %v8402_v53 = vrot.slane %v5771_v24, %v9262_v35 }
 0x35b   :  { %v4185_v38 = vpop.f32.mrf.mxu0  ;;  %v4378_v47 = vpop.f32.mrf.mxu1 }
 0x35c   :  { %9327 = vst [vmem:[#allocation87_spill] sm:$0xff] %v8390_v8  ;;  %v4377_v56 = vadd.f32 %v4376_v3, %v4184_v49  ;;  %v4186_v61 = vadd.f32 %v4185_v38, %v8176_v13 }
 0x35d   :  { %v4187_v50 = vpop.f32.mrf.mxu0  ;;  %v4380_v30 = vpop.f32.mrf.mxu1 }
 0x35e   :  { %v4537_v18 = vmax.f32 %v4377_v56, 0.0  ;;  %v4379_v39 = vadd.f32 %v4378_v47, %v4186_v61  ;;  %v4188_v54 = vadd.f32 %v4187_v50, %v8179_v4 }
 0x35f   :  { %v4189_v57 = vpop.f32.mrf.mxu0  ;;  %v4382_v8 = vpop.f32.mrf.mxu1 }
 0x360   :  { %v4687_v27 = vmul.f32 %v8397_v6, %v4537_v18  ;;  %v4538_v49 = vmax.f32 %v4379_v39, 0.0  ;;  %v4381_v3 = vadd.f32 %v4380_v30, %v4188_v54  ;;  %v4190_v19 = vadd.f32 %v4189_v57, %v8185_v7 }
 0x361   :  { %v4193_v16 = vpop.f32.mrf.mxu0  ;;  %v4386_v61 = vpop.f32.mrf.mxu1 }
 0x362   :  { %v4541_v13 = vmax.f32 %v4381_v3, 0.0  ;;  %v4383_v38 = vadd.f32 %v4382_v8, %v4190_v19  ;;  %v4194_v56 = vadd.f32 %v4193_v16, %v8191_v40  ;;  %v4688_v4 = vmul.f32 %v8402_v53, %v4538_v49 }
 0x363   :  { %v4195_v47 = vpop.f32.mrf.mxu0  ;;  %v4814_v35 = vadd.f32 %v7921_v43, %v4687_v27  ;;  %v4388_v54 = vpop.f32.mrf.mxu1 }
 0x364   :  { %v4691_v24 = vmul.f32 %v8397_v6, %v4541_v13  ;;  %v4542_v50 = vmax.f32 %v4383_v38, 0.0  ;;  %v4387_v18 = vadd.f32 %v4386_v61, %v4194_v56  ;;  %v4196_v39 = vadd.f32 %v4195_v47, %v8194_v22 }
 0x365   :  { %v4197_v7 = vpop.f32.mrf.mxu0  ;;  %v4815_v30 = vadd.f32 %v4814_v35, %v4688_v4  ;;  %v4390_v40 = vpop.f32.mrf.mxu1 }
 0x366   :  { %v4692_v57 = vmul.f32 %v8402_v53, %v4542_v50  ;;  %v4545_v8 = vmax.f32 %v4387_v18, 0.0  ;;  %v4389_v3 = vadd.f32 %v4388_v54, %v4196_v39  ;;  %v4198_v16 = vadd.f32 %v4197_v7, %v8197_v63 }
 0x367   :  { %4816 = vadd.xlane.f32.xlu0 %v4815_v30  ;;  %v4199_v49 = vpop.f32.mrf.mxu0  ;;  %v4819_v43 = vadd.f32 %v7928_v45, %v4691_v24  ;;  %v4392_v38 = vpop.f32.mrf.mxu1 }
 0x368   :  { %v4695_v27 = vmul.f32 %v8397_v6, %v4545_v8  ;;  %v4546_v19 = vmax.f32 %v4389_v3, 0.0  ;;  %v4391_v13 = vadd.f32 %v4390_v40, %v4198_v16  ;;  %v4200_v22 = vadd.f32 %v4199_v49, %v8201_v26 }
 0x369   :  { %v4203_v56 = vpop.f32.mrf.mxu0  ;;  %v4820_v61 = vadd.f32 %v4819_v43, %v4692_v57  ;;  %v4396_v50 = vpop.f32.mrf.mxu1 }
 0x36a   :  { %v4549_v4 = vmax.f32 %v4391_v13, 0.0  ;;  %v4393_v47 = vadd.f32 %v4392_v38, %v4200_v22  ;;  %v4204_v35 = vadd.f32 %v4203_v56, %v8207_v44  ;;  %v4696_v63 = vmul.f32 %v8402_v53, %v4546_v19 }
 0x36b   :  { %4821 = vadd.xlane.f32.xlu0 %v4820_v61  ;;  %v4205_v18 = vpop.f32.mrf.mxu0  ;;  %v4824_v45 = vadd.f32 %v7937_v29, %v4695_v27  ;;  %v4398_v7 = vpop.f32.mrf.mxu1 }
 0x36c   :  { %v4699_v24 = vmul.f32 %v8397_v6, %v4549_v4  ;;  %v4550_v39 = vmax.f32 %v4393_v47, 0.0  ;;  %v4397_v54 = vadd.f32 %v4396_v50, %v4204_v35  ;;  %v4206_v26 = vadd.f32 %v4205_v18, %v8210_v9 }
 0x36d   :  { %v4207_v30 = vpop.f32.mrf.mxu0  ;;  %v4825_v57 = vadd.f32 %v4824_v45, %v4696_v63  ;;  %v4400_v40 = vpop.f32.mrf.mxu1 }
 0x36e   :  { %v4700_v8 = vmul.f32 %v8402_v53, %v4550_v39  ;;  %v4553_v3 = vmax.f32 %v4397_v54, 0.0  ;;  %v4399_v44 = vadd.f32 %v4398_v7, %v4206_v26  ;;  %v4208_v16 = vadd.f32 %v4207_v30, %v8213_v14 }
 0x36f   :  { %4826 = vadd.xlane.f32.xlu1 %v4825_v57  ;;  %v4209_v49 = vpop.f32.mrf.mxu0  ;;  %v4829_v29 = vadd.f32 %v7945_v55, %v4699_v24  ;;  %v4402_v13 = vpop.f32.mrf.mxu1 }
 0x370   :  { %v4703_v43 = vmul.f32 %v8397_v6, %v4553_v3  ;;  %v4554_v27 = vmax.f32 %v4399_v44, 0.0  ;;  %v4401_v19 = vadd.f32 %v4400_v40, %v4208_v16  ;;  %v4210_v9 = vadd.f32 %v4209_v49, %v8217_v59 }
 0x371   :  { %v4213_v22 = vpop.f32.mrf.mxu0  ;;  %v4830_v38 = vadd.f32 %v4829_v29, %v4700_v8  ;;  %v4406_v47 = vpop.f32.mrf.mxu1 }
 0x372   :  { %v4704_v56 = vmul.f32 %v8402_v53, %v4554_v27  ;;  %v4557_v61 = vmax.f32 %v4401_v19, 0.0  ;;  %v4403_v4 = vadd.f32 %v4402_v13, %v4210_v9  ;;  %v4214_v14 = vadd.f32 %v4213_v22, %v8223_v41 }
 0x373   :  { %4831 = vadd.xlane.f32.xlu1 %v4830_v38  ;;  %v4215_v35 = vpop.f32.mrf.mxu0  ;;  %v4834_v55 = vadd.f32 %v7952_v5, %v4703_v43  ;;  %v4408_v45 = vpop.f32.mrf.mxu1 }
 0x374   :  { %v4707_v50 = vmul.f32 %v8397_v6, %v4557_v61  ;;  %v4558_v63 = vmax.f32 %v4403_v4, 0.0  ;;  %v4407_v18 = vadd.f32 %v4406_v47, %v4214_v14  ;;  %v4216_v59 = vadd.f32 %v4215_v35, %v8226_v32 }
 0x375   :  { %v4217_v24 = vpop.f32.mrf.mxu0  ;;  %v4835_v39 = vadd.f32 %v4834_v55, %v4704_v56  ;;  %v4410_v30 = vpop.f32.mrf.mxu1 }
 0x376   :  { %v4708_v54 = vmul.f32 %v8402_v53, %v4558_v63  ;;  %v4561_v26 = vmax.f32 %v4407_v18, 0.0  ;;  %v4409_v7 = vadd.f32 %v4408_v45, %v4216_v59  ;;  %v4218_v41 = vadd.f32 %v4217_v24, %v8229_v60 }
 0x377   :  { %4836 = vadd.xlane.f32.xlu0 %v4835_v39  ;;  %v4219_v57 = vpop.f32.mrf.mxu0  ;;  %v4839_v5 = vadd.f32 %v7959_v28, %v4707_v50  ;;  %v4412_v16 = vpop.f32.mrf.mxu1 }
 0x378   :  { %v4711_v8 = vmul.f32 %v8397_v6, %v4561_v26  ;;  %v4562_v3 = vmax.f32 %v4409_v7, 0.0  ;;  %v4411_v44 = vadd.f32 %v4410_v30, %v4218_v41  ;;  %v4220_v32 = vadd.f32 %v4219_v57, %v8233_v0 }
 0x379   :  { %v4223_v40 = vpop.f32.mrf.mxu0  ;;  %v4840_v49 = vadd.f32 %v4839_v5, %v4708_v54  ;;  %v4416_v19 = vpop.f32.mrf.mxu1 }
 0x37a   :  { %v4712_v29 = vmul.f32 %v8402_v53, %v4562_v3  ;;  %v4565_v43 = vmax.f32 %v4411_v44, 0.0  ;;  %v4413_v27 = vadd.f32 %v4412_v16, %v4220_v32  ;;  %v4224_v60 = vadd.f32 %v4223_v40, %v8239_v15 }
 0x37b   :  { %4841 = vadd.xlane.f32.xlu1 %v4840_v49  ;;  %v4225_v9 = vpop.f32.mrf.mxu0  ;;  %v4844_v28 = vadd.f32 %v7969_v1, %v4711_v8  ;;  %v4418_v56 = vpop.f32.mrf.mxu1 }
 0x37c   :  { %v4715_v13 = vmul.f32 %v8397_v6, %v4565_v43  ;;  %v4566_v22 = vmax.f32 %v4413_v27, 0.0  ;;  %v4417_v38 = vadd.f32 %v4416_v19, %v4224_v60  ;;  %v4226_v0 = vadd.f32 %v4225_v9, %v8242_v51 }
 0x37d   :  { %v4227_v61 = vpop.f32.mrf.mxu0  ;;  %v4845_v4 = vadd.f32 %v4844_v28, %v4712_v29  ;;  %v4420_v55 = vpop.f32.mrf.mxu1 }
 0x37e   :  { %v4716_v14 = vmul.f32 %v8402_v53, %v4566_v22  ;;  %v4569_v47 = vmax.f32 %v4417_v38, 0.0  ;;  %v4419_v35 = vadd.f32 %v4418_v56, %v4226_v0  ;;  %v4228_v15 = vadd.f32 %v4227_v61, %v8245_v52 }
 0x37f   :  { %4846 = vadd.xlane.f32.xlu0 %v4845_v4  ;;  %v4229_v50 = vpop.f32.mrf.mxu0  ;;  %v4849_v1 = vadd.f32 %v7977_v37, %v4715_v13  ;;  %v4422_v45 = vpop.f32.mrf.mxu1 }
 0x380   :  { %v4719_v63 = vmul.f32 %v8397_v6, %v4569_v47  ;;  %v4570_v18 = vmax.f32 %v4419_v35, 0.0  ;;  %v4421_v59 = vadd.f32 %v4420_v55, %v4228_v15  ;;  %v4230_v51 = vadd.f32 %v4229_v50, %v8249_v23 }
 0x381   :  { %v4233_v24 = vpop.f32.mrf.mxu0  ;;  %v4850_v39 = vadd.f32 %v4849_v1, %v4716_v14  ;;  %v4426_v41 = vpop.f32.mrf.mxu1 }
 0x382   :  { %v4720_v54 = vmul.f32 %v8402_v53, %v4570_v18  ;;  %v4573_v26 = vmax.f32 %v4421_v59, 0.0  ;;  %v4423_v7 = vadd.f32 %v4422_v45, %v4230_v51  ;;  %v4234_v52 = vadd.f32 %v4233_v24, %v8255_v20 }
 0x383   :  { %4851 = vadd.xlane.f32.xlu1 %v4850_v39  ;;  %v4235_v30 = vpop.f32.mrf.mxu0  ;;  %v4854_v37 = vadd.f32 %v7984_v46, %v4719_v63  ;;  %v4428_v3 = vpop.f32.mrf.mxu1 }
 0x384   :  { %v4723_v57 = vmul.f32 %v8397_v6, %v4573_v26  ;;  %v4574_v5 = vmax.f32 %v4423_v7, 0.0  ;;  %v4427_v8 = vadd.f32 %v4426_v41, %v4234_v52  ;;  %v4236_v23 = vadd.f32 %v4235_v30, %v8258_v48 }
 0x385   :  { %v4237_v44 = vpop.f32.mrf.mxu0  ;;  %v4855_v32 = vadd.f32 %v4854_v37, %v4720_v54  ;;  %v4430_v29 = vpop.f32.mrf.mxu1 }
 0x386   :  { %v4724_v16 = vmul.f32 %v8402_v53, %v4574_v5  ;;  %v4577_v40 = vmax.f32 %v4427_v8, 0.0  ;;  %v4429_v49 = vadd.f32 %v4428_v3, %v4236_v23  ;;  %v4238_v20 = vadd.f32 %v4237_v44, %v8261_v36 }
 0x387   :  { %4856 = vadd.xlane.f32.xlu0 %v4855_v32  ;;  %v4239_v43 = vpop.f32.mrf.mxu0  ;;  %v4859_v46 = vadd.f32 %v7991_v17, %v4723_v57  ;;  %v4432_v9 = vpop.f32.mrf.mxu1 }
 0x388   :  { %v4727_v27 = vmul.f32 %v8397_v6, %v4577_v40  ;;  %v4578_v60 = vmax.f32 %v4429_v49, 0.0  ;;  %v4431_v19 = vadd.f32 %v4430_v29, %v4238_v20  ;;  %v4240_v48 = vadd.f32 %v4239_v43, %v8265_v33  ;;  %v9328_v29 = vld [vmem:[#allocation42_spill] sm:$0xff] }
 0x389   :  { %v4243_v28 = vpop.f32.mrf.mxu0  ;;  %v4860_v13 = vadd.f32 %v4859_v46, %v4724_v16  ;;  %v4436_v56 = vpop.f32.mrf.mxu1 }
 0x38a   :  { %v4728_v22 = vmul.f32 %v8402_v53, %v4578_v60  ;;  %v4581_v38 = vmax.f32 %v4431_v19, 0.0  ;;  %v4433_v0 = vadd.f32 %v4432_v9, %v4240_v48  ;;  %v4244_v36 = vadd.f32 %v4243_v28, %v8271_v11  ;;  %v9329_v60 = vld [vmem:[#allocation10_spill] sm:$0xff] }
 0x38b   :  { %4861 = vadd.xlane.f32.xlu1 %v4860_v13  ;;  %v4245_v61 = vpop.f32.mrf.mxu0  ;;  %v4864_v17 = vadd.f32 %v8001_v31, %v4727_v27  ;;  %v4438_v35 = vpop.f32.mrf.mxu1 }
 0x38c   :  { %v4731_v4 = vmul.f32 %v8397_v6, %v4581_v38  ;;  %v4582_v14 = vmax.f32 %v4433_v0, 0.0  ;;  %v4437_v47 = vadd.f32 %v4436_v56, %v4244_v36  ;;  %v4246_v33 = vadd.f32 %v4245_v61, %v8274_v10  ;;  %v9330_v38 = vld [vmem:[#allocation61_spill] sm:$0xff]  ;;  %v9331_v56 = vld [vmem:[#allocation43_spill] sm:$0xff] }
 0x38d   :  { %v4247_v15 = vpop.f32.mrf.mxu0  ;;  %v4865_v55 = vadd.f32 %v4864_v17, %v4728_v22  ;;  %v4440_v18 = vpop.f32.mrf.mxu1 }
 0x38e   :  { %v4732_v50 = vmul.f32 %v8402_v53, %v4582_v14  ;;  %v4585_v1 = vmax.f32 %v4437_v47, 0.0  ;;  %v4439_v63 = vadd.f32 %v4438_v35, %v4246_v33  ;;  %v4248_v11 = vadd.f32 %v4247_v15, %v8277_v21  ;;  %v9332_v47 = vld [vmem:[#allocation62_spill] sm:$0xff] }
 0x38f   :  { %4866 = vadd.xlane.f32.xlu0 %v4865_v55  ;;  %v4249_v59 = vpop.f32.mrf.mxu0  ;;  %v4869_v31 = vadd.f32 %v8009_v34, %v4731_v4  ;;  %v4442_v39 = vpop.f32.mrf.mxu1 }
 0x390   :  { %v4735_v51 = vmul.f32 %v8397_v6, %v4585_v1  ;;  %v4586_v45 = vmax.f32 %v4439_v63, 0.0  ;;  %v4441_v24 = vadd.f32 %v4440_v18, %v4248_v11  ;;  %v4250_v10 = vadd.f32 %v4249_v59, %v8281_v25  ;;  %v9333_v11 = vld [vmem:[#allocation63_spill] sm:$0xff] }
 0x391   :  { %v4253_v54 = vpop.f32.mrf.mxu0  ;;  %v4870_v26 = vadd.f32 %v4869_v31, %v4732_v50  ;;  %v4446_v30 = vpop.f32.mrf.mxu1 }
 0x392   :  { %v4736_v7 = vmul.f32 %v8402_v53, %v4586_v45  ;;  %v4589_v52 = vmax.f32 %v4441_v24, 0.0  ;;  %v4443_v41 = vadd.f32 %v4442_v39, %v4250_v10  ;;  %v4254_v21 = vadd.f32 %v4253_v54, %v8285_v62  ;;  %v9335_v54 = vld [vmem:[#allocation64_spill] sm:$0xff] }
 0x393   :  { %4871 = vadd.xlane.f32.xlu1 %v4870_v26  ;;  %v4255_v37 = vpop.f32.mrf.mxu0  ;;  %v4874_v34 = vadd.f32 %v8016_v12, %v4735_v51  ;;  %v4448_v23 = vpop.f32.mrf.mxu1  ;;  %v9334_v51 = vld [vmem:[#allocation45_spill] sm:$0xff] }
 0x394   :  { %v4739_v57 = vmul.f32 %v8397_v6, %v4589_v52  ;;  %v4590_v5 = vmax.f32 %v4443_v41, 0.0  ;;  %v4447_v8 = vadd.f32 %v4446_v30, %v4254_v21  ;;  %v4256_v25 = vadd.f32 %v4255_v37, %v8288_v2 }
 0x395   :  { %v4257_v3 = vpop.f32.mrf.mxu0  ;;  %v4875_v44 = vadd.f32 %v4874_v34, %v4736_v7  ;;  %v4450_v49 = vpop.f32.mrf.mxu1  ;;  %v9336_v34 = vld [vmem:[#allocation65_spill] sm:$0xff] }
 0x396   :  { %v4740_v32 = vmul.f32 %v8402_v53, %v4590_v5  ;;  %v4593_v16 = vmax.f32 %v4447_v8, 0.0  ;;  %v4449_v40 = vadd.f32 %v4448_v23, %v4256_v25  ;;  %v4258_v62 = vadd.f32 %v4257_v3, %v8291_v42  ;;  %v9337_v25 = vld [vmem:[#allocation46_spill] sm:$0xff] }
 0x397   :  { %4876 = vadd.xlane.f32.xlu0 %v4875_v44  ;;  %v4259_v20 = vpop.f32.mrf.mxu0  ;;  %v4879_v12 = vadd.f32 %v9328_v29, %v4739_v57  ;;  %v4452_v19 = vpop.f32.mrf.mxu1 }
 0x398   :  { %v4743_v43 = vmul.f32 %v8397_v6, %v4593_v16  ;;  %v4594_v46 = vmax.f32 %v4449_v40, 0.0  ;;  %v4451_v27 = vadd.f32 %v4450_v49, %v4258_v62  ;;  %v4260_v2 = vadd.f32 %v4259_v20, %v9329_v60  ;;  %v9338_v16 = vld [vmem:[#allocation66_spill] sm:$0xff] }
 0x399   :  { %v4263_v48 = vpop.f32.mrf.mxu0  ;;  %v4880_v9 = vadd.f32 %v4879_v12, %v4740_v32  ;;  %v4456_v0 = vpop.f32.mrf.mxu1 }
 0x39a   :  { %v4744_v28 = vmul.f32 %v8402_v53, %v4594_v46  ;;  %v4597_v13 = vmax.f32 %v4451_v27, 0.0  ;;  %v4453_v22 = vadd.f32 %v4452_v19, %v4260_v2  ;;  %v4264_v42 = vadd.f32 %v4263_v48, %v9330_v38  ;;  %v9339_v46 = vld [vmem:[#allocation67_spill] sm:$0xff] }
 0x39b   :  { %4881 = vadd.xlane.f32.xlu1 %v4880_v9  ;;  %v4265_v36 = vpop.f32.mrf.mxu0  ;;  %v4884_v61 = vadd.f32 %v9331_v56, %v4743_v43  ;;  %v4458_v35 = vpop.f32.mrf.mxu1  ;;  %v9340_v19 = vld [vmem:[#allocation11_spill] sm:$0xff] }
 0x39c   :  { %v4747_v17 = vmul.f32 %v8397_v6, %v4597_v13  ;;  %v4598_v4 = vmax.f32 %v4453_v22, 0.0  ;;  %v4457_v14 = vadd.f32 %v4456_v0, %v4264_v42  ;;  %v4266_v33 = vadd.f32 %v4265_v36, %v9332_v47  ;;  %v9341_v22 = vld [vmem:[#allocation68_spill] sm:$0xff] }
 0x39d   :  { %v4267_v15 = vpop.f32.mrf.mxu0  ;;  %v4885_v55 = vadd.f32 %v4884_v61, %v4744_v28  ;;  %v4460_v59 = vpop.f32.mrf.mxu1 }
 0x39e   :  { %v4748_v50 = vmul.f32 %v8402_v53, %v4598_v4  ;;  %v4601_v1 = vmax.f32 %v4457_v14, 0.0  ;;  %v4459_v63 = vadd.f32 %v4458_v35, %v4266_v33  ;;  %v4268_v18 = vadd.f32 %v4267_v15, %v9333_v11  ;;  %v9342_v4 = vld [vmem:[#allocation14_spill] sm:$0xff]  ;;  %v9343_v35 = vld [vmem:[#allocation15_spill] sm:$0xff] }
 0x39f   :  { %4886 = vadd.xlane.f32.xlu0 %v4885_v55  ;;  %v4269_v31 = vpop.f32.mrf.mxu0  ;;  %v4889_v45 = vadd.f32 %v9334_v51, %v4747_v17  ;;  %v4462_v7 = vpop.f32.mrf.mxu1 }
 0x3a0   :  { %v4751_v24 = vmul.f32 %v8397_v6, %v4601_v1  ;;  %v4602_v10 = vmax.f32 %v4459_v63, 0.0  ;;  %v4461_v39 = vadd.f32 %v4460_v59, %v4268_v18  ;;  %v4270_v26 = vadd.f32 %v4269_v31, %v9335_v54  ;;  %v9344_v63 = vld [vmem:[#allocation69_spill] sm:$0xff] }
 0x3a1   :  { %v4273_v52 = vpop.f32.mrf.mxu0  ;;  %v4890_v41 = vadd.f32 %v4889_v45, %v4748_v50  ;;  %v4466_v5 = vpop.f32.mrf.mxu1 }
 0x3a2   :  { %v4752_v21 = vmul.f32 %v8402_v53, %v4602_v10  ;;  %v4605_v30 = vmax.f32 %v4461_v39, 0.0  ;;  %v4463_v37 = vadd.f32 %v4462_v7, %v4270_v26  ;;  %v4274_v57 = vadd.f32 %v4273_v52, %v9336_v34  ;;  %v9345_v10 = vld [vmem:[#allocation47_spill] sm:$0xff]  ;;  %v9346_v7 = vld [vmem:[#allocation48_spill] sm:$0xff] }
 0x3a3   :  { %4891 = vadd.xlane.f32.xlu1 %v4890_v41  ;;  %v4275_v8 = vpop.f32.mrf.mxu0  ;;  %v4894_v23 = vadd.f32 %v9337_v25, %v4751_v24  ;;  %v4468_v62 = vpop.f32.mrf.mxu1 }
 0x3a4   :  { %v4755_v3 = vmul.f32 %v8397_v6, %v4605_v30  ;;  %v4606_v44 = vmax.f32 %v4463_v37, 0.0  ;;  %v4467_v32 = vadd.f32 %v4466_v5, %v4274_v57  ;;  %v4276_v40 = vadd.f32 %v4275_v8, %v9338_v16  ;;  %v9347_v37 = vld [vmem:[#allocation44_spill] sm:$0xff] }
 0x3a5   :  { %v4277_v49 = vpop.f32.mrf.mxu0  ;;  %v4895_v20 = vadd.f32 %v4894_v23, %v4752_v21  ;;  %v4470_v60 = vpop.f32.mrf.mxu1 }
 0x3a6   :  { %v4756_v29 = vmul.f32 %v8402_v53, %v4606_v44  ;;  %v4609_v12 = vmax.f32 %v4467_v32, 0.0  ;;  %v4469_v43 = vadd.f32 %v4468_v62, %v4276_v40  ;;  %v4278_v27 = vadd.f32 %v4277_v49, %v9339_v46  ;;  %v9348_v44 = vld [vmem:[#allocation71_spill] sm:$0xff]  ;;  %v9349_v62 = vld [vmem:[#allocation50_spill] sm:$0xff] }
 0x3a7   :  { %4896 = vadd.xlane.f32.xlu0 %v4895_v20  ;;  %v4279_v2 = vpop.f32.mrf.mxu0  ;;  %v4899_v48 = vadd.f32 %v9340_v19, %v4755_v3  ;;  %v4472_v42 = vpop.f32.mrf.mxu1 }
 0x3a8   :  { %v4759_v9 = vmul.f32 %v8397_v6, %v4609_v12  ;;  %v4610_v28 = vmax.f32 %v4469_v43, 0.0  ;;  %v4471_v13 = vadd.f32 %v4470_v60, %v4278_v27  ;;  %v4280_v38 = vadd.f32 %v4279_v2, %v9341_v22  ;;  %v9350_v43 = vld [vmem:[#allocation20_spill] sm:$0xff] }
 0x3a9   :  { %v4283_v0 = vpop.f32.mrf.mxu0  ;;  %v4900_v36 = vadd.f32 %v4899_v48, %v4756_v29  ;;  %v4476_v47 = vpop.f32.mrf.mxu1 }
 0x3aa   :  { %v4760_v56 = vmul.f32 %v8402_v53, %v4610_v28  ;;  %v4613_v61 = vmax.f32 %v4471_v13, 0.0  ;;  %v4473_v17 = vadd.f32 %v4472_v42, %v4280_v38  ;;  %v4284_v14 = vadd.f32 %v4283_v0, %v9342_v4  ;;  %v9351_v28 = vld [vmem:[#allocation72_spill] sm:$0xff]  ;;  %v9352_v42 = vld [vmem:[#allocation51_spill] sm:$0xff] }
 0x3ab   :  { %4901 = vadd.xlane.f32.xlu1 %v4900_v36  ;;  %v4285_v33 = vpop.f32.mrf.mxu0  ;;  %v4904_v15 = vadd.f32 %v9343_v35, %v4759_v9  ;;  %v4478_v18 = vpop.f32.mrf.mxu1 }
 0x3ac   :  { %v4763_v55 = vmul.f32 %v8397_v6, %v4613_v61  ;;  %v4614_v50 = vmax.f32 %v4473_v17, 0.0  ;;  %v4477_v1 = vadd.f32 %v4476_v47, %v4284_v14  ;;  %v4286_v11 = vadd.f32 %v4285_v33, %v9344_v63  ;;  %v9353_v17 = vld [vmem:[#allocation73_spill] sm:$0xff] }
 0x3ad   :  { %v4287_v59 = vpop.f32.mrf.mxu0  ;;  %v4905_v31 = vadd.f32 %v4904_v15, %v4760_v56  ;;  %v4480_v54 = vpop.f32.mrf.mxu1 }
 0x3ae   :  { %v4764_v51 = vmul.f32 %v8402_v53, %v4614_v50  ;;  %v4617_v45 = vmax.f32 %v4477_v1, 0.0  ;;  %v4479_v24 = vadd.f32 %v4478_v18, %v4286_v11  ;;  %v4288_v39 = vadd.f32 %v4287_v59, %v9345_v10  ;;  %v9354_v50 = vld [vmem:[#allocation74_spill] sm:$0xff]  ;;  %v9355_v18 = vld [vmem:[#allocation17_spill] sm:$0xff] }
 0x3af   :  { %4906 = vadd.xlane.f32.xlu0 %v4905_v31  ;;  %v4289_v26 = vpop.f32.mrf.mxu0  ;;  %v4909_v52 = vadd.f32 %v9346_v7, %v4763_v55  ;;  %v4482_v57 = vpop.f32.mrf.mxu1 }
 0x3b0   :  { %v4767_v41 = vmul.f32 %v8397_v6, %v4617_v45  ;;  %v4618_v21 = vmax.f32 %v4479_v24, 0.0  ;;  %v4481_v30 = vadd.f32 %v4480_v54, %v4288_v39  ;;  %v4290_v34 = vadd.f32 %v4289_v26, %v9347_v37  ;;  %v9356_v24 = vld [vmem:[#allocation75_spill] sm:$0xff] }
 0x3b1   :  { %v4293_v5 = vpop.f32.mrf.mxu0  ;;  %v4910_v8 = vadd.f32 %v4909_v52, %v4764_v51  ;;  %v4486_v16 = vpop.f32.mrf.mxu1 }
 0x3b2   :  { %v4768_v25 = vmul.f32 %v8402_v53, %v4618_v21  ;;  %v4621_v23 = vmax.f32 %v4481_v30, 0.0  ;;  %v4483_v3 = vadd.f32 %v4482_v57, %v4290_v34  ;;  %v4294_v32 = vadd.f32 %v4293_v5, %v9348_v44  ;;  %v9357_v21 = vld [vmem:[#allocation54_spill] sm:$0xff]  ;;  %v9358_v57 = vld [vmem:[#allocation52_spill] sm:$0xff] }
 0x3b3   :  { %4911 = vadd.xlane.f32.xlu1 %v4910_v8  ;;  %v4295_v40 = vpop.f32.mrf.mxu0  ;;  %v4914_v49 = vadd.f32 %v9349_v62, %v4767_v41  ;;  %v4488_v27 = vpop.f32.mrf.mxu1 }
 0x3b4   :  { %v4771_v20 = vmul.f32 %v8397_v6, %v4621_v23  ;;  %v4622_v29 = vmax.f32 %v4483_v3, 0.0  ;;  %v4487_v12 = vadd.f32 %v4486_v16, %v4294_v32  ;;  %v4296_v46 = vadd.f32 %v4295_v40, %v9350_v43  ;;  %v9359_v3 = vld [vmem:[#allocation76_spill] sm:$0xff] }
 0x3b5   :  { %v4297_v60 = vpop.f32.mrf.mxu0  ;;  %v4915_v2 = vadd.f32 %v4914_v49, %v4768_v25  ;;  %v4490_v22 = vpop.f32.mrf.mxu1 }
 0x3b6   :  { %v4772_v19 = vmul.f32 %v8402_v53, %v4622_v29  ;;  %v4625_v48 = vmax.f32 %v4487_v12, 0.0  ;;  %v4489_v9 = vadd.f32 %v4488_v27, %v4296_v46  ;;  %v4298_v13 = vadd.f32 %v4297_v60, %v9351_v28  ;;  %v9360_v29 = vld [vmem:[#allocation77_spill] sm:$0xff] }
 0x3b7   :  { %4916 = vadd.xlane.f32.xlu0 %v4915_v2  ;;  %v4299_v38 = vpop.f32.mrf.mxu0  ;;  %v4919_v0 = vadd.f32 %v9352_v42, %v4771_v20  ;;  %v4492_v14 = vpop.f32.mrf.mxu1  ;;  %v9361_v27 = vld [vmem:[#allocation53_spill] sm:$0xff] }
 0x3b8   :  { %v4775_v36 = vmul.f32 %v8397_v6, %v4625_v48  ;;  %v4626_v56 = vmax.f32 %v4489_v9, 0.0  ;;  %v4491_v61 = vadd.f32 %v4490_v22, %v4298_v13  ;;  %v4300_v4 = vadd.f32 %v4299_v38, %v9353_v17  ;;  %v9362_v9 = vld [vmem:[#allocation78_spill] sm:$0xff] }
 0x3b9   :  { %v4303_v47 = vpop.f32.mrf.mxu0  ;;  %v4920_v33 = vadd.f32 %v4919_v0, %v4772_v19  ;;  %v4496_v63 = vpop.f32.mrf.mxu1 }
 0x3ba   :  { %v4776_v35 = vmul.f32 %v8402_v53, %v4626_v56  ;;  %v4629_v15 = vmax.f32 %v4491_v61, 0.0  ;;  %v4493_v55 = vadd.f32 %v4492_v14, %v4300_v4  ;;  %v4304_v1 = vadd.f32 %v4303_v47, %v9354_v50  ;;  %v9363_v56 = vld [vmem:[#allocation79_spill] sm:$0xff]  ;;  %v9364_v14 = vld [vmem:[#allocation25_spill] sm:$0xff] }
 0x3bb   :  { %4921 = vadd.xlane.f32.xlu1 %v4920_v33  ;;  %v4305_v11 = vpop.f32.mrf.mxu0  ;;  %v4924_v59 = vadd.f32 %v9355_v18, %v4775_v36  ;;  %v4498_v39 = vpop.f32.mrf.mxu1 }
 0x3bc   :  { %v4779_v31 = vmul.f32 %v8397_v6, %v4629_v15  ;;  %v4630_v51 = vmax.f32 %v4493_v55, 0.0  ;;  %v4497_v45 = vadd.f32 %v4496_v63, %v4304_v1  ;;  %v4306_v10 = vadd.f32 %v4305_v11, %v9356_v24  ;;  %v9365_v55 = vld [vmem:[#allocation80_spill] sm:$0xff] }
 0x3bd   :  { %v4307_v54 = vpop.f32.mrf.mxu0  ;;  %v4925_v26 = vadd.f32 %v4924_v59, %v4776_v35  ;;  %v4500_v37 = vpop.f32.mrf.mxu1 }
 0x3be   :  { %v4780_v7 = vmul.f32 %v8402_v53, %v4630_v51  ;;  %v4633_v52 = vmax.f32 %v4497_v45, 0.0  ;;  %v4499_v41 = vadd.f32 %v4498_v39, %v4306_v10  ;;  %v4308_v30 = vadd.f32 %v4307_v54, %v9357_v21  ;;  %v9366_v51 = vld [vmem:[#allocation81_spill] sm:$0xff]  ;;  %v9367_v39 = vld [vmem:[#allocation55_spill] sm:$0xff] }
 0x3bf   :  { %4926 = vadd.xlane.f32.xlu0 %v4925_v26  ;;  %v4309_v34 = vpop.f32.mrf.mxu0  ;;  %v4929_v5 = vadd.f32 %v9358_v57, %v4779_v31  ;;  %v4502_v32 = vpop.f32.mrf.mxu1 }
 0x3c0   :  { %v4783_v8 = vmul.f32 %v8397_v6, %v4633_v52  ;;  %v4634_v25 = vmax.f32 %v4499_v41, 0.0  ;;  %v4501_v23 = vadd.f32 %v4500_v37, %v4308_v30  ;;  %v4310_v44 = vadd.f32 %v4309_v34, %v9359_v3  ;;  %v9368_v41 = vld [vmem:[#allocation82_spill] sm:$0xff] }
 0x3c1   :  { %v4313_v16 = vpop.f32.mrf.mxu0  ;;  %v4930_v40 = vadd.f32 %v4929_v5, %v4780_v7  ;;  %v4506_v43 = vpop.f32.mrf.mxu1 }
 0x3c2   :  { %v4784_v62 = vmul.f32 %v8402_v53, %v4634_v25  ;;  %v4637_v49 = vmax.f32 %v4501_v23, 0.0  ;;  %v4503_v20 = vadd.f32 %v4502_v32, %v4310_v44  ;;  %v4314_v12 = vadd.f32 %v4313_v16, %v9360_v29  ;;  %v9369_v25 = vld [vmem:[#allocation83_spill] sm:$0xff] }
 0x3c3   :  { %4931 = vadd.xlane.f32.xlu1 %v4930_v40  ;;  %v4315_v46 = vpop.f32.mrf.mxu0  ;;  %v4934_v60 = vadd.f32 %v9361_v27, %v4783_v8  ;;  %v4508_v13 = vpop.f32.mrf.mxu1  ;;  %v9370_v32 = vld [vmem:[#allocation27_spill] sm:$0xff] }
 0x3c4   :  { %v4787_v2 = vmul.f32 %v8397_v6, %v4637_v49  ;;  %v4638_v19 = vmax.f32 %v4503_v20, 0.0  ;;  %v4507_v48 = vadd.f32 %v4506_v43, %v4314_v12  ;;  %v4316_v28 = vadd.f32 %v4315_v46, %v9362_v9  ;;  %v9371_v20 = vld [vmem:[#allocation84_spill] sm:$0xff] }
 0x3c5   :  { %v4317_v22 = vpop.f32.mrf.mxu0  ;;  %v4935_v38 = vadd.f32 %v4934_v60, %v4784_v62  ;;  %v4510_v17 = vpop.f32.mrf.mxu1 }
 0x3c6   :  { %v4788_v42 = vmul.f32 %v8402_v53, %v4638_v19  ;;  %v4641_v0 = vmax.f32 %v4507_v48, 0.0  ;;  %v4509_v36 = vadd.f32 %v4508_v13, %v4316_v28  ;;  %v4318_v61 = vadd.f32 %v4317_v22, %v9363_v56  ;;  %v9372_v19 = vld [vmem:[#allocation85_spill] sm:$0xff] }
 0x3c7   :  { %4936 = vadd.xlane.f32.xlu0 %v4935_v38  ;;  %v4319_v4 = vpop.f32.mrf.mxu0  ;;  %v4939_v47 = vadd.f32 %v9364_v14, %v4787_v2  ;;  %v4512_v1 = vpop.f32.mrf.mxu1  ;;  %v9373_v13 = vld [vmem:[#allocation57_spill] sm:$0xff] }
 0x3c8   :  { %v4791_v33 = vmul.f32 %v8397_v6, %v4641_v0  ;;  %v4642_v35 = vmax.f32 %v4509_v36, 0.0  ;;  %v4511_v15 = vadd.f32 %v4510_v17, %v4318_v61  ;;  %v4320_v50 = vadd.f32 %v4319_v4, %v9365_v55 }
 0x3c9   :  { %v4323_v63 = vpop.f32.mrf.mxu0  ;;  %v4940_v11 = vadd.f32 %v4939_v47, %v4788_v42  ;;  %v4516_v24 = vpop.f32.mrf.mxu1 }
 0x3ca   :  { %v4792_v18 = vmul.f32 %v8402_v53, %v4642_v35  ;;  %v4645_v59 = vmax.f32 %v4511_v15, 0.0  ;;  %v4513_v31 = vadd.f32 %v4512_v1, %v4320_v50  ;;  %v4324_v45 = vadd.f32 %v4323_v63, %v9366_v51  ;;  %v9375_v50 = vld [vmem:[#allocation58_spill] sm:$0xff] }
 0x3cb   :  { %4941 = vadd.xlane.f32.xlu1 %v4940_v11  ;;  %v4325_v10 = vpop.f32.mrf.mxu0  ;;  %v4944_v54 = vadd.f32 %v9367_v39, %v4791_v33  ;;  %v4518_v30 = vpop.f32.mrf.mxu1  ;;  %v9374_v33 = vld [vmem:[#allocation86_spill] sm:$0xff]  ;;  %v9377_v39 = vld [vmem:[#allocation59_spill] sm:$0xff] }
 0x3cc   :  { %v4795_v26 = vmul.f32 %v8397_v6, %v4645_v59  ;;  %v4646_v7 = vmax.f32 %v4513_v31, 0.0  ;;  %v4517_v52 = vadd.f32 %v4516_v24, %v4324_v45  ;;  %v4326_v21 = vadd.f32 %v4325_v10, %v9368_v41  ;;  %v9376_v59 = vld [vmem:[#allocation87_spill] sm:$0xff] }
 0x3cd   :  { %v4327_v37 = vpop.f32.mrf.mxu0  ;;  %v4945_v34 = vadd.f32 %v4944_v54, %v4792_v18  ;;  %v4520_v3 = vpop.f32.mrf.mxu1 }
 0x3ce   :  { %v4796_v57 = vmul.f32 %v8402_v53, %v4646_v7  ;;  %v4649_v5 = vmax.f32 %v4517_v52, 0.0  ;;  %v4519_v8 = vadd.f32 %v4518_v30, %v4326_v21  ;;  %v4328_v23 = vadd.f32 %v4327_v37, %v9369_v25  ;;  %v9378_v21 = vld [vmem:[#allocation60_spill] sm:$0xff] }
 0x3cf   :  { %4946 = vadd.xlane.f32.xlu0 %v4945_v34  ;;  %v4329_v44 = vpop.f32.mrf.mxu0  ;;  %v4949_v16 = vadd.f32 %v9370_v32, %v4795_v26  ;;  %v4522_v12 = vpop.f32.mrf.mxu1  ;;  %v8564_v34 = vstv %s8732_s6 }
 0x3d0   :  { %v4799_v40 = vmul.f32 %v8397_v6, %v4649_v5  ;;  %v4650_v62 = vmax.f32 %v4519_v8, 0.0  ;;  %v4521_v49 = vadd.f32 %v4520_v3, %v4328_v23  ;;  %v4330_v29 = vadd.f32 %v4329_v44, %v9371_v20 }
 0x3d1   :  { %v4333_v43 = vpop.f32.mrf.mxu0  ;;  %v4950_v46 = vadd.f32 %v4949_v16, %v4796_v57  ;;  %v4526_v9 = vpop.f32.mrf.mxu1 }
 0x3d2   :  { %v4800_v27 = vmul.f32 %v8402_v53, %v4650_v62  ;;  %v4653_v60 = vmax.f32 %v4521_v49, 0.0  ;;  %v4523_v2 = vadd.f32 %v4522_v12, %v4330_v29  ;;  %v4334_v48 = vadd.f32 %v4333_v43, %v9372_v19 }
 0x3d3   :  { %4951 = vadd.xlane.f32.xlu1 %v4950_v46  ;;  %v4335_v28 = vpop.f32.mrf.mxu0  ;;  %v4954_v22 = vadd.f32 %v9373_v13, %v4799_v40  ;;  %v4528_v56 = vpop.f32.mrf.mxu1 }
 0x3d4   :  { %v4803_v38 = vmul.f32 %v8397_v6, %v4653_v60  ;;  %v4654_v42 = vmax.f32 %v4523_v2, 0.0  ;;  %v4527_v0 = vadd.f32 %v4526_v9, %v4334_v48  ;;  %v4336_v36 = vadd.f32 %v4335_v28, %v8384_v58 }
 0x3d5   :  { %v4337_v61 = vpop.f32.mrf.mxu0  ;;  %v4955_v17 = vadd.f32 %v4954_v22, %v4800_v27  ;;  %v4530_v15 = vpop.f32.mrf.mxu1 }
 0x3d6   :  { %v4804_v4 = vmul.f32 %v8402_v53, %v4654_v42  ;;  %v4657_v14 = vmax.f32 %v4527_v0, 0.0  ;;  %v4529_v47 = vadd.f32 %v4528_v56, %v4336_v36  ;;  %v4338_v35 = vadd.f32 %v4337_v61, %v9374_v33 }
 0x3d7   :  { %4956 = vadd.xlane.f32.xlu0 %v4955_v17  ;;  %v4339_v55 = vpop.f32.mrf.mxu0  ;;  %v4959_v1 = vadd.f32 %v9375_v50, %v4803_v38  ;;  %v4532_v31 = vpop.f32.mrf.mxu1 }
 0x3d8   :  { %v4807_v63 = vmul.f32 %v8397_v6, %v4657_v14  ;;  %v4658_v11 = vmax.f32 %v4529_v47, 0.0  ;;  %v4531_v18 = vadd.f32 %v4530_v15, %v4338_v35  ;;  %v4340_v58 = vadd.f32 %v4339_v55, %v9376_v59 }
 0x3d9   :  { %v4960_v51 = vadd.f32 %v4959_v1, %v4804_v4 }
 0x3da   :  { %v4808_v45 = vmul.f32 %v8402_v53, %v4658_v11  ;;  %v4661_v24 = vmax.f32 %v4531_v18, 0.0  ;;  %v4533_v10 = vadd.f32 %v4532_v31, %v4340_v58  ;;  %v4964_v54 = vadd.f32 %v9377_v39, %v4807_v63 }
 0x3db   :  { %4961 = vadd.xlane.f32.xlu1 %v4960_v51 }
 0x3dc   :  { %v4811_v26 = vmul.f32 %v8397_v6, %v4661_v24  ;;  %v4662_v7 = vmax.f32 %v4533_v10, 0.0  ;;  %v4965_v52 = vadd.f32 %v4964_v54, %v4808_v45 }
 0x3de   :  { %v4812_v41 = vmul.f32 %v8402_v53, %v4662_v7  ;;  %4966 = vadd.xlane.f32.xlu0 %v4965_v52  ;;  %v4969_v30 = vadd.f32 %v9378_v21, %v4811_v26 }
 0x3e0   :  { %v4970_v37 = vadd.f32 %v4969_v30, %v4812_v41 }
 0x3e2   :  { %4971 = vadd.xlane.f32.xlu1 %v4970_v37 }
 0x3f0   :  { %v4817_v57 = vpop.xlane.xlu0 %4816 }
 0x3f1   :  { %v4975_v5 = vadd.f32 %v8564_v34, %v4817_v57 }
 0x3f3   :  { %5008 = vst.msk [vmem:[%s8733_s7] sm:$0xff] %vm5007_vm1, %v4975_v5 }
 0x3f4   :  { %v4822_v6 = vpop.xlane.xlu0 %4821 }
 0x3f5   :  { %v4976_v53 = vadd.f32 %v8564_v34, %v4822_v6 }
 0x3f7   :  { %5009 = vst.msk [vmem:[%s8733_s7 + $0x8] sm:$0xff] %vm5007_vm1, %v4976_v53 }
 0x3f8   :  { %v4827_v8 = vpop.xlane.xlu1 %4826 }
 0x3f9   :  { %v4977_v25 = vadd.f32 %v8564_v34, %v4827_v8 }
 0x3fb   :  { %5010 = vst.msk [vmem:[%s8733_s7 + $0x10] sm:$0xff] %vm5007_vm1, %v4977_v25 }
 0x3fc   :  { %v4832_v23 = vpop.xlane.xlu1 %4831 }
 0x3fd   :  { %v4978_v3 = vadd.f32 %v8564_v34, %v4832_v23 }
 0x3ff   :  { %5011 = vst.msk [vmem:[%s8733_s7 + $0x18] sm:$0xff] %vm5007_vm1, %v4978_v3 }
 0x400   :  { %v4837_v44 = vpop.xlane.xlu0 %4836 }
 0x401   :  { %v4979_v32 = vadd.f32 %v8564_v34, %v4837_v44 }
 0x403   :  { %5012 = vst.msk [vmem:[%s8733_s7 + $0x20] sm:$0xff] %vm5007_vm1, %v4979_v32 }
 0x404   :  { %v4842_v16 = vpop.xlane.xlu1 %4841 }
 0x405   :  { %v4980_v40 = vadd.f32 %v8564_v34, %v4842_v16 }
 0x407   :  { %5013 = vst.msk [vmem:[%s8733_s7 + $0x28] sm:$0xff] %vm5007_vm1, %v4980_v40 }
 0x408   :  { %v4847_v62 = vpop.xlane.xlu0 %4846 }
 0x409   :  { %v4981_v49 = vadd.f32 %v8564_v34, %v4847_v62 }
 0x40b   :  { %5014 = vst.msk [vmem:[%s8733_s7 + $0x30] sm:$0xff] %vm5007_vm1, %v4981_v49 }
 0x40c   :  { %v4852_v20 = vpop.xlane.xlu1 %4851 }
 0x40d   :  { %v4982_v29 = vadd.f32 %v8564_v34, %v4852_v20 }
 0x40f   :  { %5015 = vst.msk [vmem:[%s8733_s7 + $0x38] sm:$0xff] %vm5007_vm1, %v4982_v29 }
 0x410   :  { %v4857_v12 = vpop.xlane.xlu0 %4856 }
 0x411   :  { %v4983_v43 = vadd.f32 %v8564_v34, %v4857_v12 }
 0x413   :  { %5016 = vst.msk [vmem:[%s8733_s7 + $0x40] sm:$0xff] %vm5007_vm1, %v4983_v43 }
 0x414   :  { %v4862_v46 = vpop.xlane.xlu1 %4861 }
 0x415   :  { %v4984_v27 = vadd.f32 %v8564_v34, %v4862_v46 }
 0x417   :  { %5017 = vst.msk [vmem:[%s8733_s7 + $0x48] sm:$0xff] %vm5007_vm1, %v4984_v27 }
 0x418   :  { %v4867_v60 = vpop.xlane.xlu0 %4866 }
 0x419   :  { %v4985_v2 = vadd.f32 %v8564_v34, %v4867_v60 }
 0x41b   :  { %5018 = vst.msk [vmem:[%s8733_s7 + $0x50] sm:$0xff] %vm5007_vm1, %v4985_v2 }
 0x41c   :  { %v4872_v19 = vpop.xlane.xlu1 %4871 }
 0x41d   :  { %v4986_v48 = vadd.f32 %v8564_v34, %v4872_v19 }
 0x41f   :  { %5019 = vst.msk [vmem:[%s8733_s7 + $0x58] sm:$0xff] %vm5007_vm1, %v4986_v48 }
 0x420   :  { %v4877_v9 = vpop.xlane.xlu0 %4876 }
 0x421   :  { %v4987_v28 = vadd.f32 %v8564_v34, %v4877_v9 }
 0x423   :  { %5020 = vst.msk [vmem:[%s8733_s7 + $0x60] sm:$0xff] %vm5007_vm1, %v4987_v28 }
 0x424   :  { %v4882_v13 = vpop.xlane.xlu1 %4881 }
 0x425   :  { %v4988_v22 = vadd.f32 %v8564_v34, %v4882_v13 }
 0x427   :  { %5021 = vst.msk [vmem:[%s8733_s7 + $0x68] sm:$0xff] %vm5007_vm1, %v4988_v22 }
 0x428   :  { %v4887_v38 = vpop.xlane.xlu0 %4886 }
 0x429   :  { %v4989_v42 = vadd.f32 %v8564_v34, %v4887_v38 }
 0x42b   :  { %5022 = vst.msk [vmem:[%s8733_s7 + $0x70] sm:$0xff] %vm5007_vm1, %v4989_v42 }
 0x42c   :  { %v4892_v0 = vpop.xlane.xlu1 %4891 }
 0x42d   :  { %v4990_v36 = vadd.f32 %v8564_v34, %v4892_v0 }
 0x42f   :  { %5023 = vst.msk [vmem:[%s8733_s7 + $0x78] sm:$0xff] %vm5007_vm1, %v4990_v36 }
 0x430   :  { %v4897_v56 = vpop.xlane.xlu0 %4896 }
 0x431   :  { %v4991_v61 = vadd.f32 %v8564_v34, %v4897_v56 }
 0x433   :  { %5024 = vst.msk [vmem:[%s8733_s7 + $0x80] sm:$0xff] %vm5007_vm1, %v4991_v61 }
 0x434   :  { %v4902_v17 = vpop.xlane.xlu1 %4901 }
 0x435   :  { %v4992_v4 = vadd.f32 %v8564_v34, %v4902_v17 }
 0x437   :  { %5025 = vst.msk [vmem:[%s8733_s7 + $0x88] sm:$0xff] %vm5007_vm1, %v4992_v4 }
 0x438   :  { %v4907_v14 = vpop.xlane.xlu0 %4906 }
 0x439   :  { %v4993_v47 = vadd.f32 %v8564_v34, %v4907_v14 }
 0x43b   :  { %5026 = vst.msk [vmem:[%s8733_s7 + $0x90] sm:$0xff] %vm5007_vm1, %v4993_v47 }
 0x43c   :  { %v4912_v33 = vpop.xlane.xlu1 %4911 }
 0x43d   :  { %v4994_v35 = vadd.f32 %v8564_v34, %v4912_v33 }
 0x43f   :  { %5027 = vst.msk [vmem:[%s8733_s7 + $0x98] sm:$0xff] %vm5007_vm1, %v4994_v35 }
 0x440   :  { %v4917_v15 = vpop.xlane.xlu0 %4916 }
 0x441   :  { %v4995_v55 = vadd.f32 %v8564_v34, %v4917_v15 }
 0x443   :  { %5028 = vst.msk [vmem:[%s8733_s7 + $0xa0] sm:$0xff] %vm5007_vm1, %v4995_v55 }
 0x444   :  { %v4922_v50 = vpop.xlane.xlu1 %4921 }
 0x445   :  { %v4996_v1 = vadd.f32 %v8564_v34, %v4922_v50 }
 0x447   :  { %5029 = vst.msk [vmem:[%s8733_s7 + $0xa8] sm:$0xff] %vm5007_vm1, %v4996_v1 }
 0x448   :  { %v4927_v63 = vpop.xlane.xlu0 %4926 }
 0x449   :  { %v4997_v11 = vadd.f32 %v8564_v34, %v4927_v63 }
 0x44b   :  { %5030 = vst.msk [vmem:[%s8733_s7 + $0xb0] sm:$0xff] %vm5007_vm1, %v4997_v11 }
 0x44c   :  { %v4932_v18 = vpop.xlane.xlu1 %4931 }
 0x44d   :  { %v4998_v59 = vadd.f32 %v8564_v34, %v4932_v18 }
 0x44f   :  { %5031 = vst.msk [vmem:[%s8733_s7 + $0xb8] sm:$0xff] %vm5007_vm1, %v4998_v59 }
 0x450   :  { %v4937_v58 = vpop.xlane.xlu0 %4936 }
 0x451   :  { %v4999_v31 = vadd.f32 %v8564_v34, %v4937_v58 }
 0x453   :  { %5032 = vst.msk [vmem:[%s8733_s7 + $0xc0] sm:$0xff] %vm5007_vm1, %v4999_v31 }
 0x454   :  { %v4942_v51 = vpop.xlane.xlu1 %4941 }
 0x455   :  { %v5000_v45 = vadd.f32 %v8564_v34, %v4942_v51 }
 0x457   :  { %5033 = vst.msk [vmem:[%s8733_s7 + $0xc8] sm:$0xff] %vm5007_vm1, %v5000_v45 }
 0x458   :  { %v4947_v24 = vpop.xlane.xlu0 %4946 }
 0x459   :  { %v5001_v10 = vadd.f32 %v8564_v34, %v4947_v24 }
 0x45b   :  { %5034 = vst.msk [vmem:[%s8733_s7 + $0xd0] sm:$0xff] %vm5007_vm1, %v5001_v10 }
 0x45c   :  { %v4952_v39 = vpop.xlane.xlu1 %4951 }
 0x45d   :  { %v5002_v54 = vadd.f32 %v8564_v34, %v4952_v39 }
 0x45f   :  { %5035 = vst.msk [vmem:[%s8733_s7 + $0xd8] sm:$0xff] %vm5007_vm1, %v5002_v54 }
 0x460   :  { %v4957_v26 = vpop.xlane.xlu0 %4956 }
 0x461   :  { %v5003_v7 = vadd.f32 %v8564_v34, %v4957_v26 }
 0x463   :  { %5036 = vst.msk [vmem:[%s8733_s7 + $0xe0] sm:$0xff] %vm5007_vm1, %v5003_v7 }
 0x464   :  { %v4962_v52 = vpop.xlane.xlu1 %4961 }
 0x465   :  { %v5004_v41 = vadd.f32 %v8564_v34, %v4962_v52 }
 0x467   :  { %5037 = vst.msk [vmem:[%s8733_s7 + $0xe8] sm:$0xff] %vm5007_vm1, %v5004_v41  ;;  %v4967_v21 = vpop.xlane.xlu0 %4966 }
 0x468   :  { %v5005_v30 = vadd.f32 %v8564_v34, %v4967_v21 }
 0x46a   :  { %5038 = vst.msk [vmem:[%s8733_s7 + $0xf0] sm:$0xff] %vm5007_vm1, %v5005_v30 }
 0x46b   :  { %v4972_v37 = vpop.xlane.xlu1 %4971 }
 0x46c   :  { %v5006_v57 = vadd.f32 %v8564_v34, %v4972_v37 }
 0x46e   :  { %5039 = vst.msk [vmem:[%s8733_s7 + $0xf8] sm:$0xff] %vm5007_vm1, %v5006_v57 }
 0x46f   :  { %5044 = vsyncpa [#allocation4], 1 }

</bundles_post_ra>
